<compile_context>
chip_gen: v6e
topology: v6e:2x2x1
jax: 0.10.0
libtpu: 0.0.40
codegen_flags: <defaults>
</compile_context>

<pallas_src>
import jax
import jax.numpy as jnp
from jax.experimental import pallas as pl
from jax.experimental.pallas import tpu as pltpu

_BN_EPS = 1e-5
_LANE = 128        # lane width (channel padding target)
_SUBLANE = 8       # f32 sublane granularity (row-tile multiple)
_CIN_ALIGN = 128   # stage-1 input-channel padding (lane-aligned concat pieces)

try:  # budget scoped VMEM per generation (v7x: 64 MiB physical per TensorCore)
    _VMEM_CAP = int(pltpu.get_tpu_info().vmem_capacity_bytes)
except Exception:  # pragma: no cover - conservative fallback
    _VMEM_CAP = 64 * 1024 * 1024
_VMEM_LIMIT_BYTES = min(96 * 1024 * 1024, (_VMEM_CAP * 3) // 4)
_VMEM_BUDGET = int(0.8 * _VMEM_LIMIT_BYTES)
# Larger row tiles on 128 MiB-VMEM chips (v5e/v6e); conservative on v7x.
_TARGET_ROWS = 2048 if _VMEM_CAP >= 100 * 1024 * 1024 else 1024


def _round_up(x, m):
    return (x + m - 1) // m * m


def _est_stage_vmem(th, wd, cin_pad, co_pad):
    """Rough per-grid-step VMEM footprint (bytes) of the fused conv stage."""
    tm = th * wd
    b = 2 * th * wd * cin_pad * 2          # auto double-buffered input block
    b += 2 * tm * co_pad * 2               # auto double-buffered bf16 output block
    b += 9 * cin_pad * co_pad * 2          # resident weights
    b += 2 * 2 * wd * cin_pad * 2          # manual halo-row double buffer
    b += 4 * (th + 2) * wd * cin_pad * 2   # stitched slab + width-shifted concat
    b += tm * 3 * cin_pad * 2              # one live im2col(kw) patch
    b += 2 * tm * co_pad * 4               # f32 accumulator + temporaries
    return b + (2 << 20)


def _pick_h_tile(n, h, wd, cin_pad, co_pad):
    """Largest divisor TH of H with (TH*W)%8==0, rows<=target and VMEM-fitting."""
    divisors = [d for d in range(1, h + 1)
                if h % d == 0 and (d * wd) % _SUBLANE == 0]
    assert divisors, "H*W must be a multiple of 8"
    fits = [d for d in divisors
            if d * wd <= _TARGET_ROWS
            and _est_stage_vmem(d, wd, cin_pad, co_pad) <= _VMEM_BUDGET]
    if fits:
        if n == 1:  # keep >=2 grid steps so a 2-TensorCore chip is not forced idle
            split = [d for d in fits if h // d >= 2]
            if split:
                return max(split)
        return max(fits)
    return min(divisors)


def _pick_row_tile(m, cap=4096):
    """Row block for the final mem-bound BN+ReLU sweep (decoupled, larger)."""
    if m <= cap:
        return m
    best = _SUBLANE
    for d in range(_SUBLANE, cap + 1, _SUBLANE):
        if m % d == 0:
            best = d
    return best


# ----------------------------------------------------------------------------
# Fused conv stage kernel:
#   [optional: BN affine + ReLU of the previous stage applied to the input]
#   -> 3x3 same conv as 3 MXU matmuls (kw folded into K, f32 accumulation)
#   -> bf16 conv output + per-tile centred BatchNorm partial statistics.
# ----------------------------------------------------------------------------
def _make_conv_kernel(*, th, wd, cin_pad, co_pad, h, n_htiles, apply_act):
    tm = th * wd
    kdim = 3 * cin_pad

    def kernel(*refs):
        if apply_act:
            (xc_ref, xh_ref, w_ref, sc_ref, sh_ref,
             y_ref, psum_ref, pcss_ref, hbuf, sem) = refs
        else:
            (xc_ref, xh_ref, w_ref,
             y_ref, psum_ref, pcss_ref, hbuf, sem) = refs
            sc_ref = sh_ref = None

        i = pl.program_id(0)   # image index              (megacore-parallel)
        j = pl.program_id(1)   # row-tile within the image (sequential per core)

        # --- manual, double-buffered DMA of the two 1-pixel halo rows -------
        def _halo_copies(jj, slot):
            r0 = jj * th
            top_row = jnp.maximum(r0 - 1, 0)        # clamped; zeroed below at edges
            bot_row = jnp.minimum(r0 + th, h - 1)
            return (
                pltpu.make_async_copy(
                    xh_ref.at[pl.ds(i, 1), pl.ds(top_row, 1)],
                    hbuf.at[pl.ds(slot, 1), pl.ds(0, 1)],
                    sem.at[slot, 0]),
                pltpu.make_async_copy(
                    xh_ref.at[pl.ds(i, 1), pl.ds(bot_row, 1)],
                    hbuf.at[pl.ds(slot, 1), pl.ds(1, 1)],
                    sem.at[slot, 1]),
            )

        slot = j % 2

        @pl.when(j == 0)
        def _():                                    # prime the pipeline per image
            for cp in _halo_copies(j, slot):
                cp.start()

        for cp in _halo_copies(j, slot):            # halo rows for this tile
            cp.wait()

        @pl.when(j + 1 < n_htiles)
        def _():                                    # prefetch next tile's halo rows
            for cp in _halo_copies(j + 1, 1 - slot):
                cp.start()

        # --- fuse previous stage's BatchNorm affine + ReLU into the input ---
        if apply_act:
            sc = sc_ref[...].reshape(1, 1, cin_pad)
            sh = sh_ref[...].reshape(1, 1, cin_pad)

        def _prep(v, border_mul=None):
            if apply_act:
                v = jnp.maximum(v.astype(jnp.float32) * sc + sh, 0.0)
            if border_mul is not None:              # conv zero padding at image edge
                v = v.astype(jnp.float32) * border_mul
            if apply_act or border_mul is not None:
                v = v.astype(jnp.bfloat16)
            return v

        core = _prep(xc_ref[...].reshape(th, wd, cin_pad))
        hb = hbuf[slot]                                           # (2, wd, cin_pad)
        top = _prep(hb[0:1], (j > 0).astype(jnp.float32))
        bot = _prep(hb[1:2], (j < n_htiles - 1).astype(jnp.float32))
        slab = jnp.concatenate([top, core, bot], axis=0)          # (th+2, wd, cin)

        # --- width-shifted views (zero fill == conv width padding), built once
        zcol = jnp.zeros((th + 2, 1, cin_pad), jnp.bfloat16)
        s_l = jnp.concatenate([zcol, slab[:, :wd - 1, :]], axis=1)  # kw = 0
        s_r = jnp.concatenate([slab[:, 1:, :], zcol], axis=1)       # kw = 2
        ss = jnp.concatenate([s_l, slab, s_r], axis=-1)      # (th+2, wd, 3*cin_pad)

        # --- 3 MXU matmuls (kw folded into K), f32 accumulation -------------
        acc = jnp.zeros((tm, co_pad), jnp.float32)
        for kh in range(3):
            patch = ss[kh:kh + th].reshape(tm, kdim)
            acc = acc + jnp.dot(patch, w_ref[kh],
                                preferred_element_type=jnp.float32)

        # --- per-tile centred BatchNorm partials (no E[x^2]-E[x]^2 cancel) --
        tsum = jnp.sum(acc, axis=0, keepdims=True)                 # (1, co_pad)
        tmean = tsum * (1.0 / tm)
        tcss = jnp.sum(jnp.square(acc - tmean), axis=0, keepdims=True)
        psum_ref[...] = tsum.reshape(1, 1, 1, co_pad)
        pcss_ref[...] = tcss.reshape(1, 1, 1, co_pad)

        y_ref[...] = acc.astype(jnp.bfloat16).reshape(1, th, wd, co_pad)

    return kernel


def _conv_stage(x, wflat, in_scale=None, in_shift=None):
    """One fused stage.

    x:     (N, H, W, Cin_pad) bf16, spatially unpadded (halo handled in-kernel).
    wflat: (3, 3*Cin_pad, Co_pad) bf16 (kh major; rows kw-major / cin-minor).
    in_scale/in_shift: optional (1, Cin_pad) f32 BN affine of the previous
      stage, applied (with ReLU) on the fly to x.
    Returns: y (N, H, W, Co_pad) bf16 pre-BN conv output, and f32 per-channel
      (mean, biased var) over N*H*W.
    """
    n, h, wd, cin_pad = x.shape
    co_pad = wflat.shape[-1]
    apply_act = in_scale is not None

    th = _pick_h_tile(n, h, wd, cin_pad, co_pad)
    n_htiles = h // th
    tm = th * wd

    kernel = _make_conv_kernel(th=th, wd=wd, cin_pad=cin_pad, co_pad=co_pad,
                               h=h, n_htiles=n_htiles, apply_act=apply_act)

    in_specs = [
        pl.BlockSpec((1, th, wd, cin_pad), lambda i, j: (i, j, 0, 0)),   # core rows
        pl.BlockSpec(memory_space=pl.ANY),                               # halo src (HBM)
        pl.BlockSpec((3, 3 * cin_pad, co_pad), lambda i, j: (0, 0, 0)),  # weights
    ]
    args = [x, x, wflat]
    if apply_act:
        in_specs += [pl.BlockSpec((1, cin_pad), lambda i, j: (0, 0)),
                     pl.BlockSpec((1, cin_pad), lambda i, j: (0, 0))]
        args += [in_scale, in_shift]

    y, psum, pcss = pl.pallas_call(
        kernel,
        out_shape=(
            jax.ShapeDtypeStruct((n, h, wd, co_pad), jnp.bfloat16),
            jax.ShapeDtypeStruct((n, n_htiles, 1, co_pad), jnp.float32),
            jax.ShapeDtypeStruct((n, n_htiles, 1, co_pad), jnp.float32),
        ),
        grid=(n, n_htiles),
        in_specs=in_specs,
        out_specs=(
            pl.BlockSpec((1, th, wd, co_pad), lambda i, j: (i, j, 0, 0)),
            pl.BlockSpec((1, 1, 1, co_pad), lambda i, j: (i, j, 0, 0)),
            pl.BlockSpec((1, 1, 1, co_pad), lambda i, j: (i, j, 0, 0)),
        ),
        scratch_shapes=[
            pltpu.VMEM((2, 2, wd, cin_pad), jnp.bfloat16),  # halo-row double buffer
            pltpu.SemaphoreType.DMA((2, 2)),
        ],
        compiler_params=pltpu.CompilerParams(
            dimension_semantics=("parallel", "arbitrary"),
            vmem_limit_bytes=_VMEM_LIMIT_BYTES),
    )(*args)

    # Tiny O(num_tiles * Co) per-channel math in plain JAX: combine centred
    # per-tile partials (Chan's parallel-variance formula).
    m = float(n * h * wd)
    tile_sum = psum.reshape(-1, co_pad)
    tile_css = pcss.reshape(-1, co_pad)
    mean = jnp.sum(tile_sum, axis=0) / m
    tile_mean = tile_sum / float(tm)
    ss = jnp.sum(tile_css, axis=0) + float(tm) * jnp.sum(
        jnp.square(tile_mean - mean[None, :]), axis=0)
    var = jnp.maximum(ss / m, 0.0)      # biased (train-mode) variance
    return y, mean, var


# ----------------------------------------------------------------------------
# Final BN affine + ReLU sweep (only the last stage needs a standalone pass).
# ----------------------------------------------------------------------------
def _bn_relu_kernel(y_ref, scale_ref, shift_ref, o_ref):
    o_ref[...] = jnp.maximum(
        y_ref[...].astype(jnp.float32) * scale_ref[...] + shift_ref[...],
        0.0).astype(o_ref.dtype)


def _bn_relu_sweep(y2d, scale, shift, out_dtype):
    m, co_pad = y2d.shape
    tr = _pick_row_tile(m)
    return pl.pallas_call(
        _bn_relu_kernel,
        out_shape=jax.ShapeDtypeStruct((m, co_pad), out_dtype),
        grid=(m // tr,),
        in_specs=[pl.BlockSpec((tr, co_pad), lambda i: (i, 0)),
                  pl.BlockSpec((1, co_pad), lambda i: (0, 0)),
                  pl.BlockSpec((1, co_pad), lambda i: (0, 0))],
        out_specs=pl.BlockSpec((tr, co_pad), lambda i: (i, 0)),
        compiler_params=pltpu.CompilerParams(
            dimension_semantics=("parallel",),
            vmem_limit_bytes=_VMEM_LIMIT_BYTES),
    )(y2d, scale, shift)


# ----------------------------------------------------------------------------
# Glue: bilinear x2 upsample matching torch.nn.Upsample(scale_factor=2,
# mode='bilinear') (align_corners=False). Closed-form 0.25/0.75 stencil with
# edge clamp -> pure slices/elementwise, no gathers.
# ----------------------------------------------------------------------------
def _upsample2x_bilinear_nhwc(x):
    n, h, w, c = x.shape
    x_up = jnp.concatenate([x[:, :1], x[:, :-1]], axis=1)
    x_dn = jnp.concatenate([x[:, 1:], x[:, -1:]], axis=1)
    even = 0.75 * x + 0.25 * x_up
    odd = 0.75 * x + 0.25 * x_dn
    x = jnp.stack([even, odd], axis=2).reshape(n, 2 * h, w, c)
    x_lf = jnp.concatenate([x[:, :, :1], x[:, :, :-1]], axis=2)
    x_rt = jnp.concatenate([x[:, :, 1:], x[:, :, -1:]], axis=2)
    even = 0.75 * x + 0.25 * x_lf
    odd = 0.75 * x + 0.25 * x_rt
    return jnp.stack([even, odd], axis=3).reshape(n, 2 * h, 2 * w, c)


# ----------------------------------------------------------------------------
# Module: parameters + forward
# ----------------------------------------------------------------------------
def init_unet_up_block_params(key, prev_channel, input_channel, output_channel):
    cins = [prev_channel + input_channel, output_channel, output_channel]
    params = []
    keys = jax.random.split(key, 3)
    for cin, k in zip(cins, keys):
        kw, kb, kg, kbeta = jax.random.split(k, 4)
        fan_in = 9 * cin
        w = jax.random.normal(kw, (3, 3, cin, output_channel), jnp.float32) / jnp.sqrt(fan_in)
        b = 0.01 * jax.random.normal(kb, (output_channel,), jnp.float32)
        gamma = 1.0 + 0.1 * jax.random.normal(kg, (output_channel,), jnp.float32)
        beta = 0.1 * jax.random.normal(kbeta, (output_channel,), jnp.float32)
        params.append((w, b, gamma, beta))
    return params


def unet_up_block(params, prev_feature_map, x):
    """prev_feature_map: (N, prev_c, H, W) NCHW; x: (N, in_c, H/2, W/2) NCHW."""
    prev = jnp.transpose(prev_feature_map, (0, 2, 3, 1))   # -> NHWC
    xh = jnp.transpose(x, (0, 2, 3, 1))                    # -> NHWC
    xh = _upsample2x_bilinear_nhwc(xh)
    feat = jnp.concatenate([xh, prev], axis=-1)            # torch.cat((x, prev), dim=1)
    n, h, wd, cin = feat.shape
    assert (h * wd) % _SUBLANE == 0, "H*W must be a multiple of 8"

    co = params[0][0].shape[-1]
    co_pad = _round_up(co, _LANE)
    cin_pad = _round_up(cin, _CIN_ALIGN)

    cur = jnp.pad(feat.astype(jnp.bfloat16),
                  ((0, 0), (0, 0), (0, 0), (0, cin_pad - cin)))
    scale = shift = None
    for wk, _b, gamma, beta in params:
        # conv bias `_b` is exactly cancelled by the train-mode BatchNorm mean
        # subtraction that follows, so it is dropped (no numerical change).
        ci = cur.shape[-1]
        wpad = jnp.pad(wk.astype(jnp.bfloat16),
                       ((0, 0), (0, 0), (0, ci - wk.shape[2]), (0, co_pad - co)))
        wflat = wpad.reshape(3, 3 * ci, co_pad)             # (kh, kw-major|cin, co)
        y, mean, var = _conv_stage(cur, wflat, scale, shift)
        inv = jax.lax.rsqrt(var + _BN_EPS)
        g = jnp.pad(gamma.astype(jnp.float32), (0, co_pad - co))
        bt = jnp.pad(beta.astype(jnp.float32), (0, co_pad - co))
        scale = (g * inv).reshape(1, co_pad)
        shift = (bt - mean * g * inv).reshape(1, co_pad)
        cur = y                                             # channels stay padded

    m = n * h * wd
    out = _bn_relu_sweep(cur.reshape(m, co_pad), scale, shift, jnp.float32)
    out = out[:, :co].reshape(n, h, wd, co)                 # un-pad channels once
    return jnp.transpose(out, (0, 3, 1, 2))                 # back to NCHW


# ----------------------------------------------------------------------------
# Pure-JAX f32 reference (gather-based upsample + XLA conv) for validation.
# ----------------------------------------------------------------------------
def _reference_forward(params, prev_feature_map, x):
    def up_ref(xx):
        n, h, w, c = xx.shape

        def src(out_len, in_len):
            o = jnp.arange(out_len, dtype=jnp.float32)
            s = jnp.clip((o + 0.5) * (in_len / out_len) - 0.5, 0.0, in_len - 1.0)
            i0 = jnp.floor(s).astype(jnp.int32)
            i1 = jnp.minimum(i0 + 1, in_len - 1)
            return i0, i1, s - i0.astype(jnp.float32)

        h0, h1, fh = src(2 * h, h)
        w0, w1, fw = src(2 * w, w)
        xh = xx[:, h0] * (1 - fh)[None, :, None, None] + xx[:, h1] * fh[None, :, None, None]
        return (xh[:, :, w0] * (1 - fw)[None, None, :, None]
                + xh[:, :, w1] * fw[None, None, :, None])

    prev = jnp.transpose(prev_feature_map, (0, 2, 3, 1))
    xh = up_ref(jnp.transpose(x, (0, 2, 3, 1)))
    h = jnp.concatenate([xh, prev], axis=-1)
    for wk, b, gamma, beta in params:
        y = jax.lax.conv_general_dilated(
            h, wk, window_strides=(1, 1), padding=((1, 1), (1, 1)),
            dimension_numbers=("NHWC", "HWIO", "NHWC"),
            precision=jax.lax.Precision.HIGHEST) + b
        mean = jnp.mean(y, axis=(0, 1, 2))
        var = jnp.mean(jnp.square(y - mean), axis=(0, 1, 2))
        y = (y - mean) * jax.lax.rsqrt(var + _BN_EPS) * gamma + beta
        h = jnp.maximum(y, 0.0)
    return jnp.transpose(h, (0, 3, 1, 2))


if __name__ == "__main__":
    prev_channel, input_channel, output_channel = 4, 4, 8
    N, H, W = 2, 16, 16

    key = jax.random.PRNGKey(0)
    k_prev, k_x, k_params = jax.random.split(key, 3)
    prev_feature_map = jax.random.normal(k_prev, (N, prev_channel, H, W), jnp.float32)
    x = jax.random.normal(k_x, (N, input_channel, H // 2, W // 2), jnp.float32)
    params = init_unet_up_block_params(k_params, prev_channel, input_channel, output_channel)

    fwd = jax.jit(unet_up_block)
    out = jax.block_until_ready(fwd(params, prev_feature_map, x))

    assert out.shape == (N, output_channel, H, W), out.shape
    assert bool(jnp.all(jnp.isfinite(out)))
    assert bool(jnp.all(out >= 0.0))  # ReLU output

    # Numerical check vs a pure-JAX f32 reference (bf16 matmuls and bf16
    # inter-stage activations => loose tolerance).
    ref = _reference_forward(params, prev_feature_map, x)
    err = float(jnp.max(jnp.abs(out - ref)))
    assert bool(jnp.allclose(out, ref, atol=1.5e-1, rtol=1.5e-1)), (
        "max abs err = %f" % err)
    print("KERNEL_OK")
</pallas_src>

<mosaic_0001>
module attributes {stable_mosaic.version = 11 : i64} {
  func.func @kernel(%arg0: i32, %arg1: i32, %arg2: memref<1x16x16x128xbf16, #tpu.memory_space<vmem>>, %arg3: memref<2x16x16x128xbf16, #tpu.memory_space<any>>, %arg4: memref<3x384x128xbf16, #tpu.memory_space<vmem>>, %arg5: memref<1x16x16x128xbf16, #tpu.memory_space<vmem>>, %arg6: memref<1x1x1x128xf32, #tpu.memory_space<vmem>>, %arg7: memref<1x1x1x128xf32, #tpu.memory_space<vmem>>, %arg8: memref<2x2x16x128xbf16, #tpu.memory_space<vmem>>, %arg9: memref<2x2x!tpu.dma_semaphore, #tpu.memory_space<semaphore_mem>>) attributes {dimension_semantics = [#tpu.dimension_semantics<parallel>, #tpu.dimension_semantics<arbitrary>], iteration_bounds = array<i64: 2, 1>, scalar_prefetch = 0 : i64, scratch_operands = 2 : i64, tpu.core_type = #tpu.core_type<tc>, window_params = [{transform_indices = @transform_0, window_bounds = array<i64: 1, 16, 16, 128>}, {}, {pipeline_mode = #tpu.pipeline_mode<synchronous>, transform_indices = @transform_2, window_bounds = array<i64: 3, 384, 128>}, {transform_indices = @transform_3, window_bounds = array<i64: 1, 16, 16, 128>}, {transform_indices = @transform_4, window_bounds = array<i64: 1, 1, 1, 128>}, {transform_indices = @transform_5, window_bounds = array<i64: 1, 1, 1, 128>}]} {
    %c2_i32 = arith.constant 2 : i32
    %c0_i32 = arith.constant 0 : i32
    %0 = arith.cmpi eq, %c2_i32, %c0_i32 : i32
    %c1_i32 = arith.constant 1 : i32
    %1 = arith.select %0, %c1_i32, %c2_i32 : i32
    %2 = arith.remsi %arg1, %1 : i32
    %c0_i32_0 = arith.constant 0 : i32
    %3 = arith.cmpi ne, %2, %c0_i32_0 : i32
    %c0_i32_1 = arith.constant 0 : i32
    %4 = arith.cmpi slt, %2, %c0_i32_1 : i32
    %c0_i32_2 = arith.constant 0 : i32
    %5 = arith.cmpi slt, %1, %c0_i32_2 : i32
    %6 = arith.xori %4, %5 : i1
    %7 = arith.andi %6, %3 : i1
    %8 = arith.addi %2, %1 : i32
    %9 = arith.select %7, %8, %2 : i32
    %c0_i32_3 = arith.constant 0 : i32
    %10 = arith.cmpi eq, %arg1, %c0_i32_3 : i32
    %11 = arith.extui %10 : i1 to i32
    %c0_i32_4 = arith.constant 0 : i32
    %12 = arith.cmpi ne, %11, %c0_i32_4 : i32
    scf.if %12 {
      %c16_i32_57 = arith.constant 16 : i32
      %93 = arith.muli %arg1, %c16_i32_57 : i32
      %c1_i32_58 = arith.constant 1 : i32
      %94 = arith.subi %93, %c1_i32_58 : i32
      %c0_i32_59 = arith.constant 0 : i32
      %95 = arith.maxsi %94, %c0_i32_59 : i32
      %c16_i32_60 = arith.constant 16 : i32
      %96 = arith.addi %93, %c16_i32_60 : i32
      %c15_i32_61 = arith.constant 15 : i32
      %97 = arith.minsi %96, %c15_i32_61 : i32
      %c0_i32_62 = arith.constant 0 : i32
      %c0_i32_63 = arith.constant 0 : i32
      %c0_i32_64 = arith.constant 0 : i32
      %98 = tpu.memref_slice %arg3[%arg0, %95, %c0_i32_63, %c0_i32_64] : memref<2x16x16x128xbf16, #tpu.memory_space<any>> -> memref<1x1x16x128xbf16, #tpu.memory_space<any>>
      %c0_i32_65 = arith.constant 0 : i32
      %c0_i32_66 = arith.constant 0 : i32
      %c0_i32_67 = arith.constant 0 : i32
      %99 = tpu.memref_slice %arg8[%9, %c0_i32_65, %c0_i32_66, %c0_i32_67] : memref<2x2x16x128xbf16, #tpu.memory_space<vmem>> -> memref<1x1x16x128xbf16, #tpu.memory_space<vmem>>
      %100 = tpu.memref_slice %arg9[%9, %c0_i32_62] : memref<2x2x!tpu.dma_semaphore, #tpu.memory_space<semaphore_mem>> -> memref<1x1x!tpu.dma_semaphore, #tpu.memory_space<semaphore_mem>>
      %101 = tpu.memref_squeeze %100 : memref<1x1x!tpu.dma_semaphore, #tpu.memory_space<semaphore_mem>> -> memref<!tpu.dma_semaphore, #tpu.memory_space<semaphore_mem>>
      tpu.enqueue_dma source(%98 : memref<1x1x16x128xbf16, #tpu.memory_space<any>>) target(%99 : memref<1x1x16x128xbf16, #tpu.memory_space<vmem>>) target_semaphore(%101 : memref<!tpu.dma_semaphore, #tpu.memory_space<semaphore_mem>>)
      %c1_i32_68 = arith.constant 1 : i32
      %c0_i32_69 = arith.constant 0 : i32
      %c0_i32_70 = arith.constant 0 : i32
      %102 = tpu.memref_slice %arg3[%arg0, %97, %c0_i32_69, %c0_i32_70] : memref<2x16x16x128xbf16, #tpu.memory_space<any>> -> memref<1x1x16x128xbf16, #tpu.memory_space<any>>
      %c1_i32_71 = arith.constant 1 : i32
      %c0_i32_72 = arith.constant 0 : i32
      %c0_i32_73 = arith.constant 0 : i32
      %103 = tpu.memref_slice %arg8[%9, %c1_i32_71, %c0_i32_72, %c0_i32_73] : memref<2x2x16x128xbf16, #tpu.memory_space<vmem>> -> memref<1x1x16x128xbf16, #tpu.memory_space<vmem>>
      %104 = tpu.memref_slice %arg9[%9, %c1_i32_68] : memref<2x2x!tpu.dma_semaphore, #tpu.memory_space<semaphore_mem>> -> memref<1x1x!tpu.dma_semaphore, #tpu.memory_space<semaphore_mem>>
      %105 = tpu.memref_squeeze %104 : memref<1x1x!tpu.dma_semaphore, #tpu.memory_space<semaphore_mem>> -> memref<!tpu.dma_semaphore, #tpu.memory_space<semaphore_mem>>
      tpu.enqueue_dma source(%102 : memref<1x1x16x128xbf16, #tpu.memory_space<any>>) target(%103 : memref<1x1x16x128xbf16, #tpu.memory_space<vmem>>) target_semaphore(%105 : memref<!tpu.dma_semaphore, #tpu.memory_space<semaphore_mem>>)
    } else {
    }
    %c16_i32 = arith.constant 16 : i32
    %13 = arith.muli %arg1, %c16_i32 : i32
    %c1_i32_5 = arith.constant 1 : i32
    %14 = arith.subi %13, %c1_i32_5 : i32
    %c0_i32_6 = arith.constant 0 : i32
    %15 = arith.maxsi %14, %c0_i32_6 : i32
    %c16_i32_7 = arith.constant 16 : i32
    %16 = arith.addi %13, %c16_i32_7 : i32
    %c15_i32 = arith.constant 15 : i32
    %17 = arith.minsi %16, %c15_i32 : i32
    %c0_i32_8 = arith.constant 0 : i32
    %c0_i32_9 = arith.constant 0 : i32
    %c0_i32_10 = arith.constant 0 : i32
    %18 = tpu.memref_slice %arg3[%arg0, %15, %c0_i32_9, %c0_i32_10] : memref<2x16x16x128xbf16, #tpu.memory_space<any>> -> memref<1x1x16x128xbf16, #tpu.memory_space<any>>
    %c0_i32_11 = arith.constant 0 : i32
    %c0_i32_12 = arith.constant 0 : i32
    %c0_i32_13 = arith.constant 0 : i32
    %19 = tpu.memref_slice %arg8[%9, %c0_i32_11, %c0_i32_12, %c0_i32_13] : memref<2x2x16x128xbf16, #tpu.memory_space<vmem>> -> memref<1x1x16x128xbf16, #tpu.memory_space<vmem>>
    %20 = tpu.memref_slice %arg9[%9, %c0_i32_8] : memref<2x2x!tpu.dma_semaphore, #tpu.memory_space<semaphore_mem>> -> memref<1x1x!tpu.dma_semaphore, #tpu.memory_space<semaphore_mem>>
    %21 = tpu.memref_squeeze %20 : memref<1x1x!tpu.dma_semaphore, #tpu.memory_space<semaphore_mem>> -> memref<!tpu.dma_semaphore, #tpu.memory_space<semaphore_mem>>
    tpu.wait_dma2 semaphore(%21 : memref<!tpu.dma_semaphore, #tpu.memory_space<semaphore_mem>>) src(%18 : memref<1x1x16x128xbf16, #tpu.memory_space<any>>) dst(%19 : memref<1x1x16x128xbf16, #tpu.memory_space<vmem>>)
    %c1_i32_14 = arith.constant 1 : i32
    %c0_i32_15 = arith.constant 0 : i32
    %c0_i32_16 = arith.constant 0 : i32
    %22 = tpu.memref_slice %arg3[%arg0, %17, %c0_i32_15, %c0_i32_16] : memref<2x16x16x128xbf16, #tpu.memory_space<any>> -> memref<1x1x16x128xbf16, #tpu.memory_space<any>>
    %c1_i32_17 = arith.constant 1 : i32
    %c0_i32_18 = arith.constant 0 : i32
    %c0_i32_19 = arith.constant 0 : i32
    %23 = tpu.memref_slice %arg8[%9, %c1_i32_17, %c0_i32_18, %c0_i32_19] : memref<2x2x16x128xbf16, #tpu.memory_space<vmem>> -> memref<1x1x16x128xbf16, #tpu.memory_space<vmem>>
    %24 = tpu.memref_slice %arg9[%9, %c1_i32_14] : memref<2x2x!tpu.dma_semaphore, #tpu.memory_space<semaphore_mem>> -> memref<1x1x!tpu.dma_semaphore, #tpu.memory_space<semaphore_mem>>
    %25 = tpu.memref_squeeze %24 : memref<1x1x!tpu.dma_semaphore, #tpu.memory_space<semaphore_mem>> -> memref<!tpu.dma_semaphore, #tpu.memory_space<semaphore_mem>>
    tpu.wait_dma2 semaphore(%25 : memref<!tpu.dma_semaphore, #tpu.memory_space<semaphore_mem>>) src(%22 : memref<1x1x16x128xbf16, #tpu.memory_space<any>>) dst(%23 : memref<1x1x16x128xbf16, #tpu.memory_space<vmem>>)
    %c1_i32_20 = arith.constant 1 : i32
    %26 = arith.addi %arg1, %c1_i32_20 : i32
    %c1_i32_21 = arith.constant 1 : i32
    %27 = arith.cmpi slt, %26, %c1_i32_21 : i32
    %28 = arith.extui %27 : i1 to i32
    %c0_i32_22 = arith.constant 0 : i32
    %29 = arith.cmpi ne, %28, %c0_i32_22 : i32
    scf.if %29 {
      %c1_i32_57 = arith.constant 1 : i32
      %93 = arith.addi %arg1, %c1_i32_57 : i32
      %c1_i32_58 = arith.constant 1 : i32
      %94 = arith.subi %c1_i32_58, %9 : i32
      %c16_i32_59 = arith.constant 16 : i32
      %95 = arith.muli %93, %c16_i32_59 : i32
      %c1_i32_60 = arith.constant 1 : i32
      %96 = arith.subi %95, %c1_i32_60 : i32
      %c0_i32_61 = arith.constant 0 : i32
      %97 = arith.maxsi %96, %c0_i32_61 : i32
      %c16_i32_62 = arith.constant 16 : i32
      %98 = arith.addi %95, %c16_i32_62 : i32
      %c15_i32_63 = arith.constant 15 : i32
      %99 = arith.minsi %98, %c15_i32_63 : i32
      %c0_i32_64 = arith.constant 0 : i32
      %c0_i32_65 = arith.constant 0 : i32
      %c0_i32_66 = arith.constant 0 : i32
      %100 = tpu.memref_slice %arg3[%arg0, %97, %c0_i32_65, %c0_i32_66] : memref<2x16x16x128xbf16, #tpu.memory_space<any>> -> memref<1x1x16x128xbf16, #tpu.memory_space<any>>
      %c0_i32_67 = arith.constant 0 : i32
      %c0_i32_68 = arith.constant 0 : i32
      %c0_i32_69 = arith.constant 0 : i32
      %101 = tpu.memref_slice %arg8[%94, %c0_i32_67, %c0_i32_68, %c0_i32_69] : memref<2x2x16x128xbf16, #tpu.memory_space<vmem>> -> memref<1x1x16x128xbf16, #tpu.memory_space<vmem>>
      %102 = tpu.memref_slice %arg9[%94, %c0_i32_64] : memref<2x2x!tpu.dma_semaphore, #tpu.memory_space<semaphore_mem>> -> memref<1x1x!tpu.dma_semaphore, #tpu.memory_space<semaphore_mem>>
      %103 = tpu.memref_squeeze %102 : memref<1x1x!tpu.dma_semaphore, #tpu.memory_space<semaphore_mem>> -> memref<!tpu.dma_semaphore, #tpu.memory_space<semaphore_mem>>
      tpu.enqueue_dma source(%100 : memref<1x1x16x128xbf16, #tpu.memory_space<any>>) target(%101 : memref<1x1x16x128xbf16, #tpu.memory_space<vmem>>) target_semaphore(%103 : memref<!tpu.dma_semaphore, #tpu.memory_space<semaphore_mem>>)
      %c1_i32_70 = arith.constant 1 : i32
      %c0_i32_71 = arith.constant 0 : i32
      %c0_i32_72 = arith.constant 0 : i32
      %104 = tpu.memref_slice %arg3[%arg0, %99, %c0_i32_71, %c0_i32_72] : memref<2x16x16x128xbf16, #tpu.memory_space<any>> -> memref<1x1x16x128xbf16, #tpu.memory_space<any>>
      %c1_i32_73 = arith.constant 1 : i32
      %c0_i32_74 = arith.constant 0 : i32
      %c0_i32_75 = arith.constant 0 : i32
      %105 = tpu.memref_slice %arg8[%94, %c1_i32_73, %c0_i32_74, %c0_i32_75] : memref<2x2x16x128xbf16, #tpu.memory_space<vmem>> -> memref<1x1x16x128xbf16, #tpu.memory_space<vmem>>
      %106 = tpu.memref_slice %arg9[%94, %c1_i32_70] : memref<2x2x!tpu.dma_semaphore, #tpu.memory_space<semaphore_mem>> -> memref<1x1x!tpu.dma_semaphore, #tpu.memory_space<semaphore_mem>>
      %107 = tpu.memref_squeeze %106 : memref<1x1x!tpu.dma_semaphore, #tpu.memory_space<semaphore_mem>> -> memref<!tpu.dma_semaphore, #tpu.memory_space<semaphore_mem>>
      tpu.enqueue_dma source(%104 : memref<1x1x16x128xbf16, #tpu.memory_space<any>>) target(%105 : memref<1x1x16x128xbf16, #tpu.memory_space<vmem>>) target_semaphore(%107 : memref<!tpu.dma_semaphore, #tpu.memory_space<semaphore_mem>>)
    } else {
    }
    %c0 = arith.constant 0 : index
    %c0_23 = arith.constant 0 : index
    %c0_24 = arith.constant 0 : index
    %c0_25 = arith.constant 0 : index
    %30 = vector.load %arg2[%c0, %c0_23, %c0_24, %c0_25] : memref<1x16x16x128xbf16, #tpu.memory_space<vmem>>, vector<1x16x16x128xbf16>
    %31 = vector.shape_cast %30 : vector<1x16x16x128xbf16> to vector<16x16x128xbf16>
    %32 = arith.index_cast %9 : i32 to index
    %c0_26 = arith.constant 0 : index
    %c0_27 = arith.constant 0 : index
    %c0_28 = arith.constant 0 : index
    %33 = vector.load %arg8[%32, %c0_26, %c0_27, %c0_28] : memref<2x2x16x128xbf16, #tpu.memory_space<vmem>>, vector<1x2x16x128xbf16>
    %34 = vector.shape_cast %33 : vector<1x2x16x128xbf16> to vector<2x16x128xbf16>
    %35 = vector.extract_strided_slice %34 {offsets = [0, 0, 0], sizes = [1, 16, 128], strides = [1, 1, 1]} : vector<2x16x128xbf16> to vector<1x16x128xbf16>
    %c0_i32_29 = arith.constant 0 : i32
    %36 = arith.cmpi sgt, %arg1, %c0_i32_29 : i32
    %37 = arith.extui %36 : i1 to i32
    %38 = arith.sitofp %37 : i32 to f32
    %39 = arith.extf %35 : vector<1x16x128xbf16> to vector<1x16x128xf32>
    %40 = vector.broadcast %38 : f32 to vector<1x16x128xf32>
    %41 = arith.mulf %39, %40 : vector<1x16x128xf32>
    %42 = arith.truncf %41 : vector<1x16x128xf32> to vector<1x16x128xbf16>
    %43 = vector.extract_strided_slice %34 {offsets = [1, 0, 0], sizes = [1, 16, 128], strides = [1, 1, 1]} : vector<2x16x128xbf16> to vector<1x16x128xbf16>
    %c0_i32_30 = arith.constant 0 : i32
    %44 = arith.cmpi slt, %arg1, %c0_i32_30 : i32
    %45 = arith.extui %44 : i1 to i32
    %46 = arith.sitofp %45 : i32 to f32
    %47 = arith.extf %43 : vector<1x16x128xbf16> to vector<1x16x128xf32>
    %48 = vector.broadcast %46 : f32 to vector<1x16x128xf32>
    %49 = arith.mulf %47, %48 : vector<1x16x128xf32>
    %50 = arith.truncf %49 : vector<1x16x128xf32> to vector<1x16x128xbf16>
    %51 = tpu.concatenate %42, %31, %50 in 0 : vector<1x16x128xbf16>, vector<16x16x128xbf16>, vector<1x16x128xbf16> -> vector<18x16x128xbf16>
    %cst = arith.constant 0.000000e+00 : bf16
    %52 = vector.broadcast %cst : bf16 to vector<18x1x128xbf16>
    %53 = vector.extract_strided_slice %51 {offsets = [0, 0, 0], sizes = [18, 15, 128], strides = [1, 1, 1]} : vector<18x16x128xbf16> to vector<18x15x128xbf16>
    %54 = tpu.concatenate %52, %53 in 1 : vector<18x1x128xbf16>, vector<18x15x128xbf16> -> vector<18x16x128xbf16>
    %55 = vector.extract_strided_slice %51 {offsets = [0, 1, 0], sizes = [18, 15, 128], strides = [1, 1, 1]} : vector<18x16x128xbf16> to vector<18x15x128xbf16>
    %56 = tpu.concatenate %55, %52 in 1 : vector<18x15x128xbf16>, vector<18x1x128xbf16> -> vector<18x16x128xbf16>
    %57 = tpu.concatenate %54, %51, %56 in 2 : vector<18x16x128xbf16>, vector<18x16x128xbf16>, vector<18x16x128xbf16> -> vector<18x16x384xbf16>
    %cst_31 = arith.constant 0.000000e+00 : f32
    %58 = vector.broadcast %cst_31 : f32 to vector<256x128xf32>
    %59 = vector.extract_strided_slice %57 {offsets = [0, 0, 0], sizes = [16, 16, 384], strides = [1, 1, 1]} : vector<18x16x384xbf16> to vector<16x16x384xbf16>
    %60 = vector.shape_cast %59 : vector<16x16x384xbf16> to vector<256x384xbf16>
    %c0_32 = arith.constant 0 : index
    %c0_33 = arith.constant 0 : index
    %c0_34 = arith.constant 0 : index
    %61 = vector.load %arg4[%c0_32, %c0_33, %c0_34] : memref<3x384x128xbf16, #tpu.memory_space<vmem>>, vector<1x384x128xbf16>
    %62 = vector.shape_cast %61 : vector<1x384x128xbf16> to vector<384x128xbf16>
    %cst_35 = arith.constant dense<0.000000e+00> : vector<256x128xf32>
    %63 = tpu.matmul %60, %62, %cst_35 {dimension_numbers = #tpu.dot_dimension_numbers<[1], [0], [0], [1], [0, 0, 1, 1], [], []>} : vector<256x384xbf16>, vector<384x128xbf16>, vector<256x128xf32> -> vector<256x128xf32>
    %64 = arith.addf %58, %63 : vector<256x128xf32>
    %65 = vector.extract_strided_slice %57 {offsets = [1, 0, 0], sizes = [16, 16, 384], strides = [1, 1, 1]} : vector<18x16x384xbf16> to vector<16x16x384xbf16>
    %66 = vector.shape_cast %65 : vector<16x16x384xbf16> to vector<256x384xbf16>
    %c1 = arith.constant 1 : index
    %c0_36 = arith.constant 0 : index
    %c0_37 = arith.constant 0 : index
    %67 = vector.load %arg4[%c1, %c0_36, %c0_37] : memref<3x384x128xbf16, #tpu.memory_space<vmem>>, vector<1x384x128xbf16>
    %68 = vector.shape_cast %67 : vector<1x384x128xbf16> to vector<384x128xbf16>
    %cst_38 = arith.constant dense<0.000000e+00> : vector<256x128xf32>
    %69 = tpu.matmul %66, %68, %cst_38 {dimension_numbers = #tpu.dot_dimension_numbers<[1], [0], [0], [1], [0, 0, 1, 1], [], []>} : vector<256x384xbf16>, vector<384x128xbf16>, vector<256x128xf32> -> vector<256x128xf32>
    %70 = arith.addf %64, %69 : vector<256x128xf32>
    %71 = vector.extract_strided_slice %57 {offsets = [2, 0, 0], sizes = [16, 16, 384], strides = [1, 1, 1]} : vector<18x16x384xbf16> to vector<16x16x384xbf16>
    %72 = vector.shape_cast %71 : vector<16x16x384xbf16> to vector<256x384xbf16>
    %c2 = arith.constant 2 : index
    %c0_39 = arith.constant 0 : index
    %c0_40 = arith.constant 0 : index
    %73 = vector.load %arg4[%c2, %c0_39, %c0_40] : memref<3x384x128xbf16, #tpu.memory_space<vmem>>, vector<1x384x128xbf16>
    %74 = vector.shape_cast %73 : vector<1x384x128xbf16> to vector<384x128xbf16>
    %cst_41 = arith.constant dense<0.000000e+00> : vector<256x128xf32>
    %75 = tpu.matmul %72, %74, %cst_41 {dimension_numbers = #tpu.dot_dimension_numbers<[1], [0], [0], [1], [0, 0, 1, 1], [], []>} : vector<256x384xbf16>, vector<384x128xbf16>, vector<256x128xf32> -> vector<256x128xf32>
    %76 = arith.addf %70, %75 : vector<256x128xf32>
    %cst_42 = arith.constant dense<0.000000e+00> : vector<128xf32>
    %77 = vector.multi_reduction <add>, %76, %cst_42 [0] : vector<256x128xf32> to vector<128xf32>
    %78 = vector.shape_cast %77 : vector<128xf32> to vector<1x128xf32>
    %cst_43 = arith.constant 3.906250e-03 : f32
    %79 = vector.broadcast %cst_43 : f32 to vector<1x128xf32>
    %80 = arith.mulf %78, %79 : vector<1x128xf32>
    %81 = vector.broadcast %80 : vector<1x128xf32> to vector<256x128xf32>
    %82 = arith.subf %76, %81 : vector<256x128xf32>
    %83 = arith.mulf %82, %82 : vector<256x128xf32>
    %cst_44 = arith.constant dense<0.000000e+00> : vector<128xf32>
    %84 = vector.multi_reduction <add>, %83, %cst_44 [0] : vector<256x128xf32> to vector<128xf32>
    %85 = vector.shape_cast %84 : vector<128xf32> to vector<1x128xf32>
    %86 = vector.shape_cast %78 : vector<1x128xf32> to vector<1x1x1x128xf32>
    %c0_45 = arith.constant 0 : index
    %c0_46 = arith.constant 0 : index
    %c0_47 = arith.constant 0 : index
    %c0_48 = arith.constant 0 : index
    %87 = vector.load %arg6[%c0_45, %c0_46, %c0_47, %c0_48] : memref<1x1x1x128xf32, #tpu.memory_space<vmem>>, vector<1x1x1x128xf32>
    tpu.vector_store %arg6[%c0_45, %c0_46, %c0_47, %c0_48], %86 {strides = array<i32>} : memref<1x1x1x128xf32, #tpu.memory_space<vmem>>, vector<1x1x1x128xf32>,
    %88 = vector.shape_cast %85 : vector<1x128xf32> to vector<1x1x1x128xf32>
    %c0_49 = arith.constant 0 : index
    %c0_50 = arith.constant 0 : index
    %c0_51 = arith.constant 0 : index
    %c0_52 = arith.constant 0 : index
    %89 = vector.load %arg7[%c0_49, %c0_50, %c0_51, %c0_52] : memref<1x1x1x128xf32, #tpu.memory_space<vmem>>, vector<1x1x1x128xf32>
    tpu.vector_store %arg7[%c0_49, %c0_50, %c0_51, %c0_52], %88 {strides = array<i32>} : memref<1x1x1x128xf32, #tpu.memory_space<vmem>>, vector<1x1x1x128xf32>,
    %90 = arith.truncf %76 : vector<256x128xf32> to vector<256x128xbf16>
    %91 = vector.shape_cast %90 : vector<256x128xbf16> to vector<1x16x16x128xbf16>
    %c0_53 = arith.constant 0 : index
    %c0_54 = arith.constant 0 : index
    %c0_55 = arith.constant 0 : index
    %c0_56 = arith.constant 0 : index
    %92 = vector.load %arg5[%c0_53, %c0_54, %c0_55, %c0_56] : memref<1x16x16x128xbf16, #tpu.memory_space<vmem>>, vector<1x16x16x128xbf16>
    tpu.vector_store %arg5[%c0_53, %c0_54, %c0_55, %c0_56], %91 {strides = array<i32>} : memref<1x16x16x128xbf16, #tpu.memory_space<vmem>>, vector<1x16x16x128xbf16>,
    return
  }
  func.func @transform_0(%arg0: i32, %arg1: i32) -> (i32, i32, i32, i32) {
    %c0_i32 = arith.constant 0 : i32
    %c0_i32_0 = arith.constant 0 : i32
    %c0_i32_1 = arith.constant 0 : i32
    return %arg0, %arg1, %c0_i32, %c0_i32_0 : i32, i32, i32, i32
  }
  func.func @transform_2(%arg0: i32, %arg1: i32) -> (i32, i32, i32) {
    %c0_i32 = arith.constant 0 : i32
    %c0_i32_0 = arith.constant 0 : i32
    %c0_i32_1 = arith.constant 0 : i32
    %c0_i32_2 = arith.constant 0 : i32
    return %c0_i32, %c0_i32_0, %c0_i32_1 : i32, i32, i32
  }
  func.func @transform_3(%arg0: i32, %arg1: i32) -> (i32, i32, i32, i32) {
    %c0_i32 = arith.constant 0 : i32
    %c0_i32_0 = arith.constant 0 : i32
    %c0_i32_1 = arith.constant 0 : i32
    return %arg0, %arg1, %c0_i32, %c0_i32_0 : i32, i32, i32, i32
  }
  func.func @transform_4(%arg0: i32, %arg1: i32) -> (i32, i32, i32, i32) {
    %c0_i32 = arith.constant 0 : i32
    %c0_i32_0 = arith.constant 0 : i32
    %c0_i32_1 = arith.constant 0 : i32
    return %arg0, %arg1, %c0_i32, %c0_i32_0 : i32, i32, i32, i32
  }
  func.func @transform_5(%arg0: i32, %arg1: i32) -> (i32, i32, i32, i32) {
    %c0_i32 = arith.constant 0 : i32
    %c0_i32_0 = arith.constant 0 : i32
    %c0_i32_1 = arith.constant 0 : i32
    return %arg0, %arg1, %c0_i32, %c0_i32_0 : i32, i32, i32, i32
  }
}

module attributes {stable_mosaic.version = 11 : i64} {
  func.func @kernel(%arg0: i32, %arg1: i32, %arg2: memref<1x16x16x128xbf16, #tpu.memory_space<vmem>>, %arg3: memref<2x16x16x128xbf16, #tpu.memory_space<any>>, %arg4: memref<3x384x128xbf16, #tpu.memory_space<vmem>>, %arg5: memref<1x128xf32, #tpu.memory_space<vmem>>, %arg6: memref<1x128xf32, #tpu.memory_space<vmem>>, %arg7: memref<1x16x16x128xbf16, #tpu.memory_space<vmem>>, %arg8: memref<1x1x1x128xf32, #tpu.memory_space<vmem>>, %arg9: memref<1x1x1x128xf32, #tpu.memory_space<vmem>>, %arg10: memref<2x2x16x128xbf16, #tpu.memory_space<vmem>>, %arg11: memref<2x2x!tpu.dma_semaphore, #tpu.memory_space<semaphore_mem>>) attributes {dimension_semantics = [#tpu.dimension_semantics<parallel>, #tpu.dimension_semantics<arbitrary>], iteration_bounds = array<i64: 2, 1>, scalar_prefetch = 0 : i64, scratch_operands = 2 : i64, tpu.core_type = #tpu.core_type<tc>, window_params = [{transform_indices = @transform_0, window_bounds = array<i64: 1, 16, 16, 128>}, {}, {pipeline_mode = #tpu.pipeline_mode<synchronous>, transform_indices = @transform_2, window_bounds = array<i64: 3, 384, 128>}, {pipeline_mode = #tpu.pipeline_mode<synchronous>, transform_indices = @transform_3, window_bounds = array<i64: 1, 128>}, {pipeline_mode = #tpu.pipeline_mode<synchronous>, transform_indices = @transform_4, window_bounds = array<i64: 1, 128>}, {transform_indices = @transform_5, window_bounds = array<i64: 1, 16, 16, 128>}, {transform_indices = @transform_6, window_bounds = array<i64: 1, 1, 1, 128>}, {transform_indices = @transform_7, window_bounds = array<i64: 1, 1, 1, 128>}]} {
    %c2_i32 = arith.constant 2 : i32
    %c0_i32 = arith.constant 0 : i32
    %0 = arith.cmpi eq, %c2_i32, %c0_i32 : i32
    %c1_i32 = arith.constant 1 : i32
    %1 = arith.select %0, %c1_i32, %c2_i32 : i32
    %2 = arith.remsi %arg1, %1 : i32
    %c0_i32_0 = arith.constant 0 : i32
    %3 = arith.cmpi ne, %2, %c0_i32_0 : i32
    %c0_i32_1 = arith.constant 0 : i32
    %4 = arith.cmpi slt, %2, %c0_i32_1 : i32
    %c0_i32_2 = arith.constant 0 : i32
    %5 = arith.cmpi slt, %1, %c0_i32_2 : i32
    %6 = arith.xori %4, %5 : i1
    %7 = arith.andi %6, %3 : i1
    %8 = arith.addi %2, %1 : i32
    %9 = arith.select %7, %8, %2 : i32
    %c0_i32_3 = arith.constant 0 : i32
    %10 = arith.cmpi eq, %arg1, %c0_i32_3 : i32
    %11 = arith.extui %10 : i1 to i32
    %c0_i32_4 = arith.constant 0 : i32
    %12 = arith.cmpi ne, %11, %c0_i32_4 : i32
    scf.if %12 {
      %c16_i32_64 = arith.constant 16 : i32
      %117 = arith.muli %arg1, %c16_i32_64 : i32
      %c1_i32_65 = arith.constant 1 : i32
      %118 = arith.subi %117, %c1_i32_65 : i32
      %c0_i32_66 = arith.constant 0 : i32
      %119 = arith.maxsi %118, %c0_i32_66 : i32
      %c16_i32_67 = arith.constant 16 : i32
      %120 = arith.addi %117, %c16_i32_67 : i32
      %c15_i32_68 = arith.constant 15 : i32
      %121 = arith.minsi %120, %c15_i32_68 : i32
      %c0_i32_69 = arith.constant 0 : i32
      %c0_i32_70 = arith.constant 0 : i32
      %c0_i32_71 = arith.constant 0 : i32
      %122 = tpu.memref_slice %arg3[%arg0, %119, %c0_i32_70, %c0_i32_71] : memref<2x16x16x128xbf16, #tpu.memory_space<any>> -> memref<1x1x16x128xbf16, #tpu.memory_space<any>>
      %c0_i32_72 = arith.constant 0 : i32
      %c0_i32_73 = arith.constant 0 : i32
      %c0_i32_74 = arith.constant 0 : i32
      %123 = tpu.memref_slice %arg10[%9, %c0_i32_72, %c0_i32_73, %c0_i32_74] : memref<2x2x16x128xbf16, #tpu.memory_space<vmem>> -> memref<1x1x16x128xbf16, #tpu.memory_space<vmem>>
      %124 = tpu.memref_slice %arg11[%9, %c0_i32_69] : memref<2x2x!tpu.dma_semaphore, #tpu.memory_space<semaphore_mem>> -> memref<1x1x!tpu.dma_semaphore, #tpu.memory_space<semaphore_mem>>
      %125 = tpu.memref_squeeze %124 : memref<1x1x!tpu.dma_semaphore, #tpu.memory_space<semaphore_mem>> -> memref<!tpu.dma_semaphore, #tpu.memory_space<semaphore_mem>>
      tpu.enqueue_dma source(%122 : memref<1x1x16x128xbf16, #tpu.memory_space<any>>) target(%123 : memref<1x1x16x128xbf16, #tpu.memory_space<vmem>>) target_semaphore(%125 : memref<!tpu.dma_semaphore, #tpu.memory_space<semaphore_mem>>)
      %c1_i32_75 = arith.constant 1 : i32
      %c0_i32_76 = arith.constant 0 : i32
      %c0_i32_77 = arith.constant 0 : i32
      %126 = tpu.memref_slice %arg3[%arg0, %121, %c0_i32_76, %c0_i32_77] : memref<2x16x16x128xbf16, #tpu.memory_space<any>> -> memref<1x1x16x128xbf16, #tpu.memory_space<any>>
      %c1_i32_78 = arith.constant 1 : i32
      %c0_i32_79 = arith.constant 0 : i32
      %c0_i32_80 = arith.constant 0 : i32
      %127 = tpu.memref_slice %arg10[%9, %c1_i32_78, %c0_i32_79, %c0_i32_80] : memref<2x2x16x128xbf16, #tpu.memory_space<vmem>> -> memref<1x1x16x128xbf16, #tpu.memory_space<vmem>>
      %128 = tpu.memref_slice %arg11[%9, %c1_i32_75] : memref<2x2x!tpu.dma_semaphore, #tpu.memory_space<semaphore_mem>> -> memref<1x1x!tpu.dma_semaphore, #tpu.memory_space<semaphore_mem>>
      %129 = tpu.memref_squeeze %128 : memref<1x1x!tpu.dma_semaphore, #tpu.memory_space<semaphore_mem>> -> memref<!tpu.dma_semaphore, #tpu.memory_space<semaphore_mem>>
      tpu.enqueue_dma source(%126 : memref<1x1x16x128xbf16, #tpu.memory_space<any>>) target(%127 : memref<1x1x16x128xbf16, #tpu.memory_space<vmem>>) target_semaphore(%129 : memref<!tpu.dma_semaphore, #tpu.memory_space<semaphore_mem>>)
    } else {
    }
    %c16_i32 = arith.constant 16 : i32
    %13 = arith.muli %arg1, %c16_i32 : i32
    %c1_i32_5 = arith.constant 1 : i32
    %14 = arith.subi %13, %c1_i32_5 : i32
    %c0_i32_6 = arith.constant 0 : i32
    %15 = arith.maxsi %14, %c0_i32_6 : i32
    %c16_i32_7 = arith.constant 16 : i32
    %16 = arith.addi %13, %c16_i32_7 : i32
    %c15_i32 = arith.constant 15 : i32
    %17 = arith.minsi %16, %c15_i32 : i32
    %c0_i32_8 = arith.constant 0 : i32
    %c0_i32_9 = arith.constant 0 : i32
    %c0_i32_10 = arith.constant 0 : i32
    %18 = tpu.memref_slice %arg3[%arg0, %15, %c0_i32_9, %c0_i32_10] : memref<2x16x16x128xbf16, #tpu.memory_space<any>> -> memref<1x1x16x128xbf16, #tpu.memory_space<any>>
    %c0_i32_11 = arith.constant 0 : i32
    %c0_i32_12 = arith.constant 0 : i32
    %c0_i32_13 = arith.constant 0 : i32
    %19 = tpu.memref_slice %arg10[%9, %c0_i32_11, %c0_i32_12, %c0_i32_13] : memref<2x2x16x128xbf16, #tpu.memory_space<vmem>> -> memref<1x1x16x128xbf16, #tpu.memory_space<vmem>>
    %20 = tpu.memref_slice %arg11[%9, %c0_i32_8] : memref<2x2x!tpu.dma_semaphore, #tpu.memory_space<semaphore_mem>> -> memref<1x1x!tpu.dma_semaphore, #tpu.memory_space<semaphore_mem>>
    %21 = tpu.memref_squeeze %20 : memref<1x1x!tpu.dma_semaphore, #tpu.memory_space<semaphore_mem>> -> memref<!tpu.dma_semaphore, #tpu.memory_space<semaphore_mem>>
    tpu.wait_dma2 semaphore(%21 : memref<!tpu.dma_semaphore, #tpu.memory_space<semaphore_mem>>) src(%18 : memref<1x1x16x128xbf16, #tpu.memory_space<any>>) dst(%19 : memref<1x1x16x128xbf16, #tpu.memory_space<vmem>>)
    %c1_i32_14 = arith.constant 1 : i32
    %c0_i32_15 = arith.constant 0 : i32
    %c0_i32_16 = arith.constant 0 : i32
    %22 = tpu.memref_slice %arg3[%arg0, %17, %c0_i32_15, %c0_i32_16] : memref<2x16x16x128xbf16, #tpu.memory_space<any>> -> memref<1x1x16x128xbf16, #tpu.memory_space<any>>
    %c1_i32_17 = arith.constant 1 : i32
    %c0_i32_18 = arith.constant 0 : i32
    %c0_i32_19 = arith.constant 0 : i32
    %23 = tpu.memref_slice %arg10[%9, %c1_i32_17, %c0_i32_18, %c0_i32_19] : memref<2x2x16x128xbf16, #tpu.memory_space<vmem>> -> memref<1x1x16x128xbf16, #tpu.memory_space<vmem>>
    %24 = tpu.memref_slice %arg11[%9, %c1_i32_14] : memref<2x2x!tpu.dma_semaphore, #tpu.memory_space<semaphore_mem>> -> memref<1x1x!tpu.dma_semaphore, #tpu.memory_space<semaphore_mem>>
    %25 = tpu.memref_squeeze %24 : memref<1x1x!tpu.dma_semaphore, #tpu.memory_space<semaphore_mem>> -> memref<!tpu.dma_semaphore, #tpu.memory_space<semaphore_mem>>
    tpu.wait_dma2 semaphore(%25 : memref<!tpu.dma_semaphore, #tpu.memory_space<semaphore_mem>>) src(%22 : memref<1x1x16x128xbf16, #tpu.memory_space<any>>) dst(%23 : memref<1x1x16x128xbf16, #tpu.memory_space<vmem>>)
    %c1_i32_20 = arith.constant 1 : i32
    %26 = arith.addi %arg1, %c1_i32_20 : i32
    %c1_i32_21 = arith.constant 1 : i32
    %27 = arith.cmpi slt, %26, %c1_i32_21 : i32
    %28 = arith.extui %27 : i1 to i32
    %c0_i32_22 = arith.constant 0 : i32
    %29 = arith.cmpi ne, %28, %c0_i32_22 : i32
    scf.if %29 {
      %c1_i32_64 = arith.constant 1 : i32
      %117 = arith.addi %arg1, %c1_i32_64 : i32
      %c1_i32_65 = arith.constant 1 : i32
      %118 = arith.subi %c1_i32_65, %9 : i32
      %c16_i32_66 = arith.constant 16 : i32
      %119 = arith.muli %117, %c16_i32_66 : i32
      %c1_i32_67 = arith.constant 1 : i32
      %120 = arith.subi %119, %c1_i32_67 : i32
      %c0_i32_68 = arith.constant 0 : i32
      %121 = arith.maxsi %120, %c0_i32_68 : i32
      %c16_i32_69 = arith.constant 16 : i32
      %122 = arith.addi %119, %c16_i32_69 : i32
      %c15_i32_70 = arith.constant 15 : i32
      %123 = arith.minsi %122, %c15_i32_70 : i32
      %c0_i32_71 = arith.constant 0 : i32
      %c0_i32_72 = arith.constant 0 : i32
      %c0_i32_73 = arith.constant 0 : i32
      %124 = tpu.memref_slice %arg3[%arg0, %121, %c0_i32_72, %c0_i32_73] : memref<2x16x16x128xbf16, #tpu.memory_space<any>> -> memref<1x1x16x128xbf16, #tpu.memory_space<any>>
      %c0_i32_74 = arith.constant 0 : i32
      %c0_i32_75 = arith.constant 0 : i32
      %c0_i32_76 = arith.constant 0 : i32
      %125 = tpu.memref_slice %arg10[%118, %c0_i32_74, %c0_i32_75, %c0_i32_76] : memref<2x2x16x128xbf16, #tpu.memory_space<vmem>> -> memref<1x1x16x128xbf16, #tpu.memory_space<vmem>>
      %126 = tpu.memref_slice %arg11[%118, %c0_i32_71] : memref<2x2x!tpu.dma_semaphore, #tpu.memory_space<semaphore_mem>> -> memref<1x1x!tpu.dma_semaphore, #tpu.memory_space<semaphore_mem>>
      %127 = tpu.memref_squeeze %126 : memref<1x1x!tpu.dma_semaphore, #tpu.memory_space<semaphore_mem>> -> memref<!tpu.dma_semaphore, #tpu.memory_space<semaphore_mem>>
      tpu.enqueue_dma source(%124 : memref<1x1x16x128xbf16, #tpu.memory_space<any>>) target(%125 : memref<1x1x16x128xbf16, #tpu.memory_space<vmem>>) target_semaphore(%127 : memref<!tpu.dma_semaphore, #tpu.memory_space<semaphore_mem>>)
      %c1_i32_77 = arith.constant 1 : i32
      %c0_i32_78 = arith.constant 0 : i32
      %c0_i32_79 = arith.constant 0 : i32
      %128 = tpu.memref_slice %arg3[%arg0, %123, %c0_i32_78, %c0_i32_79] : memref<2x16x16x128xbf16, #tpu.memory_space<any>> -> memref<1x1x16x128xbf16, #tpu.memory_space<any>>
      %c1_i32_80 = arith.constant 1 : i32
      %c0_i32_81 = arith.constant 0 : i32
      %c0_i32_82 = arith.constant 0 : i32
      %129 = tpu.memref_slice %arg10[%118, %c1_i32_80, %c0_i32_81, %c0_i32_82] : memref<2x2x16x128xbf16, #tpu.memory_space<vmem>> -> memref<1x1x16x128xbf16, #tpu.memory_space<vmem>>
      %130 = tpu.memref_slice %arg11[%118, %c1_i32_77] : memref<2x2x!tpu.dma_semaphore, #tpu.memory_space<semaphore_mem>> -> memref<1x1x!tpu.dma_semaphore, #tpu.memory_space<semaphore_mem>>
      %131 = tpu.memref_squeeze %130 : memref<1x1x!tpu.dma_semaphore, #tpu.memory_space<semaphore_mem>> -> memref<!tpu.dma_semaphore, #tpu.memory_space<semaphore_mem>>
      tpu.enqueue_dma source(%128 : memref<1x1x16x128xbf16, #tpu.memory_space<any>>) target(%129 : memref<1x1x16x128xbf16, #tpu.memory_space<vmem>>) target_semaphore(%131 : memref<!tpu.dma_semaphore, #tpu.memory_space<semaphore_mem>>)
    } else {
    }
    %c0 = arith.constant 0 : index
    %c0_23 = arith.constant 0 : index
    %30 = vector.load %arg5[%c0, %c0_23] : memref<1x128xf32, #tpu.memory_space<vmem>>, vector<1x128xf32>
    %31 = vector.shape_cast %30 : vector<1x128xf32> to vector<1x1x128xf32>
    %c0_24 = arith.constant 0 : index
    %c0_25 = arith.constant 0 : index
    %32 = vector.load %arg6[%c0_24, %c0_25] : memref<1x128xf32, #tpu.memory_space<vmem>>, vector<1x128xf32>
    %33 = vector.shape_cast %32 : vector<1x128xf32> to vector<1x1x128xf32>
    %c0_26 = arith.constant 0 : index
    %c0_27 = arith.constant 0 : index
    %c0_28 = arith.constant 0 : index
    %c0_29 = arith.constant 0 : index
    %34 = vector.load %arg2[%c0_26, %c0_27, %c0_28, %c0_29] : memref<1x16x16x128xbf16, #tpu.memory_space<vmem>>, vector<1x16x16x128xbf16>
    %35 = vector.shape_cast %34 : vector<1x16x16x128xbf16> to vector<16x16x128xbf16>
    %36 = arith.extf %35 : vector<16x16x128xbf16> to vector<16x16x128xf32>
    %37 = vector.broadcast %31 : vector<1x1x128xf32> to vector<16x16x128xf32>
    %38 = arith.mulf %36, %37 : vector<16x16x128xf32>
    %39 = vector.broadcast %33 : vector<1x1x128xf32> to vector<16x16x128xf32>
    %40 = arith.addf %38, %39 : vector<16x16x128xf32>
    %cst = arith.constant 0.000000e+00 : f32
    %41 = vector.broadcast %cst : f32 to vector<16x16x128xf32>
    %42 = arith.maximumf %40, %41 : vector<16x16x128xf32>
    %43 = arith.truncf %42 : vector<16x16x128xf32> to vector<16x16x128xbf16>
    %44 = arith.index_cast %9 : i32 to index
    %c0_30 = arith.constant 0 : index
    %c0_31 = arith.constant 0 : index
    %c0_32 = arith.constant 0 : index
    %45 = vector.load %arg10[%44, %c0_30, %c0_31, %c0_32] : memref<2x2x16x128xbf16, #tpu.memory_space<vmem>>, vector<1x2x16x128xbf16>
    %46 = vector.shape_cast %45 : vector<1x2x16x128xbf16> to vector<2x16x128xbf16>
    %47 = vector.extract_strided_slice %46 {offsets = [0, 0, 0], sizes = [1, 16, 128], strides = [1, 1, 1]} : vector<2x16x128xbf16> to vector<1x16x128xbf16>
    %c0_i32_33 = arith.constant 0 : i32
    %48 = arith.cmpi sgt, %arg1, %c0_i32_33 : i32
    %49 = arith.extui %48 : i1 to i32
    %50 = arith.sitofp %49 : i32 to f32
    %51 = arith.extf %47 : vector<1x16x128xbf16> to vector<1x16x128xf32>
    %52 = vector.broadcast %31 : vector<1x1x128xf32> to vector<1x16x128xf32>
    %53 = arith.mulf %51, %52 : vector<1x16x128xf32>
    %54 = vector.broadcast %33 : vector<1x1x128xf32> to vector<1x16x128xf32>
    %55 = arith.addf %53, %54 : vector<1x16x128xf32>
    %cst_34 = arith.constant 0.000000e+00 : f32
    %56 = vector.broadcast %cst_34 : f32 to vector<1x16x128xf32>
    %57 = arith.maximumf %55, %56 : vector<1x16x128xf32>
    %58 = vector.broadcast %50 : f32 to vector<1x16x128xf32>
    %59 = arith.mulf %57, %58 : vector<1x16x128xf32>
    %60 = arith.truncf %59 : vector<1x16x128xf32> to vector<1x16x128xbf16>
    %61 = vector.extract_strided_slice %46 {offsets = [1, 0, 0], sizes = [1, 16, 128], strides = [1, 1, 1]} : vector<2x16x128xbf16> to vector<1x16x128xbf16>
    %c0_i32_35 = arith.constant 0 : i32
    %62 = arith.cmpi slt, %arg1, %c0_i32_35 : i32
    %63 = arith.extui %62 : i1 to i32
    %64 = arith.sitofp %63 : i32 to f32
    %65 = arith.extf %61 : vector<1x16x128xbf16> to vector<1x16x128xf32>
    %66 = vector.broadcast %31 : vector<1x1x128xf32> to vector<1x16x128xf32>
    %67 = arith.mulf %65, %66 : vector<1x16x128xf32>
    %68 = vector.broadcast %33 : vector<1x1x128xf32> to vector<1x16x128xf32>
    %69 = arith.addf %67, %68 : vector<1x16x128xf32>
    %cst_36 = arith.constant 0.000000e+00 : f32
    %70 = vector.broadcast %cst_36 : f32 to vector<1x16x128xf32>
    %71 = arith.maximumf %69, %70 : vector<1x16x128xf32>
    %72 = vector.broadcast %64 : f32 to vector<1x16x128xf32>
    %73 = arith.mulf %71, %72 : vector<1x16x128xf32>
    %74 = arith.truncf %73 : vector<1x16x128xf32> to vector<1x16x128xbf16>
    %75 = tpu.concatenate %60, %43, %74 in 0 : vector<1x16x128xbf16>, vector<16x16x128xbf16>, vector<1x16x128xbf16> -> vector<18x16x128xbf16>
    %cst_37 = arith.constant 0.000000e+00 : bf16
    %76 = vector.broadcast %cst_37 : bf16 to vector<18x1x128xbf16>
    %77 = vector.extract_strided_slice %75 {offsets = [0, 0, 0], sizes = [18, 15, 128], strides = [1, 1, 1]} : vector<18x16x128xbf16> to vector<18x15x128xbf16>
    %78 = tpu.concatenate %76, %77 in 1 : vector<18x1x128xbf16>, vector<18x15x128xbf16> -> vector<18x16x128xbf16>
    %79 = vector.extract_strided_slice %75 {offsets = [0, 1, 0], sizes = [18, 15, 128], strides = [1, 1, 1]} : vector<18x16x128xbf16> to vector<18x15x128xbf16>
    %80 = tpu.concatenate %79, %76 in 1 : vector<18x15x128xbf16>, vector<18x1x128xbf16> -> vector<18x16x128xbf16>
    %81 = tpu.concatenate %78, %75, %80 in 2 : vector<18x16x128xbf16>, vector<18x16x128xbf16>, vector<18x16x128xbf16> -> vector<18x16x384xbf16>
    %cst_38 = arith.constant 0.000000e+00 : f32
    %82 = vector.broadcast %cst_38 : f32 to vector<256x128xf32>
    %83 = vector.extract_strided_slice %81 {offsets = [0, 0, 0], sizes = [16, 16, 384], strides = [1, 1, 1]} : vector<18x16x384xbf16> to vector<16x16x384xbf16>
    %84 = vector.shape_cast %83 : vector<16x16x384xbf16> to vector<256x384xbf16>
    %c0_39 = arith.constant 0 : index
    %c0_40 = arith.constant 0 : index
    %c0_41 = arith.constant 0 : index
    %85 = vector.load %arg4[%c0_39, %c0_40, %c0_41] : memref<3x384x128xbf16, #tpu.memory_space<vmem>>, vector<1x384x128xbf16>
    %86 = vector.shape_cast %85 : vector<1x384x128xbf16> to vector<384x128xbf16>
    %cst_42 = arith.constant dense<0.000000e+00> : vector<256x128xf32>
    %87 = tpu.matmul %84, %86, %cst_42 {dimension_numbers = #tpu.dot_dimension_numbers<[1], [0], [0], [1], [0, 0, 1, 1], [], []>} : vector<256x384xbf16>, vector<384x128xbf16>, vector<256x128xf32> -> vector<256x128xf32>
    %88 = arith.addf %82, %87 : vector<256x128xf32>
    %89 = vector.extract_strided_slice %81 {offsets = [1, 0, 0], sizes = [16, 16, 384], strides = [1, 1, 1]} : vector<18x16x384xbf16> to vector<16x16x384xbf16>
    %90 = vector.shape_cast %89 : vector<16x16x384xbf16> to vector<256x384xbf16>
    %c1 = arith.constant 1 : index
    %c0_43 = arith.constant 0 : index
    %c0_44 = arith.constant 0 : index
    %91 = vector.load %arg4[%c1, %c0_43, %c0_44] : memref<3x384x128xbf16, #tpu.memory_space<vmem>>, vector<1x384x128xbf16>
    %92 = vector.shape_cast %91 : vector<1x384x128xbf16> to vector<384x128xbf16>
    %cst_45 = arith.constant dense<0.000000e+00> : vector<256x128xf32>
    %93 = tpu.matmul %90, %92, %cst_45 {dimension_numbers = #tpu.dot_dimension_numbers<[1], [0], [0], [1], [0, 0, 1, 1], [], []>} : vector<256x384xbf16>, vector<384x128xbf16>, vector<256x128xf32> -> vector<256x128xf32>
    %94 = arith.addf %88, %93 : vector<256x128xf32>
    %95 = vector.extract_strided_slice %81 {offsets = [2, 0, 0], sizes = [16, 16, 384], strides = [1, 1, 1]} : vector<18x16x384xbf16> to vector<16x16x384xbf16>
    %96 = vector.shape_cast %95 : vector<16x16x384xbf16> to vector<256x384xbf16>
    %c2 = arith.constant 2 : index
    %c0_46 = arith.constant 0 : index
    %c0_47 = arith.constant 0 : index
    %97 = vector.load %arg4[%c2, %c0_46, %c0_47] : memref<3x384x128xbf16, #tpu.memory_space<vmem>>, vector<1x384x128xbf16>
    %98 = vector.shape_cast %97 : vector<1x384x128xbf16> to vector<384x128xbf16>
    %cst_48 = arith.constant dense<0.000000e+00> : vector<256x128xf32>
    %99 = tpu.matmul %96, %98, %cst_48 {dimension_numbers = #tpu.dot_dimension_numbers<[1], [0], [0], [1], [0, 0, 1, 1], [], []>} : vector<256x384xbf16>, vector<384x128xbf16>, vector<256x128xf32> -> vector<256x128xf32>
    %100 = arith.addf %94, %99 : vector<256x128xf32>
    %cst_49 = arith.constant dense<0.000000e+00> : vector<128xf32>
    %101 = vector.multi_reduction <add>, %100, %cst_49 [0] : vector<256x128xf32> to vector<128xf32>
    %102 = vector.shape_cast %101 : vector<128xf32> to vector<1x128xf32>
    %cst_50 = arith.constant 3.906250e-03 : f32
    %103 = vector.broadcast %cst_50 : f32 to vector<1x128xf32>
    %104 = arith.mulf %102, %103 : vector<1x128xf32>
    %105 = vector.broadcast %104 : vector<1x128xf32> to vector<256x128xf32>
    %106 = arith.subf %100, %105 : vector<256x128xf32>
    %107 = arith.mulf %106, %106 : vector<256x128xf32>
    %cst_51 = arith.constant dense<0.000000e+00> : vector<128xf32>
    %108 = vector.multi_reduction <add>, %107, %cst_51 [0] : vector<256x128xf32> to vector<128xf32>
    %109 = vector.shape_cast %108 : vector<128xf32> to vector<1x128xf32>
    %110 = vector.shape_cast %102 : vector<1x128xf32> to vector<1x1x1x128xf32>
    %c0_52 = arith.constant 0 : index
    %c0_53 = arith.constant 0 : index
    %c0_54 = arith.constant 0 : index
    %c0_55 = arith.constant 0 : index
    %111 = vector.load %arg8[%c0_52, %c0_53, %c0_54, %c0_55] : memref<1x1x1x128xf32, #tpu.memory_space<vmem>>, vector<1x1x1x128xf32>
    tpu.vector_store %arg8[%c0_52, %c0_53, %c0_54, %c0_55], %110 {strides = array<i32>} : memref<1x1x1x128xf32, #tpu.memory_space<vmem>>, vector<1x1x1x128xf32>,
    %112 = vector.shape_cast %109 : vector<1x128xf32> to vector<1x1x1x128xf32>
    %c0_56 = arith.constant 0 : index
    %c0_57 = arith.constant 0 : index
    %c0_58 = arith.constant 0 : index
    %c0_59 = arith.constant 0 : index
    %113 = vector.load %arg9[%c0_56, %c0_57, %c0_58, %c0_59] : memref<1x1x1x128xf32, #tpu.memory_space<vmem>>, vector<1x1x1x128xf32>
    tpu.vector_store %arg9[%c0_56, %c0_57, %c0_58, %c0_59], %112 {strides = array<i32>} : memref<1x1x1x128xf32, #tpu.memory_space<vmem>>, vector<1x1x1x128xf32>,
    %114 = arith.truncf %100 : vector<256x128xf32> to vector<256x128xbf16>
    %115 = vector.shape_cast %114 : vector<256x128xbf16> to vector<1x16x16x128xbf16>
    %c0_60 = arith.constant 0 : index
    %c0_61 = arith.constant 0 : index
    %c0_62 = arith.constant 0 : index
    %c0_63 = arith.constant 0 : index
    %116 = vector.load %arg7[%c0_60, %c0_61, %c0_62, %c0_63] : memref<1x16x16x128xbf16, #tpu.memory_space<vmem>>, vector<1x16x16x128xbf16>
    tpu.vector_store %arg7[%c0_60, %c0_61, %c0_62, %c0_63], %115 {strides = array<i32>} : memref<1x16x16x128xbf16, #tpu.memory_space<vmem>>, vector<1x16x16x128xbf16>,
    return
  }
  func.func @transform_0(%arg0: i32, %arg1: i32) -> (i32, i32, i32, i32) {
    %c0_i32 = arith.constant 0 : i32
    %c0_i32_0 = arith.constant 0 : i32
    %c0_i32_1 = arith.constant 0 : i32
    return %arg0, %arg1, %c0_i32, %c0_i32_0 : i32, i32, i32, i32
  }
  func.func @transform_2(%arg0: i32, %arg1: i32) -> (i32, i32, i32) {
    %c0_i32 = arith.constant 0 : i32
    %c0_i32_0 = arith.constant 0 : i32
    %c0_i32_1 = arith.constant 0 : i32
    %c0_i32_2 = arith.constant 0 : i32
    return %c0_i32, %c0_i32_0, %c0_i32_1 : i32, i32, i32
  }
  func.func @transform_3(%arg0: i32, %arg1: i32) -> (i32, i32) {
    %c0_i32 = arith.constant 0 : i32
    %c0_i32_0 = arith.constant 0 : i32
    %c0_i32_1 = arith.constant 0 : i32
    return %c0_i32, %c0_i32_0 : i32, i32
  }
  func.func @transform_4(%arg0: i32, %arg1: i32) -> (i32, i32) {
    %c0_i32 = arith.constant 0 : i32
    %c0_i32_0 = arith.constant 0 : i32
    %c0_i32_1 = arith.constant 0 : i32
    return %c0_i32, %c0_i32_0 : i32, i32
  }
  func.func @transform_5(%arg0: i32, %arg1: i32) -> (i32, i32, i32, i32) {
    %c0_i32 = arith.constant 0 : i32
    %c0_i32_0 = arith.constant 0 : i32
    %c0_i32_1 = arith.constant 0 : i32
    return %arg0, %arg1, %c0_i32, %c0_i32_0 : i32, i32, i32, i32
  }
  func.func @transform_6(%arg0: i32, %arg1: i32) -> (i32, i32, i32, i32) {
    %c0_i32 = arith.constant 0 : i32
    %c0_i32_0 = arith.constant 0 : i32
    %c0_i32_1 = arith.constant 0 : i32
    return %arg0, %arg1, %c0_i32, %c0_i32_0 : i32, i32, i32, i32
  }
  func.func @transform_7(%arg0: i32, %arg1: i32) -> (i32, i32, i32, i32) {
    %c0_i32 = arith.constant 0 : i32
    %c0_i32_0 = arith.constant 0 : i32
    %c0_i32_1 = arith.constant 0 : i32
    return %arg0, %arg1, %c0_i32, %c0_i32_0 : i32, i32, i32, i32
  }
}

module attributes {stable_mosaic.version = 11 : i64} {
  func.func @_bn_relu_kernel(%arg0: i32, %arg1: memref<512x128xbf16, #tpu.memory_space<vmem>>, %arg2: memref<1x128xf32, #tpu.memory_space<vmem>>, %arg3: memref<1x128xf32, #tpu.memory_space<vmem>>, %arg4: memref<512x128xf32, #tpu.memory_space<vmem>>) attributes {dimension_semantics = [#tpu.dimension_semantics<parallel>], iteration_bounds = array<i64: 1>, scalar_prefetch = 0 : i64, scratch_operands = 0 : i64, tpu.core_type = #tpu.core_type<tc>, window_params = [{transform_indices = @transform_0, window_bounds = array<i64: 512, 128>}, {pipeline_mode = #tpu.pipeline_mode<synchronous>, transform_indices = @transform_1, window_bounds = array<i64: 1, 128>}, {pipeline_mode = #tpu.pipeline_mode<synchronous>, transform_indices = @transform_2, window_bounds = array<i64: 1, 128>}, {transform_indices = @transform_3, window_bounds = array<i64: 512, 128>}]} {
    %c0 = arith.constant 0 : index
    %c0_0 = arith.constant 0 : index
    %0 = vector.load %arg1[%c0, %c0_0] : memref<512x128xbf16, #tpu.memory_space<vmem>>, vector<512x128xbf16>
    %1 = arith.extf %0 : vector<512x128xbf16> to vector<512x128xf32>
    %c0_1 = arith.constant 0 : index
    %c0_2 = arith.constant 0 : index
    %2 = vector.load %arg2[%c0_1, %c0_2] : memref<1x128xf32, #tpu.memory_space<vmem>>, vector<1x128xf32>
    %3 = vector.broadcast %2 : vector<1x128xf32> to vector<512x128xf32>
    %4 = arith.mulf %1, %3 : vector<512x128xf32>
    %c0_3 = arith.constant 0 : index
    %c0_4 = arith.constant 0 : index
    %5 = vector.load %arg3[%c0_3, %c0_4] : memref<1x128xf32, #tpu.memory_space<vmem>>, vector<1x128xf32>
    %6 = vector.broadcast %5 : vector<1x128xf32> to vector<512x128xf32>
    %7 = arith.addf %4, %6 : vector<512x128xf32>
    %cst = arith.constant 0.000000e+00 : f32
    %8 = vector.broadcast %cst : f32 to vector<512x128xf32>
    %9 = arith.maximumf %7, %8 : vector<512x128xf32>
    %c0_5 = arith.constant 0 : index
    %c0_6 = arith.constant 0 : index
    %10 = vector.load %arg4[%c0_5, %c0_6] : memref<512x128xf32, #tpu.memory_space<vmem>>, vector<512x128xf32>
    tpu.vector_store %arg4[%c0_5, %c0_6], %9 {strides = array<i32>} : memref<512x128xf32, #tpu.memory_space<vmem>>, vector<512x128xf32>,
    return
  }
  func.func @transform_0(%arg0: i32) -> (i32, i32) {
    %c0_i32 = arith.constant 0 : i32
    %c0_i32_0 = arith.constant 0 : i32
    return %arg0, %c0_i32 : i32, i32
  }
  func.func @transform_1(%arg0: i32) -> (i32, i32) {
    %c0_i32 = arith.constant 0 : i32
    %c0_i32_0 = arith.constant 0 : i32
    %c0_i32_1 = arith.constant 0 : i32
    return %c0_i32, %c0_i32_0 : i32, i32
  }
  func.func @transform_2(%arg0: i32) -> (i32, i32) {
    %c0_i32 = arith.constant 0 : i32
    %c0_i32_0 = arith.constant 0 : i32
    %c0_i32_1 = arith.constant 0 : i32
    return %c0_i32, %c0_i32_0 : i32, i32
  }
  func.func @transform_3(%arg0: i32) -> (i32, i32) {
    %c0_i32 = arith.constant 0 : i32
    %c0_i32_0 = arith.constant 0 : i32
    return %arg0, %c0_i32 : i32, i32
  }
}

</mosaic_0001>

<bundles_post_ra>
// kernel: unet_up_block.7
= control target key start
LH: loop header
LB: loop body
LE: loop exit
PB: predicated region body
PF: predicated region fallthrough
CT: control target
= control target key end

     0   :  { %s1023_s0 = inlined_call_operand.vmem [shape: bf16[512,128], index: 0, kind: input, shape index: {}]   ;;  %s1024_s1 = inlined_call_operand.vmem [shape: f32[1,128], index: 1, kind: input, shape index: {}]   ;;  %s1025_s2 = inlined_call_operand.vmem [shape: f32[1,128], index: 2, kind: input, shape index: {}]   ;;  %s1026_s3 = inlined_call_operand.vmem [shape: f32[512,128], index: 3, kind: output, shape index: {}]  }
   0x1   :  { %v419_v0 = vld [vmem:[%s1023_s0] sm:$0xff]   ;;  %v546_v4 = vld [vmem:[%s1023_s0 + $0x8] sm:$0xff]   ;;  %v547_v5 = vld [vmem:[%s1023_s0 + $0x10] sm:$0xff]  }
   0x2   :  { %v603_v1 = vld [vmem:[%s1024_s1] ss:$0 sm:$0xff]  ;;  %v420_v2 = vunpack.c.l.bf16 %v419_v0  ;;  %v421_v3 = vunpack.c.h.bf16 %v419_v0  ;;  %v548_v6 = vld [vmem:[%s1023_s0 + $0x18] sm:$0xff]   ;;  %v424_v8 = vunpack.c.l.bf16 %v546_v4  ;;  %v425_v9 = vunpack.c.h.bf16 %v546_v4  ;;  %v550_v33 = vld [vmem:[%s1023_s0 + $0x28] sm:$0xff]  }
   0x3   :  { %v617_v7 = vld [vmem:[%s1025_s2] ss:$0 sm:$0xff]  ;;  %v428_v10 = vunpack.c.l.bf16 %v547_v5  ;;  %v429_v11 = vunpack.c.h.bf16 %v547_v5  ;;  %v432_v14 = vunpack.c.l.bf16 %v548_v6  ;;  %v433_v15 = vunpack.c.h.bf16 %v548_v6  ;;  %v551_v34 = vld [vmem:[%s1023_s0 + $0x30] sm:$0xff]   ;;  %v552_v39 = vld [vmem:[%s1023_s0 + $0x38] sm:$0xff]  }
   0x4   :  { %v149_v12 = vmul.f32 %v420_v2, %v603_v1  ;;  %v150_v13 = vmul.f32 %v421_v3, %v603_v1  ;;  %v151_v16 = vmul.f32 %v424_v8, %v603_v1  ;;  %v152_v17 = vmul.f32 %v425_v9, %v603_v1  ;;  %v549_v28 = vld [vmem:[%s1023_s0 + $0x20] sm:$0xff]   ;;  %v554_v6 = vld [vmem:[%s1023_s0 + $0x48] sm:$0xff]   ;;  %v555_v8 = vld [vmem:[%s1023_s0 + $0x50] sm:$0xff]  }
   0x5   :  { %v153_v18 = vmul.f32 %v428_v10, %v603_v1  ;;  %v154_v19 = vmul.f32 %v429_v11, %v603_v1  ;;  %v155_v22 = vmul.f32 %v432_v14, %v603_v1  ;;  %v156_v23 = vmul.f32 %v433_v15, %v603_v1  ;;  %v553_v0 = vld [vmem:[%s1023_s0 + $0x40] sm:$0xff]  }
   0x6   :  { %v220_v20 = vadd.f32 %v617_v7, %v149_v12  ;;  %v221_v21 = vadd.f32 %v617_v7, %v150_v13  ;;  %v222_v24 = vadd.f32 %v617_v7, %v151_v16  ;;  %v223_v25 = vadd.f32 %v617_v7, %v152_v17  ;;  %v556_v13 = vld [vmem:[%s1023_s0 + $0x58] sm:$0xff]  }
   0x7   :  { %v224_v26 = vadd.f32 %v617_v7, %v153_v18  ;;  %v225_v27 = vadd.f32 %v617_v7, %v154_v19  ;;  %v226_v31 = vadd.f32 %v617_v7, %v155_v22  ;;  %v227_v32 = vadd.f32 %v617_v7, %v156_v23 }
   0x8   :  { %v284_v29 = vmax.f32 %v220_v20, 0.0  ;;  %v285_v30 = vmax.f32 %v221_v21, 0.0  ;;  %v286_v35 = vmax.f32 %v222_v24, 0.0  ;;  %v287_v36 = vmax.f32 %v223_v25, 0.0 }
   0x9   :  { %v288_v37 = vmax.f32 %v224_v26, 0.0  ;;  %v289_v38 = vmax.f32 %v225_v27, 0.0  ;;  %v290_v40 = vmax.f32 %v226_v31, 0.0  ;;  %v291_v41 = vmax.f32 %v227_v32, 0.0 }
   0xa   :  { %348 = vst [vmem:[%s1026_s3] sm:$0xff] %v284_v29  ;;  %349 = vst [vmem:[%s1026_s3 + $0x8] sm:$0xff] %v285_v30  ;;  %v436_v42 = vunpack.c.l.bf16 %v549_v28  ;;  %v437_v43 = vunpack.c.h.bf16 %v549_v28  ;;  %v440_v44 = vunpack.c.l.bf16 %v550_v33  ;;  %v441_v45 = vunpack.c.h.bf16 %v550_v33 }
   0xb   :  { %350 = vst [vmem:[%s1026_s3 + $0x10] sm:$0xff] %v286_v35  ;;  %351 = vst [vmem:[%s1026_s3 + $0x18] sm:$0xff] %v287_v36  ;;  %v444_v46 = vunpack.c.l.bf16 %v551_v34  ;;  %v445_v47 = vunpack.c.h.bf16 %v551_v34  ;;  %v448_v50 = vunpack.c.l.bf16 %v552_v39  ;;  %v449_v51 = vunpack.c.h.bf16 %v552_v39 }
   0xc   :  { %352 = vst [vmem:[%s1026_s3 + $0x20] sm:$0xff] %v288_v37  ;;  %353 = vst [vmem:[%s1026_s3 + $0x28] sm:$0xff] %v289_v38  ;;  %v157_v48 = vmul.f32 %v436_v42, %v603_v1  ;;  %v158_v49 = vmul.f32 %v437_v43, %v603_v1  ;;  %v159_v52 = vmul.f32 %v440_v44, %v603_v1  ;;  %v452_v16 = vunpack.c.l.bf16 %v553_v0  ;;  %v557_v38 = vld [vmem:[%s1023_s0 + $0x60] sm:$0xff]   ;;  %v558_v43 = vld [vmem:[%s1023_s0 + $0x68] sm:$0xff]  }
   0xd   :  { %354 = vst [vmem:[%s1026_s3 + $0x30] sm:$0xff] %v290_v40  ;;  %355 = vst [vmem:[%s1026_s3 + $0x38] sm:$0xff] %v291_v41  ;;  %v160_v53 = vmul.f32 %v441_v45, %v603_v1  ;;  %v161_v54 = vmul.f32 %v444_v46, %v603_v1  ;;  %v162_v55 = vmul.f32 %v445_v47, %v603_v1  ;;  %v453_v17 = vunpack.c.h.bf16 %v553_v0  ;;  %v559_v44 = vld [vmem:[%s1023_s0 + $0x70] sm:$0xff]  }
   0xe   :  { %v228_v56 = vadd.f32 %v617_v7, %v157_v48  ;;  %v229_v57 = vadd.f32 %v617_v7, %v158_v49  ;;  %v163_v58 = vmul.f32 %v448_v50, %v603_v1  ;;  %v164_v59 = vmul.f32 %v449_v51, %v603_v1  ;;  %v560_v49 = vld [vmem:[%s1023_s0 + $0x78] sm:$0xff]  }
   0xf   :  { %v230_v60 = vadd.f32 %v617_v7, %v159_v52  ;;  %v231_v61 = vadd.f32 %v617_v7, %v160_v53  ;;  %v232_v62 = vadd.f32 %v617_v7, %v161_v54  ;;  %v233_v63 = vadd.f32 %v617_v7, %v162_v55 }
  0x10   :  { %v292_v2 = vmax.f32 %v228_v56, 0.0  ;;  %v293_v3 = vmax.f32 %v229_v57, 0.0  ;;  %v234_v4 = vadd.f32 %v617_v7, %v163_v58  ;;  %v235_v5 = vadd.f32 %v617_v7, %v164_v59 }
  0x11   :  { %v294_v9 = vmax.f32 %v230_v60, 0.0  ;;  %v295_v10 = vmax.f32 %v231_v61, 0.0  ;;  %v296_v11 = vmax.f32 %v232_v62, 0.0  ;;  %v297_v12 = vmax.f32 %v233_v63, 0.0 }
  0x12   :  { %356 = vst [vmem:[%s1026_s3 + $0x40] sm:$0xff] %v292_v2  ;;  %357 = vst [vmem:[%s1026_s3 + $0x48] sm:$0xff] %v293_v3  ;;  %v298_v14 = vmax.f32 %v234_v4, 0.0  ;;  %v299_v15 = vmax.f32 %v235_v5, 0.0  ;;  %v456_v18 = vunpack.c.l.bf16 %v554_v6  ;;  %v457_v19 = vunpack.c.h.bf16 %v554_v6 }
  0x13   :  { %358 = vst [vmem:[%s1026_s3 + $0x50] sm:$0xff] %v294_v9  ;;  %359 = vst [vmem:[%s1026_s3 + $0x58] sm:$0xff] %v295_v10  ;;  %v460_v20 = vunpack.c.l.bf16 %v555_v8  ;;  %v461_v21 = vunpack.c.h.bf16 %v555_v8  ;;  %v165_v22 = vmul.f32 %v452_v16, %v603_v1  ;;  %v166_v23 = vmul.f32 %v453_v17, %v603_v1  ;;  %v562_v17 = vld [vmem:[%s1023_s0 + $0x88] sm:$0xff]  }
  0x14   :  { %360 = vst [vmem:[%s1026_s3 + $0x60] sm:$0xff] %v296_v11  ;;  %361 = vst [vmem:[%s1026_s3 + $0x68] sm:$0xff] %v297_v12  ;;  %v464_v24 = vunpack.c.l.bf16 %v556_v13  ;;  %v465_v25 = vunpack.c.h.bf16 %v556_v13  ;;  %v167_v26 = vmul.f32 %v456_v18, %v603_v1  ;;  %v168_v27 = vmul.f32 %v457_v19, %v603_v1  ;;  %v561_v12 = vld [vmem:[%s1023_s0 + $0x80] sm:$0xff]   ;;  %v563_v18 = vld [vmem:[%s1023_s0 + $0x90] sm:$0xff]  }
  0x15   :  { %362 = vst [vmem:[%s1026_s3 + $0x70] sm:$0xff] %v298_v14  ;;  %363 = vst [vmem:[%s1026_s3 + $0x78] sm:$0xff] %v299_v15  ;;  %v169_v28 = vmul.f32 %v460_v20, %v603_v1  ;;  %v170_v29 = vmul.f32 %v461_v21, %v603_v1  ;;  %v236_v30 = vadd.f32 %v617_v7, %v165_v22  ;;  %v468_v52 = vunpack.c.l.bf16 %v557_v38 }
  0x16   :  { %v237_v31 = vadd.f32 %v617_v7, %v166_v23  ;;  %v171_v32 = vmul.f32 %v464_v24, %v603_v1  ;;  %v172_v33 = vmul.f32 %v465_v25, %v603_v1  ;;  %v238_v34 = vadd.f32 %v617_v7, %v167_v26  ;;  %v564_v23 = vld [vmem:[%s1023_s0 + $0x98] sm:$0xff]  }
  0x17   :  { %v239_v35 = vadd.f32 %v617_v7, %v168_v27  ;;  %v240_v36 = vadd.f32 %v617_v7, %v169_v28  ;;  %v241_v37 = vadd.f32 %v617_v7, %v170_v29  ;;  %v300_v39 = vmax.f32 %v236_v30, 0.0 }
  0x18   :  { %v301_v40 = vmax.f32 %v237_v31, 0.0  ;;  %v242_v41 = vadd.f32 %v617_v7, %v171_v32  ;;  %v243_v42 = vadd.f32 %v617_v7, %v172_v33  ;;  %v302_v45 = vmax.f32 %v238_v34, 0.0 }
  0x19   :  { %v303_v46 = vmax.f32 %v239_v35, 0.0  ;;  %v304_v47 = vmax.f32 %v240_v36, 0.0  ;;  %v305_v48 = vmax.f32 %v241_v37, 0.0  ;;  %364 = vst [vmem:[%s1026_s3 + $0x80] sm:$0xff] %v300_v39  ;;  %v469_v53 = vunpack.c.h.bf16 %v557_v38 }
  0x1a   :  { %365 = vst [vmem:[%s1026_s3 + $0x88] sm:$0xff] %v301_v40  ;;  %v306_v50 = vmax.f32 %v242_v41, 0.0  ;;  %v307_v51 = vmax.f32 %v243_v42, 0.0  ;;  %366 = vst [vmem:[%s1026_s3 + $0x90] sm:$0xff] %v302_v45  ;;  %v472_v54 = vunpack.c.l.bf16 %v558_v43  ;;  %v473_v55 = vunpack.c.h.bf16 %v558_v43 }
  0x1b   :  { %367 = vst [vmem:[%s1026_s3 + $0x98] sm:$0xff] %v303_v46  ;;  %368 = vst [vmem:[%s1026_s3 + $0xa0] sm:$0xff] %v304_v47  ;;  %v476_v56 = vunpack.c.l.bf16 %v559_v44  ;;  %v477_v57 = vunpack.c.h.bf16 %v559_v44  ;;  %v173_v58 = vmul.f32 %v468_v52, %v603_v1  ;;  %v174_v59 = vmul.f32 %v469_v53, %v603_v1  ;;  %v566_v53 = vld [vmem:[%s1023_s0 + $0xa8] sm:$0xff]  }
  0x1c   :  { %369 = vst [vmem:[%s1026_s3 + $0xa8] sm:$0xff] %v305_v48  ;;  %370 = vst [vmem:[%s1026_s3 + $0xb0] sm:$0xff] %v306_v50  ;;  %v480_v60 = vunpack.c.l.bf16 %v560_v49  ;;  %v481_v61 = vunpack.c.h.bf16 %v560_v49  ;;  %v175_v62 = vmul.f32 %v472_v54, %v603_v1  ;;  %v176_v63 = vmul.f32 %v473_v55, %v603_v1  ;;  %v565_v48 = vld [vmem:[%s1023_s0 + $0xa0] sm:$0xff]   ;;  %v567_v54 = vld [vmem:[%s1023_s0 + $0xb0] sm:$0xff]  }
  0x1d   :  { %371 = vst [vmem:[%s1026_s3 + $0xb8] sm:$0xff] %v307_v51  ;;  %v177_v0 = vmul.f32 %v476_v56, %v603_v1  ;;  %v178_v2 = vmul.f32 %v477_v57, %v603_v1  ;;  %v244_v3 = vadd.f32 %v617_v7, %v173_v58  ;;  %v245_v4 = vadd.f32 %v617_v7, %v174_v59  ;;  %v568_v59 = vld [vmem:[%s1023_s0 + $0xb8] sm:$0xff]  }
  0x1e   :  { %v179_v5 = vmul.f32 %v480_v60, %v603_v1  ;;  %v180_v6 = vmul.f32 %v481_v61, %v603_v1  ;;  %v246_v8 = vadd.f32 %v617_v7, %v175_v62  ;;  %v247_v9 = vadd.f32 %v617_v7, %v176_v63 }
  0x1f   :  { %v248_v10 = vadd.f32 %v617_v7, %v177_v0  ;;  %v249_v11 = vadd.f32 %v617_v7, %v178_v2  ;;  %v308_v13 = vmax.f32 %v244_v3, 0.0  ;;  %v309_v14 = vmax.f32 %v245_v4, 0.0 }
  0x20   :  { %v250_v15 = vadd.f32 %v617_v7, %v179_v5  ;;  %v251_v16 = vadd.f32 %v617_v7, %v180_v6  ;;  %v310_v19 = vmax.f32 %v246_v8, 0.0  ;;  %v311_v20 = vmax.f32 %v247_v9, 0.0 }
  0x21   :  { %v312_v21 = vmax.f32 %v248_v10, 0.0  ;;  %v313_v22 = vmax.f32 %v249_v11, 0.0  ;;  %372 = vst [vmem:[%s1026_s3 + $0xc0] sm:$0xff] %v308_v13  ;;  %373 = vst [vmem:[%s1026_s3 + $0xc8] sm:$0xff] %v309_v14  ;;  %v484_v26 = vunpack.c.l.bf16 %v561_v12  ;;  %v485_v27 = vunpack.c.h.bf16 %v561_v12 }
  0x22   :  { %v314_v24 = vmax.f32 %v250_v15, 0.0  ;;  %v315_v25 = vmax.f32 %v251_v16, 0.0  ;;  %374 = vst [vmem:[%s1026_s3 + $0xd0] sm:$0xff] %v310_v19  ;;  %375 = vst [vmem:[%s1026_s3 + $0xd8] sm:$0xff] %v311_v20  ;;  %v488_v28 = vunpack.c.l.bf16 %v562_v17  ;;  %v489_v29 = vunpack.c.h.bf16 %v562_v17 }
  0x23   :  { %376 = vst [vmem:[%s1026_s3 + $0xe0] sm:$0xff] %v312_v21  ;;  %377 = vst [vmem:[%s1026_s3 + $0xe8] sm:$0xff] %v313_v22  ;;  %v492_v30 = vunpack.c.l.bf16 %v563_v18  ;;  %v493_v31 = vunpack.c.h.bf16 %v563_v18  ;;  %v181_v32 = vmul.f32 %v484_v26, %v603_v1  ;;  %v182_v33 = vmul.f32 %v485_v27, %v603_v1  ;;  %v569_v22 = vld [vmem:[%s1023_s0 + $0xc0] sm:$0xff]   ;;  %v570_v27 = vld [vmem:[%s1023_s0 + $0xc8] sm:$0xff]  }
  0x24   :  { %378 = vst [vmem:[%s1026_s3 + $0xf0] sm:$0xff] %v314_v24  ;;  %379 = vst [vmem:[%s1026_s3 + $0xf8] sm:$0xff] %v315_v25  ;;  %v496_v34 = vunpack.c.l.bf16 %v564_v23  ;;  %v497_v35 = vunpack.c.h.bf16 %v564_v23  ;;  %v183_v36 = vmul.f32 %v488_v28, %v603_v1  ;;  %v184_v37 = vmul.f32 %v489_v29, %v603_v1  ;;  %v571_v28 = vld [vmem:[%s1023_s0 + $0xd0] sm:$0xff]  }
  0x25   :  { %v185_v38 = vmul.f32 %v492_v30, %v603_v1  ;;  %v186_v39 = vmul.f32 %v493_v31, %v603_v1  ;;  %v252_v40 = vadd.f32 %v617_v7, %v181_v32  ;;  %v253_v41 = vadd.f32 %v617_v7, %v182_v33  ;;  %v572_v33 = vld [vmem:[%s1023_s0 + $0xd8] sm:$0xff]  }
  0x26   :  { %v187_v42 = vmul.f32 %v496_v34, %v603_v1  ;;  %v188_v43 = vmul.f32 %v497_v35, %v603_v1  ;;  %v254_v44 = vadd.f32 %v617_v7, %v183_v36  ;;  %v255_v45 = vadd.f32 %v617_v7, %v184_v37 }
  0x27   :  { %v256_v46 = vadd.f32 %v617_v7, %v185_v38  ;;  %v257_v47 = vadd.f32 %v617_v7, %v186_v39  ;;  %v316_v49 = vmax.f32 %v252_v40, 0.0  ;;  %v317_v50 = vmax.f32 %v253_v41, 0.0 }
  0x28   :  { %v258_v51 = vadd.f32 %v617_v7, %v187_v42  ;;  %v259_v52 = vadd.f32 %v617_v7, %v188_v43  ;;  %v318_v55 = vmax.f32 %v254_v44, 0.0  ;;  %v319_v56 = vmax.f32 %v255_v45, 0.0 }
  0x29   :  { %v320_v57 = vmax.f32 %v256_v46, 0.0  ;;  %v321_v58 = vmax.f32 %v257_v47, 0.0  ;;  %380 = vst [vmem:[%s1026_s3 + $0x100] sm:$0xff] %v316_v49  ;;  %381 = vst [vmem:[%s1026_s3 + $0x108] sm:$0xff] %v317_v50  ;;  %v500_v62 = vunpack.c.l.bf16 %v565_v48  ;;  %v501_v63 = vunpack.c.h.bf16 %v565_v48 }
  0x2a   :  { %v322_v60 = vmax.f32 %v258_v51, 0.0  ;;  %v323_v61 = vmax.f32 %v259_v52, 0.0  ;;  %382 = vst [vmem:[%s1026_s3 + $0x110] sm:$0xff] %v318_v55  ;;  %383 = vst [vmem:[%s1026_s3 + $0x118] sm:$0xff] %v319_v56  ;;  %v504_v0 = vunpack.c.l.bf16 %v566_v53  ;;  %v505_v2 = vunpack.c.h.bf16 %v566_v53 }
  0x2b   :  { %384 = vst [vmem:[%s1026_s3 + $0x120] sm:$0xff] %v320_v57  ;;  %385 = vst [vmem:[%s1026_s3 + $0x128] sm:$0xff] %v321_v58  ;;  %v508_v3 = vunpack.c.l.bf16 %v567_v54  ;;  %v509_v4 = vunpack.c.h.bf16 %v567_v54  ;;  %v189_v5 = vmul.f32 %v500_v62, %v603_v1  ;;  %v190_v6 = vmul.f32 %v501_v63, %v603_v1  ;;  %v573_v58 = vld [vmem:[%s1023_s0 + $0xe0] sm:$0xff]   ;;  %v574_v63 = vld [vmem:[%s1023_s0 + $0xe8] sm:$0xff]  }
  0x2c   :  { %386 = vst [vmem:[%s1026_s3 + $0x130] sm:$0xff] %v322_v60  ;;  %387 = vst [vmem:[%s1026_s3 + $0x138] sm:$0xff] %v323_v61  ;;  %v512_v8 = vunpack.c.l.bf16 %v568_v59  ;;  %v513_v9 = vunpack.c.h.bf16 %v568_v59  ;;  %v191_v10 = vmul.f32 %v504_v0, %v603_v1  ;;  %v192_v11 = vmul.f32 %v505_v2, %v603_v1  ;;  %v575_v0 = vld [vmem:[%s1023_s0 + $0xf0] sm:$0xff]  }
  0x2d   :  { %v193_v12 = vmul.f32 %v508_v3, %v603_v1  ;;  %v194_v13 = vmul.f32 %v509_v4, %v603_v1  ;;  %v260_v14 = vadd.f32 %v617_v7, %v189_v5  ;;  %v261_v15 = vadd.f32 %v617_v7, %v190_v6  ;;  %v576_v6 = vld [vmem:[%s1023_s0 + $0xf8] sm:$0xff]  }
  0x2e   :  { %v195_v16 = vmul.f32 %v512_v8, %v603_v1  ;;  %v196_v17 = vmul.f32 %v513_v9, %v603_v1  ;;  %v262_v18 = vadd.f32 %v617_v7, %v191_v10  ;;  %v263_v19 = vadd.f32 %v617_v7, %v192_v11 }
  0x2f   :  { %v264_v20 = vadd.f32 %v617_v7, %v193_v12  ;;  %v265_v21 = vadd.f32 %v617_v7, %v194_v13  ;;  %v324_v23 = vmax.f32 %v260_v14, 0.0  ;;  %v325_v24 = vmax.f32 %v261_v15, 0.0 }
  0x30   :  { %v266_v25 = vadd.f32 %v617_v7, %v195_v16  ;;  %v267_v26 = vadd.f32 %v617_v7, %v196_v17  ;;  %v326_v29 = vmax.f32 %v262_v18, 0.0  ;;  %v327_v30 = vmax.f32 %v263_v19, 0.0 }
  0x31   :  { %v328_v31 = vmax.f32 %v264_v20, 0.0  ;;  %v329_v32 = vmax.f32 %v265_v21, 0.0  ;;  %388 = vst [vmem:[%s1026_s3 + $0x140] sm:$0xff] %v324_v23  ;;  %389 = vst [vmem:[%s1026_s3 + $0x148] sm:$0xff] %v325_v24  ;;  %v516_v36 = vunpack.c.l.bf16 %v569_v22  ;;  %v517_v37 = vunpack.c.h.bf16 %v569_v22 }
  0x32   :  { %v330_v34 = vmax.f32 %v266_v25, 0.0  ;;  %v331_v35 = vmax.f32 %v267_v26, 0.0  ;;  %390 = vst [vmem:[%s1026_s3 + $0x150] sm:$0xff] %v326_v29  ;;  %391 = vst [vmem:[%s1026_s3 + $0x158] sm:$0xff] %v327_v30  ;;  %v520_v38 = vunpack.c.l.bf16 %v570_v27  ;;  %v521_v39 = vunpack.c.h.bf16 %v570_v27 }
  0x33   :  { %392 = vst [vmem:[%s1026_s3 + $0x160] sm:$0xff] %v328_v31  ;;  %393 = vst [vmem:[%s1026_s3 + $0x168] sm:$0xff] %v329_v32  ;;  %v524_v40 = vunpack.c.l.bf16 %v571_v28  ;;  %v525_v41 = vunpack.c.h.bf16 %v571_v28  ;;  %v197_v42 = vmul.f32 %v516_v36, %v603_v1  ;;  %v198_v43 = vmul.f32 %v517_v37, %v603_v1 }
  0x34   :  { %394 = vst [vmem:[%s1026_s3 + $0x170] sm:$0xff] %v330_v34  ;;  %395 = vst [vmem:[%s1026_s3 + $0x178] sm:$0xff] %v331_v35  ;;  %v528_v44 = vunpack.c.l.bf16 %v572_v33  ;;  %v529_v45 = vunpack.c.h.bf16 %v572_v33  ;;  %v199_v46 = vmul.f32 %v520_v38, %v603_v1  ;;  %v200_v47 = vmul.f32 %v521_v39, %v603_v1 }
  0x35   :  { %v201_v48 = vmul.f32 %v524_v40, %v603_v1  ;;  %v202_v49 = vmul.f32 %v525_v41, %v603_v1  ;;  %v268_v50 = vadd.f32 %v617_v7, %v197_v42  ;;  %v269_v51 = vadd.f32 %v617_v7, %v198_v43 }
  0x36   :  { %v203_v52 = vmul.f32 %v528_v44, %v603_v1  ;;  %v204_v53 = vmul.f32 %v529_v45, %v603_v1  ;;  %v270_v54 = vadd.f32 %v617_v7, %v199_v46  ;;  %v271_v55 = vadd.f32 %v617_v7, %v200_v47 }
  0x37   :  { %v272_v56 = vadd.f32 %v617_v7, %v201_v48  ;;  %v273_v57 = vadd.f32 %v617_v7, %v202_v49  ;;  %v332_v59 = vmax.f32 %v268_v50, 0.0  ;;  %v333_v60 = vmax.f32 %v269_v51, 0.0 }
  0x38   :  { %v274_v61 = vadd.f32 %v617_v7, %v203_v52  ;;  %v275_v62 = vadd.f32 %v617_v7, %v204_v53  ;;  %v334_v2 = vmax.f32 %v270_v54, 0.0  ;;  %v335_v3 = vmax.f32 %v271_v55, 0.0 }
  0x39   :  { %v336_v4 = vmax.f32 %v272_v56, 0.0  ;;  %v337_v5 = vmax.f32 %v273_v57, 0.0  ;;  %396 = vst [vmem:[%s1026_s3 + $0x180] sm:$0xff] %v332_v59  ;;  %397 = vst [vmem:[%s1026_s3 + $0x188] sm:$0xff] %v333_v60  ;;  %v532_v10 = vunpack.c.l.bf16 %v573_v58  ;;  %v533_v11 = vunpack.c.h.bf16 %v573_v58 }
  0x3a   :  { %v338_v8 = vmax.f32 %v274_v61, 0.0  ;;  %v339_v9 = vmax.f32 %v275_v62, 0.0  ;;  %398 = vst [vmem:[%s1026_s3 + $0x190] sm:$0xff] %v334_v2  ;;  %399 = vst [vmem:[%s1026_s3 + $0x198] sm:$0xff] %v335_v3  ;;  %v536_v12 = vunpack.c.l.bf16 %v574_v63  ;;  %v537_v13 = vunpack.c.h.bf16 %v574_v63 }
  0x3b   :  { %400 = vst [vmem:[%s1026_s3 + $0x1a0] sm:$0xff] %v336_v4  ;;  %401 = vst [vmem:[%s1026_s3 + $0x1a8] sm:$0xff] %v337_v5  ;;  %v540_v14 = vunpack.c.l.bf16 %v575_v0  ;;  %v541_v15 = vunpack.c.h.bf16 %v575_v0  ;;  %v205_v16 = vmul.f32 %v532_v10, %v603_v1  ;;  %v206_v17 = vmul.f32 %v533_v11, %v603_v1 }
  0x3c   :  { %402 = vst [vmem:[%s1026_s3 + $0x1b0] sm:$0xff] %v338_v8  ;;  %403 = vst [vmem:[%s1026_s3 + $0x1b8] sm:$0xff] %v339_v9  ;;  %v544_v18 = vunpack.c.l.bf16 %v576_v6  ;;  %v545_v19 = vunpack.c.h.bf16 %v576_v6  ;;  %v207_v20 = vmul.f32 %v536_v12, %v603_v1  ;;  %v208_v21 = vmul.f32 %v537_v13, %v603_v1 }
  0x3d   :  { %v209_v22 = vmul.f32 %v540_v14, %v603_v1  ;;  %v210_v23 = vmul.f32 %v541_v15, %v603_v1  ;;  %v276_v24 = vadd.f32 %v617_v7, %v205_v16  ;;  %v277_v25 = vadd.f32 %v617_v7, %v206_v17 }
  0x3e   :  { %v211_v26 = vmul.f32 %v544_v18, %v603_v1  ;;  %v212_v27 = vmul.f32 %v545_v19, %v603_v1  ;;  %v278_v28 = vadd.f32 %v617_v7, %v207_v20  ;;  %v279_v29 = vadd.f32 %v617_v7, %v208_v21 }
  0x3f   :  { %v280_v30 = vadd.f32 %v617_v7, %v209_v22  ;;  %v281_v31 = vadd.f32 %v617_v7, %v210_v23  ;;  %v340_v32 = vmax.f32 %v276_v24, 0.0  ;;  %v341_v33 = vmax.f32 %v277_v25, 0.0 }
  0x40   :  { %v282_v34 = vadd.f32 %v617_v7, %v211_v26  ;;  %v283_v35 = vadd.f32 %v617_v7, %v212_v27  ;;  %v342_v36 = vmax.f32 %v278_v28, 0.0  ;;  %v343_v37 = vmax.f32 %v279_v29, 0.0 }
  0x41   :  { %v344_v38 = vmax.f32 %v280_v30, 0.0  ;;  %v345_v39 = vmax.f32 %v281_v31, 0.0  ;;  %404 = vst [vmem:[%s1026_s3 + $0x1c0] sm:$0xff] %v340_v32  ;;  %405 = vst [vmem:[%s1026_s3 + $0x1c8] sm:$0xff] %v341_v33 }
  0x42   :  { %v346_v1 = vmax.f32 %v282_v34, 0.0  ;;  %v347_v40 = vmax.f32 %v283_v35, 0.0  ;;  %406 = vst [vmem:[%s1026_s3 + $0x1d0] sm:$0xff] %v342_v36  ;;  %407 = vst [vmem:[%s1026_s3 + $0x1d8] sm:$0xff] %v343_v37 }
  0x43   :  { %408 = vst [vmem:[%s1026_s3 + $0x1e0] sm:$0xff] %v344_v38  ;;  %409 = vst [vmem:[%s1026_s3 + $0x1e8] sm:$0xff] %v345_v39 }
  0x44   :  { %410 = vst [vmem:[%s1026_s3 + $0x1f0] sm:$0xff] %v346_v1  ;;  %411 = vst [vmem:[%s1026_s3 + $0x1f8] sm:$0xff] %v347_v40 }

// kernel: unet_up_block.5
= control target key start
LH: loop header
LB: loop body
LE: loop exit
PB: predicated region body
PF: predicated region fallthrough
CT: control target
= control target key end

     0   :  { %s4399_s24 = smov 0   ;;  %s4401_s25 = smov 0   ;;  %s5809_s0 = inlined_call_operand.vmem [shape: bf16[2,16,16,128], index: 0, kind: input, shape index: {}, may-alias: {0,1}]   ;;  %s5810_s1 = inlined_call_operand.vmem [shape: bf16[2,16,16,128], index: 1, kind: input, shape index: {}, may-alias: {0,1}]   ;;  %s5811_s2 = inlined_call_operand.vmem [shape: bf16[3,384,128], index: 2, kind: input, shape index: {}]   ;;  %s5812_s3 = inlined_call_operand.vmem [shape: f32[1,128], index: 3, kind: input, shape index: {}]   ;;  %s5813_s4 = inlined_call_operand.vmem [shape: f32[1,128], index: 4, kind: input, shape index: {}]   ;;  %s5814_s5 = inlined_call_operand.vmem [shape: bf16[2,16,16,128], index: 5, kind: output, shape index: {0}]   ;;  %s5815_s6 = inlined_call_operand.vmem [shape: f32[2,1,1,128], index: 6, kind: output, shape index: {1}]   ;;  %s5816_s7 = inlined_call_operand.vmem [shape: f32[2,1,1,128], index: 7, kind: output, shape index: {2}]  }
   0x1   :  { %s4403_s26 = smov 0  }
   0x2 LB: > { %s30_s27 = sadd.s32 1, %s4352_s25  ;;  %p3211_p0 = scmp.ge.s32.totalorder %s4356_s26, 1  ;;  %s4356_s26 = sphi %s4403_s26, %s18_s26   ;;  %s4352_s25 = sphi %s4401_s25, %s5867_s25   ;;  %s4348_s24 = sphi %s4399_s24, %s5866_s24  }
   0x3   : > { %p32_p1 = scmp.ge.s32.totalorder %s30_s27, 2  ;;  %p244_p2 = scmp.lt.s32.totalorder %s4356_s26, 3 }
   0x5   : > { %s5869_s27 = smov (%p32_p1, %s30_s27), 0  ;;  %p245_p3 = pnand %p3211_p0, %p244_p2 }
   0x7   : > { %248 = sbr.rel (%p245_p3) target bundleno = 647 (0x287), region = 36 }
   0xc   : > { %p297_p4 = scmp.lt.s32.totalorder %s4348_s24, 1  ;;  %s3440_s28 = sshll.u32 %s4348_s24, 7 }
   0xd   : > { %s358_s8 = scalar_lea.vmem %s5810_s1, %s3440_s28 }
   0xe   : > { %s5871_s24 = smov (!%p297_p4, %s4348_s24), 1  ;;  %v4422_v0 = vld [vmem:[%s358_s8] sm:$0xff] }
   0xf   : > { %s3438_s9 = sshll.u32 %s5871_s24, 7  ;;  %s323_s12 = scalar_lea.vmem %s5815_s6, %s5871_s24 }
  0x10   : > { %s4432_s15 = scalar_lea.vmem %s5809_s0, %s3438_s9  ;;  %s4437_s18 = scalar_lea.vmem %s5814_s5, %s3438_s9 }
  0x11   : > { %s329_s21 = scalar_lea.vmem %s5816_s7, %s5871_s24 }
  0x12   : > { %406 = vsyncadd [#allocation3], 128  ;;  %s3442_s22 = sadd.s32 120, %s3440_s28  ;;  %s4358_s8 = smov [#allocation3]  }
  0x13   : > { %s410_s30 = scalar_lea.vmem %s5810_s1, %s3442_s22  ;;  %s3081_s10 = scalar_lea.sflag %s4358_s8, 1 }
  0x14   : > { %v4446_v1 = vld [vmem:[%s410_s30] sm:$0xff] }
  0x15   : > { %458 = vsyncadd %s3081_s10, 128 }
  0x16   : > { %4342 = dma.done.wait [#allocation3], 128 }
  0x17   : > { %4343 = vsyncadd [#allocation3], 4294967168 }
  0x18   : > { %4344 = dma.done.wait %s3081_s10, 128 }
  0x19   : > { %4345 = vsyncadd %s3081_s10, 4294967168  ;;  %v4256_v2 = vld [vmem:[%s5811_s2 + $0x138] sm:$0xff]   ;;  %v4258_v4 = vld [vmem:[%s5811_s2 + $0x130] sm:$0xff]   ;;  %vm960_vm0 = vcmask 1040384   ;;  %vm961_vm1 = vsmask.f32 256 }
  0x1a   : > { %v4257_v3 = vld [vmem:[%s5811_s2 + $0xf8] sm:$0xff]   ;;  %3663 = vmatprep.subr.bf16.mxu0 %v4256_v2  ;;  %4215 = vmatprep.subr.bf16.mxu1 %v4256_v2  ;;  %v4259_v5 = vld [vmem:[%s5811_s2 + $0xf0] sm:$0xff]   ;;  %v4260_v6 = vld [vmem:[%s5811_s2 + $0x128] sm:$0xff]   ;;  %vm1036_vm3 = vsmask.f32 7424  ;;  %vm1035_vm4 = vcmask 1047552  }
  0x1b   : > { %3664 = vmatpush3.bf16.msra.mxu0 %v4257_v3  ;;  %4223 = vmatpush3.bf16.msra.mxu1 %v4257_v3  ;;  %v4261_v7 = vld [vmem:[%s5811_s2 + $0xe8] sm:$0xff]   ;;  %v4262_v8 = vld [vmem:[%s5811_s2 + $0x120] sm:$0xff]   ;;  %v4264_v10 = vld [vmem:[%s5811_s2 + $0x118] sm:$0xff]  }
  0x1c   : > { %3665 = vmatprep.subr.bf16.mxu0 %v4258_v4  ;;  %4216 = vmatprep.subr.bf16.mxu1 %v4258_v4  ;;  %v4263_v9 = vld [vmem:[%s5811_s2 + $0xe0] sm:$0xff]   ;;  %v4265_v11 = vld [vmem:[%s5811_s2 + $0xd8] sm:$0xff]   ;;  %v4266_v12 = vld [vmem:[%s5811_s2 + $0x110] sm:$0xff]  }
  0x1d   : > { %v4484_v13 = vld [vmem:[%s5812_s3] ss:$0 sm:$0xff]  ;;  %v4267_v21 = vld [vmem:[%s5811_s2 + $0xd0] sm:$0xff]   ;;  %v4268_v24 = vld [vmem:[%s5811_s2 + $0x108] sm:$0xff]  }
  0x1e   : > { %v3480_v14 = vld [vmem:[%s4432_s15] sm:$0xff]   ;;  %v3632_v27 = vld [vmem:[%s4432_s15 + $0x8] sm:$0xff]   ;;  %v3633_v47 = vld [vmem:[%s4432_s15 + $0x10] sm:$0xff]  }
  0x1f   : > { %3666 = vmatpush3.bf16.msra.mxu0 %v4259_v5  ;;  %4224 = vmatpush3.bf16.msra.mxu1 %v4259_v5  ;;  %v3481_v15 = vunpack.c.l.bf16 %v3480_v14  ;;  %v3482_v16 = vunpack.c.h.bf16 %v3480_v14  ;;  %v3643_v17 = vld [vmem:[%s4432_s15 + $0x60] sm:$0xff]   ;;  %v3644_v28 = vld [vmem:[%s4432_s15 + $0x68] sm:$0xff]   ;;  %v3485_v31 = vunpack.c.l.bf16 %v3632_v27  ;;  %v3486_v32 = vunpack.c.h.bf16 %v3632_v27  ;;  %v4272_v54 = vld [vmem:[%s5811_s2 + $0x178] sm:$0xff]  }
  0x20   : > { %3667 = vmatprep.subr.bf16.mxu0 %v4260_v6  ;;  %4217 = vmatprep.subr.bf16.mxu1 %v4260_v6  ;;  %v4491_v18 = vld [vmem:[%s5813_s4] ss:$0 sm:$0xff]  ;;  %v3529_v19 = vunpack.c.l.bf16 %v3643_v17  ;;  %v3530_v20 = vunpack.c.h.bf16 %v3643_v17  ;;  %v4269_v33 = vld [vmem:[%s5811_s2 + $0xc8] sm:$0xff]   ;;  %v3533_v36 = vunpack.c.l.bf16 %v3644_v28  ;;  %v3534_v37 = vunpack.c.h.bf16 %v3644_v28  ;;  %v4273_v60 = vld [vmem:[%s5811_s2 + $0xb8] sm:$0xff]  }
  0x21   : > { %v661_v22 = vmul.f32 %v3481_v15, %v4484_v13  ;;  %v662_v23 = vmul.f32 %v3482_v16, %v4484_v13  ;;  %v663_v40 = vmul.f32 %v3485_v31, %v4484_v13  ;;  %v664_v41 = vmul.f32 %v3486_v32, %v4484_v13  ;;  %v4270_v42 = vld [vmem:[%s5811_s2 + $0x100] sm:$0xff]   ;;  %v3645_v63 = vld [vmem:[%s4432_s15 + $0x70] sm:$0xff]   ;;  %vm4552_vm2 = vmand %vm960_vm0, %vm961_vm1 }
  0x22   : > { %v685_v25 = vmul.f32 %v3529_v19, %v4484_v13  ;;  %v686_v26 = vmul.f32 %v3530_v20, %v4484_v13  ;;  %v687_v45 = vmul.f32 %v3533_v36, %v4484_v13  ;;  %v688_v46 = vmul.f32 %v3534_v37, %v4484_v13  ;;  %v4271_v48 = vld [vmem:[%s5811_s2 + $0xc0] sm:$0xff]   ;;  %v4274_v27 = vld [vmem:[%s5811_s2 + $0x170] sm:$0xff]   ;;  %v4275_v37 = vld [vmem:[%s5811_s2 + $0x168] sm:$0xff]  }
  0x23   : > { %3668 = vmatpush3.bf16.msra.mxu0 %v4261_v7  ;;  %4225 = vmatpush3.bf16.msra.mxu1 %v4261_v7  ;;  %v699_v29 = vadd.f32 %v4491_v18, %v661_v22  ;;  %v700_v30 = vadd.f32 %v4491_v18, %v662_v23  ;;  %v701_v50 = vadd.f32 %v4491_v18, %v663_v40  ;;  %v3489_v52 = vunpack.c.l.bf16 %v3633_v47  ;;  %vm4709_vm5 = vmand %vm1035_vm4, %vm1036_vm3 }
  0x24   : > { %3669 = vmatprep.subr.bf16.mxu0 %v4262_v8  ;;  %4218 = vmatprep.subr.bf16.mxu1 %v4262_v8  ;;  %v723_v34 = vadd.f32 %v4491_v18, %v685_v25  ;;  %v724_v35 = vadd.f32 %v4491_v18, %v686_v26  ;;  %v702_v51 = vadd.f32 %v4491_v18, %v664_v41  ;;  %v3490_v57 = vunpack.c.h.bf16 %v3633_v47 }
  0x25   : > { %v731_v38 = vmax.f32 %v699_v29, 0.0  ;;  %v732_v39 = vmax.f32 %v700_v30, 0.0  ;;  %v725_v55 = vadd.f32 %v4491_v18, %v687_v45  ;;  %v726_v56 = vadd.f32 %v4491_v18, %v688_v46  ;;  %v3646_v30 = vld [vmem:[%s4432_s15 + $0x78] sm:$0xff]   ;;  %v4281_v45 = vld [vmem:[%s5811_s2 + $0xa8] sm:$0xff]  }
  0x26   : > { %v755_v43 = vmax.f32 %v723_v34, 0.0  ;;  %v756_v44 = vmax.f32 %v724_v35, 0.0  ;;  %v733_v61 = vmax.f32 %v701_v50, 0.0  ;;  %v734_v62 = vmax.f32 %v702_v51, 0.0  ;;  %v3635_v51 = vld [vmem:[%s4432_s15 + $0x20] sm:$0xff]  }
  0x27   : > { %3670 = vmatpush3.bf16.msra.mxu0 %v4263_v9  ;;  %4226 = vmatpush3.bf16.msra.mxu1 %v4263_v9  ;;  %v4523_v49 = vpack.c.bf16 %v732_v39, %v731_v38  ;;  %v757_v4 = vmax.f32 %v725_v55, 0.0  ;;  %v758_v5 = vmax.f32 %v726_v56, 0.0  ;;  %v665_v8 = vmul.f32 %v3489_v52, %v4484_v13 }
  0x28   : > { %3671 = vmatprep.subr.bf16.mxu0 %v4264_v10  ;;  %4219 = vmatprep.subr.bf16.mxu1 %v4264_v10  ;;  %v4527_v53 = vpack.c.bf16 %v756_v44, %v755_v43  ;;  %v4546_v7 = vpack.c.bf16 %v734_v62, %v733_v61  ;;  %v666_v9 = vmul.f32 %v3490_v57, %v4484_v13  ;;  %v3537_v14 = vunpack.c.l.bf16 %v3645_v63 }
  0x29   : > { %v824_v58 = vshrl.u32 %v4523_v49, 16  ;;  %v827_v59 = vshll.u32 %v4523_v49, 16  ;;  %1329 = vmatprep.mubr.bf16.mxu0 %v4523_v49  ;;  %v3538_v15 = vunpack.c.h.bf16 %v3645_v63  ;;  %v703_v20 = vadd.f32 %v4491_v18, %v665_v8  ;;  %v4276_v63 = vld [vmem:[%s5811_s2 + $0x160] sm:$0xff]  }
  0x2a   : > { %v908_v2 = vshrl.u32 %v4527_v53, 16  ;;  %v911_v3 = vshll.u32 %v4527_v53, 16  ;;  %1425 = vmatprep.mubr.bf16.mxu1 %v4527_v53  ;;  %v831_v17 = vshrl.u32 %v4546_v7, 16  ;;  %v834_v19 = vshll.u32 %v4546_v7, 16 }
  0x2b   : > { %3672 = vmatpush3.bf16.msra.mxu0 %v4265_v11  ;;  %4227 = vmatpush3.bf16.msra.mxu1 %v4265_v11  ;;  %v826_v6 = vrot.slane %v824_v58, 7  ;;  %v704_v25 = vadd.f32 %v4491_v18, %v666_v9  ;;  %v735_v29 = vmax.f32 %v703_v20, 0.0  ;;  %v689_v35 = vmul.f32 %v3537_v14, %v4484_v13 }
  0x2c   : > { %3673 = vmatprep.subr.bf16.mxu0 %v4266_v12  ;;  %4220 = vmatprep.subr.bf16.mxu1 %v4266_v12  ;;  %v910_v11 = vrot.slane %v908_v2, 7  ;;  %v4558_v12 = vpack.c.bf16 %v758_v5, %v757_v4  ;;  %v833_v28 = vrot.slane %v831_v17, 7  ;;  %v690_v38 = vmul.f32 %v3538_v15, %v4484_v13 }
  0x2d   : > { %v829_v16 = vor.u32 %v827_v59, %v826_v6  ;;  %v736_v34 = vmax.f32 %v704_v25, 0.0  ;;  %v727_v43 = vadd.f32 %v4491_v18, %v689_v35  ;;  %v3541_v44 = vunpack.c.l.bf16 %v3646_v30  ;;  %v4285_v25 = vld [vmem:[%s5811_s2 + $0xa0] sm:$0xff]  }
  0x2e   : > { %v913_v22 = vor.u32 %v911_v3, %v910_v11  ;;  %v915_v23 = vshrl.u32 %v4558_v12, 16  ;;  %v836_v36 = vor.u32 %v834_v19, %v833_v28  ;;  %v728_v47 = vadd.f32 %v4491_v18, %v690_v38  ;;  %v4290_v38 = vld [vmem:[%s5811_s2 + $0x98] sm:$0xff]  }
  0x2f   : > { %3674 = vmatpush3.bf16.msra.mxu0 %v4267_v21  ;;  %4228 = vmatpush3.bf16.msra.mxu1 %v4267_v21  ;;  %v3634_v21 = vld [vmem:[%s4432_s15 + $0x18] sm:$0xff]   ;;  %v4573_v26 = vsel %vm4552_vm2, 0, %v829_v16  ;;  %v3542_v62 = vunpack.c.h.bf16 %v3646_v30  ;;  %v691_v5 = vmul.f32 %v3541_v44, %v4484_v13  ;;  %v3497_v6 = vunpack.c.l.bf16 %v3635_v51 }
  0x30   : > { %3675 = vmatprep.subr.bf16.mxu0 %v4268_v24  ;;  %4221 = vmatprep.subr.bf16.mxu1 %v4268_v24  ;;  %v918_v24 = vshll.u32 %v4558_v12, 16  ;;  %v4584_v31 = vsel %vm4552_vm2, 0, %v913_v22  ;;  %v917_v32 = vrot.slane %v915_v23, 7  ;;  %v3493_v39 = vunpack.c.l.bf16 %v3634_v21 }
  0x31   : > { %v3494_v40 = vunpack.c.h.bf16 %v3634_v21  ;;  %v4611_v46 = vsel %vm4552_vm2, 0, %v836_v36  ;;  %v760_v57 = vmax.f32 %v728_v47, 0.0  ;;  %v3498_v8 = vunpack.c.h.bf16 %v3635_v51 }
  0x32   : > { %v920_v41 = vor.u32 %v918_v24, %v917_v32  ;;  %v692_v15 = vmul.f32 %v3542_v62, %v4484_v13  ;;  %v729_v20 = vadd.f32 %v4491_v18, %v691_v5  ;;  %v669_v21 = vmul.f32 %v3497_v6, %v4484_v13  ;;  %v3637_v5 = vld [vmem:[%s4432_s15 + $0x30] sm:$0xff]  }
  0x33   : > { %3676 = vmatpush3.bf16.msra.mxu0 %v4269_v33  ;;  %4229 = vmatpush3.bf16.msra.mxu1 %v4269_v33  ;;  %v4277_v33 = vld [vmem:[%s5811_s2 + $0xb0] sm:$0xff]   ;;  %v668_v50 = vmul.f32 %v3494_v40, %v4484_v13  ;;  %v670_v22 = vmul.f32 %v3498_v8, %v4484_v13 }
  0x34   : > { %3677 = vmatprep.subr.bf16.mxu0 %v4270_v42  ;;  %4222 = vmatprep.subr.bf16.mxu1 %v4270_v42  ;;  %v4602_v42 = vpack.c.bf16 %v736_v34, %v735_v29  ;;  %v4619_v52 = vsel %vm4552_vm2, 0, %v920_v41  ;;  %v4278_v29 = vld [vmem:[%s5811_s2 + $0x158] sm:$0xff]   ;;  %v730_v32 = vadd.f32 %v4491_v18, %v692_v15  ;;  %v761_v34 = vmax.f32 %v729_v20, 0.0 }
  0x35   : > { %v706_v61 = vadd.f32 %v4491_v18, %v668_v50  ;;  %v707_v35 = vadd.f32 %v4491_v18, %v669_v21  ;;  %v708_v36 = vadd.f32 %v4491_v18, %v670_v22 }
  0x36   : > { %v838_v55 = vshrl.u32 %v4602_v42, 16  ;;  %v841_v56 = vshll.u32 %v4602_v42, 16 }
  0x37   : > { %3678 = vmatpush3.bf16.msra.mxu0 %v4271_v48  ;;  %4230 = vmatpush3.bf16.msra.mxu1 %v4271_v48  ;;  %v667_v48 = vmul.f32 %v3493_v39, %v4484_v13  ;;  %v738_v14 = vmax.f32 %v706_v61, 0.0  ;;  %v739_v44 = vmax.f32 %v707_v35, 0.0  ;;  %v740_v47 = vmax.f32 %v708_v36, 0.0 }
  0x38   : > { %4071 = vmatprep.subr.bf16.mxu1 %v4272_v54  ;;  %4119 = vmatprep.subr.bf16.mxu0 %v4273_v60  ;;  %v840_v4 = vrot.slane %v838_v55, 7  ;;  %v3506_v35 = vunpack.c.h.bf16 %v3637_v5 }
  0x3a   : > { %1330 = vmatmul.mubr.bf16.vlgmr.msra.gmra.mxu0 %v4573_v26  ;;  %1426 = vmatmul.mubr.bf16.vlgmr.msra.gmra.mxu1 %v4584_v31  ;;  %v843_v16 = vor.u32 %v841_v56, %v840_v4 }
  0x3b   : > { %4120 = vmatpush3.bf16.msra.mxu0 %v4273_v60  ;;  %4072 = vmatpush3.bf16.msra.mxu1 %v4272_v54  ;;  %v759_v54 = vmax.f32 %v727_v43, 0.0  ;;  %v705_v60 = vadd.f32 %v4491_v18, %v667_v48  ;;  %v983_v48 = vrot.slane %v827_v59, 1 }
  0x3c   : > { %1337 = vmatprep.mubr.bf16.mxu0 %v4546_v7  ;;  %4073 = vmatprep.subr.bf16.mxu1 %v4274_v27  ;;  %v4662_v39 = vsel %vm4552_vm2, 0, %v843_v16 }
  0x3d   : > { %1433 = vmatprep.mubr.bf16.mxu1 %v4558_v12  ;;  %4121 = vmatprep.subr.bf16.mxu0 %v4277_v33  ;;  %v4631_v9 = vpack.c.bf16 %v760_v57, %v759_v54  ;;  %v737_v11 = vmax.f32 %v705_v60, 0.0  ;;  %v4679_v60 = vpack.c.bf16 %v740_v47, %v739_v44  ;;  %v984_v6 = vor.u32 %v983_v48, %v824_v58  ;;  %v4280_v58 = vld [vmem:[%s5811_s2 + $0x148] sm:$0xff]  }
  0x3f   : > { %4122 = vmatpush3.bf16.msra.mxu0 %v4277_v33  ;;  %4074 = vmatpush3.bf16.msra.mxu1 %v4274_v27  ;;  %v922_v27 = vshrl.u32 %v4631_v9, 16  ;;  %v925_v28 = vshll.u32 %v4631_v9, 16  ;;  %v4650_v30 = vpack.c.bf16 %v738_v14, %v737_v11  ;;  %v3636_v33 = vld [vmem:[%s4432_s15 + $0x28] sm:$0xff]   ;;  %v4293_v11 = vld [vmem:[%s5811_s2 + $0x90] sm:$0xff]   ;;  %v852_v15 = vshrl.u32 %v4679_v60, 16 }
  0x40   : > { %4123 = vmatprep.subr.bf16.mxu0 %v4281_v45  ;;  %4075 = vmatprep.subr.bf16.mxu1 %v4275_v37  ;;  %v3501_v57 = vunpack.c.l.bf16 %v3636_v33  ;;  %v3502_v59 = vunpack.c.h.bf16 %v3636_v33  ;;  %v855_v21 = vshll.u32 %v4679_v60, 16  ;;  %v3638_v33 = vld [vmem:[%s4432_s15 + $0x38] sm:$0xff]  }
  0x41   : > { %v924_v40 = vrot.slane %v922_v27, 7  ;;  %v845_v41 = vshrl.u32 %v4650_v30, 16  ;;  %v848_v43 = vshll.u32 %v4650_v30, 16  ;;  %v854_v47 = vrot.slane %v852_v15, 7 }
  0x42   : > { %1338 = vmatmul.mubr.bf16.gmra.mxu0 %v4611_v46  ;;  %1434 = vmatmul.mubr.bf16.gmra.mxu1 %v4619_v52  ;;  %v671_v8 = vmul.f32 %v3501_v57, %v4484_v13  ;;  %v672_v16 = vmul.f32 %v3502_v59, %v4484_v13 }
  0x43   : > { %1345 = vmatprep.mubr.bf16.mxu0 %v4602_v42  ;;  %4076 = vmatpush3.bf16.msra.mxu1 %v4275_v37  ;;  %v762_v37 = vmax.f32 %v730_v32, 0.0  ;;  %v927_v50 = vor.u32 %v925_v28, %v924_v40  ;;  %v847_v54 = vrot.slane %v845_v41, 7  ;;  %v3505_v32 = vunpack.c.l.bf16 %v3637_v5  ;;  %v4282_v5 = vld [vmem:[%s5811_s2 + $0x140] sm:$0xff]  }
  0x44   : > { %1441 = vmatprep.mubr.bf16.mxu1 %v4631_v9  ;;  %4077 = vmatprep.subr.bf16.mxu1 %v4276_v63  ;;  %v709_v22 = vadd.f32 %v4491_v18, %v671_v8  ;;  %v989_v57 = vrot.slane %v848_v43, 1  ;;  %v3509_v8 = vunpack.c.l.bf16 %v3638_v33 }
  0x45   : > { %4124 = vmatpush3.bf16.msra.mxu0 %v4281_v45  ;;  %v4672_v51 = vpack.c.bf16 %v762_v37, %v761_v34  ;;  %v4279_v45 = vld [vmem:[%s5811_s2 + $0x150] sm:$0xff]   ;;  %v4683_v61 = vsel %vm4552_vm2, 0, %v927_v50  ;;  %v850_v14 = vor.u32 %v848_v43, %v847_v54  ;;  %v710_v34 = vadd.f32 %v4491_v18, %v672_v16  ;;  %v3639_v50 = vld [vmem:[%s4432_s15 + $0x40] sm:$0xff]  }
  0x46   : > { %4125 = vmatprep.subr.bf16.mxu0 %v4285_v25  ;;  %v741_v40 = vmax.f32 %v709_v22, 0.0  ;;  %v673_v37 = vmul.f32 %v3505_v32, %v4484_v13  ;;  %v4741_v54 = vsel %vm4709_vm5, %v984_v6, 0  ;;  %v3514_v16 = vunpack.c.h.bf16 %v3639_v50  ;;  %v4301_v22 = vld [vmem:[%s5811_s2 + $0x80] sm:$0xff]  }
  0x47   : > { %4078 = vmatpush3.bf16.msra.mxu1 %v4276_v63  ;;  %v5817_v62 = vshrl.u32 %v4672_v51, 16  ;;  %v5818_v4 = vshll.u32 %v4672_v51, 16  ;;  %v985_v63 = vrot.slane %v834_v19, 1  ;;  %v4729_v44 = vsel %vm4552_vm2, 0, %v850_v14 }
  0x48   : > { %4079 = vmatprep.subr.bf16.mxu1 %v4278_v29  ;;  %v742_v48 = vmax.f32 %v710_v34, 0.0  ;;  %v711_v59 = vadd.f32 %v4491_v18, %v673_v37  ;;  %v3510_v14 = vunpack.c.h.bf16 %v3638_v33  ;;  %v857_v32 = vor.u32 %v855_v21, %v854_v47  ;;  %v3640_v34 = vld [vmem:[%s4432_s15 + $0x48] sm:$0xff]  }
  0x49   : > { %4126 = vmatpush3.bf16.msra.mxu0 %v4285_v25  ;;  %v931_v19 = vrot.slane %v5817_v62, 7  ;;  %v987_v25 = vrot.slane %v841_v56, 1  ;;  %v986_v36 = vor.u32 %v985_v63, %v831_v17  ;;  %v4298_v56 = vld [vmem:[%s5811_s2 + $0x88] sm:$0xff]   ;;  %v678_v37 = vmul.f32 %v3514_v16, %v4484_v13 }
  0x4a   : > { %1346 = vmatmul.mubr.bf16.gmra.mxu0 %v4662_v39  ;;  %4127 = vmatprep.subr.bf16.mxu0 %v4290_v38  ;;  %v4747_v63 = vpack.c.bf16 %v742_v48, %v741_v40  ;;  %v743_v6 = vmax.f32 %v711_v59, 0.0  ;;  %v990_v16 = vor.u32 %v989_v57, %v845_v41  ;;  %v3518_v41 = vunpack.c.h.bf16 %v3640_v34 }
  0x4b   : > { %1442 = vmatmul.mubr.bf16.gmra.mxu1 %v4683_v61  ;;  %1353 = vmatprep.mubr.bf16.mxu0 %v4650_v30  ;;  %v988_v43 = vor.u32 %v987_v25, %v838_v55  ;;  %v4283_v55 = vld [vmem:[%s5811_s2 + $0x78] sm:$0xff]   ;;  %v991_v25 = vrot.slane %v855_v21, 1  ;;  %v716_v59 = vadd.f32 %v4491_v18, %v678_v37 }
  0x4c   : > { %4080 = vmatpush3.bf16.msra.mxu1 %v4278_v29  ;;  %1449 = vmatprep.mubr.bf16.mxu1 %v4672_v51  ;;  %v934_v29 = vor.u32 %v5818_v4, %v931_v19  ;;  %v3513_v19 = vunpack.c.l.bf16 %v3639_v50  ;;  %v862_v48 = vshll.u32 %v4747_v63, 16 }
  0x4d   : > { %4081 = vmatprep.subr.bf16.mxu1 %v4279_v45  ;;  %4128 = vmatpush3.bf16.msra.mxu0 %v4290_v38  ;;  %v674_v38 = vmul.f32 %v3506_v35, %v4484_v13  ;;  %v676_v35 = vmul.f32 %v3510_v14, %v4484_v13  ;;  %v4782_v14 = vsel %vm4552_vm2, 0, %v857_v32  ;;  %v992_v32 = vor.u32 %v991_v25, %v852_v15 }
  0x4e   : > { %4129 = vmatprep.subr.bf16.mxu0 %v4293_v11  ;;  %v4737_v17 = vsel %vm4552_vm2, 0, %v934_v29  ;;  %v675_v29 = vmul.f32 %v3509_v8, %v4484_v13  ;;  %v677_v40 = vmul.f32 %v3513_v19, %v4484_v13  ;;  %v4305_v8 = vld [vmem:[%s5811_s2 + $0x1f8] sm:$0xff]   ;;  %v4793_v19 = vsel %vm4709_vm5, %v988_v43, 0 }
  0x4f   : > { %5826 = vst [vmem:[#allocation10_spill] sm:$0xff] %v4737_v17  ;;  %v714_v21 = vadd.f32 %v4491_v18, %v676_v35  ;;  %v748_v37 = vmax.f32 %v716_v59, 0.0  ;;  %v993_v25 = vrot.slane %v862_v48, 1  ;;  %v680_v59 = vmul.f32 %v3518_v41, %v4484_v13 }
  0x50   : > { %4082 = vmatpush3.bf16.msra.mxu1 %v4279_v45  ;;  %v712_v45 = vadd.f32 %v4491_v18, %v674_v38  ;;  %v713_v38 = vadd.f32 %v4491_v18, %v675_v29  ;;  %v715_v50 = vadd.f32 %v4491_v18, %v677_v40 }
  0x51   : > { %4083 = vmatprep.subr.bf16.mxu1 %v4280_v58  ;;  %4130 = vmatpush3.bf16.msra.mxu0 %v4293_v11  ;;  %v859_v11 = vshrl.u32 %v4747_v63, 16  ;;  %v746_v40 = vmax.f32 %v714_v21, 0.0  ;;  %v4288_v21 = vld [vmem:[%s5811_s2 + $0x68] sm:$0xff]  }
  0x52   : > { %1354 = vmatmul.mubr.bf16.gmra.mxu0 %v4729_v44  ;;  %4131 = vmatprep.subr.bf16.mxu0 %v4298_v56  ;;  %v744_v33 = vmax.f32 %v712_v45, 0.0  ;;  %v3517_v45 = vunpack.c.l.bf16 %v3640_v34  ;;  %v745_v35 = vmax.f32 %v713_v38, 0.0  ;;  %v747_v43 = vmax.f32 %v715_v50, 0.0  ;;  %v4287_v34 = vld [vmem:[%s5811_s2 + $0x30] sm:$0xff]  }
  0x53   : > { %1450 = vmatmul.mubr.bf16.gmra.mxu1 %v4737_v17  ;;  %1361 = vmatprep.mubr.bf16.mxu0 %v4679_v60  ;;  %v861_v47 = vrot.slane %v859_v11, 7 }
  0x54   : > { %4084 = vmatpush3.bf16.msra.mxu1 %v4280_v58  ;;  %4087 = vmatprep.mubr.bf16.mxu1 %v4741_v54  ;;  %v4771_v58 = vpack.c.bf16 %v744_v33, %v743_v6  ;;  %v4284_v6 = vld [vmem:[%s5811_s2 + $0x38] sm:$0xff]   ;;  %v3641_v33 = vld [vmem:[%s4432_s15 + $0x50] sm:$0xff]   ;;  %v679_v57 = vmul.f32 %v3517_v45, %v4484_v13  ;;  %v4824_v50 = vpack.c.bf16 %v746_v40, %v745_v35 }
  0x55   : > { %4085 = vmatprep.subr.bf16.mxu1 %v4282_v5  ;;  %4132 = vmatpush3.bf16.msra.mxu0 %v4298_v56  ;;  %v4786_v56 = vsel %vm4709_vm5, %v986_v36, 0  ;;  %v4286_v36 = vld [vmem:[%s5811_s2 + $0x70] sm:$0xff]   ;;  %v3521_v15 = vunpack.c.l.bf16 %v3641_v33 }
  0x56   : > { %4133 = vmatprep.subr.bf16.mxu0 %v4301_v22  ;;  %v866_v29 = vshrl.u32 %v4771_v58, 16  ;;  %v869_v38 = vshll.u32 %v4771_v58, 16 }
  0x57   : > { %v681_v35 = vmul.f32 %v3521_v15, %v4484_v13  ;;  %v876_v15 = vshll.u32 %v4824_v50, 16 }
  0x58   : > { %4086 = vmatpush3.bf16.msra.mxu1 %v4282_v5  ;;  %v864_v5 = vor.u32 %v862_v48, %v861_v47  ;;  %v4818_v47 = vsel %vm4709_vm5, %v992_v32, 0  ;;  %v868_v48 = vrot.slane %v866_v29, 7  ;;  %v4289_v32 = vld [vmem:[%s5811_s2 + $0x28] sm:$0xff]  }
  0x59   : > { %3799 = vmatprep.subr.bf16.mxu1 %v4283_v55  ;;  %4134 = vmatpush3.bf16.msra.mxu0 %v4301_v22  ;;  %v3522_v55 = vunpack.c.h.bf16 %v3641_v33  ;;  %v4811_v22 = vsel %vm4709_vm5, %v990_v16, 0  ;;  %v3642_v16 = vld [vmem:[%s4432_s15 + $0x58] sm:$0xff]   ;;  %v995_v33 = vrot.slane %v869_v38, 1  ;;  %v719_v41 = vadd.f32 %v4491_v18, %v681_v35  ;;  %v4292_v35 = vld [vmem:[%s5811_s2 + $0x20] sm:$0xff]  }
  0x5a   : > { %1362 = vmatmul.mubr.bf16.gmra.mxu0 %v4782_v14  ;;  %3935 = vmatprep.subr.bf16.mxu0 %v4305_v8  ;;  %v4829_v45 = vsel %vm4552_vm2, 0, %v864_v5  ;;  %v4831_v8 = vpack.c.bf16 %v748_v37, %v747_v43  ;;  %v994_v5 = vor.u32 %v993_v25, %v859_v11  ;;  %v873_v43 = vshrl.u32 %v4824_v50, 16  ;;  %v4291_v37 = vld [vmem:[%s5811_s2 + $0x60] sm:$0xff]  }
  0x5b   : > { %4088 = vmatmul.mubr.bf16.vlgmr.msra.gmra.mxu1 %v4786_v56  ;;  %1369 = vmatprep.mubr.bf16.mxu0 %v4747_v63  ;;  %v682_v40 = vmul.f32 %v3522_v55, %v4484_v13  ;;  %v871_v25 = vor.u32 %v869_v38, %v868_v48  ;;  %v3526_v4 = vunpack.c.h.bf16 %v3642_v16  ;;  %v1011_v38 = vrot.slane %v925_v28, 1 }
  0x5c   : > { %3800 = vmatpush3.bf16.msra.mxu1 %v4284_v6  ;;  %4091 = vmatprep.mubr.bf16.mxu1 %v4793_v19  ;;  %v717_v6 = vadd.f32 %v4491_v18, %v679_v57  ;;  %v883_v55 = vshll.u32 %v4831_v8, 16  ;;  %v996_v48 = vor.u32 %v995_v33, %v866_v29  ;;  %v880_v29 = vshrl.u32 %v4831_v8, 16 }
  0x5d   : > { %3801 = vmatprep.subr.bf16.mxu1 %v4286_v36  ;;  %v718_v36 = vadd.f32 %v4491_v18, %v680_v59  ;;  %v720_v57 = vadd.f32 %v4491_v18, %v682_v40  ;;  %v3525_v59 = vunpack.c.l.bf16 %v3642_v16  ;;  %v875_v16 = vrot.slane %v873_v43, 7 }
  0x5e   : > { %v4883_v28 = vsel %vm4552_vm2, 0, %v871_v25 }
  0x5f   : > { %v750_v11 = vmax.f32 %v718_v36, 0.0  ;;  %v752_v62 = vmax.f32 %v720_v57, 0.0  ;;  %v683_v40 = vmul.f32 %v3525_v59, %v4484_v13  ;;  %v1009_v36 = vrot.slane %v918_v24, 1 }
  0x60   : > { %3802 = vmatpush3.bf16.msra.mxu1 %v4287_v34  ;;  %v749_v34 = vmax.f32 %v717_v6, 0.0  ;;  %v1007_v6 = vrot.slane %v911_v3, 1  ;;  %v997_v57 = vrot.slane %v876_v15, 1  ;;  %v4879_v24 = vor.u32 %v1011_v38, %v922_v27  ;;  %v4295_v27 = vld [vmem:[%s5811_s2 + $0x18] sm:$0xff]  }
  0x61   : > { %3803 = vmatprep.subr.bf16.mxu1 %v4288_v21  ;;  %v751_v21 = vmax.f32 %v719_v41, 0.0  ;;  %v684_v41 = vmul.f32 %v3526_v4, %v4484_v13  ;;  %v4875_v3 = vor.u32 %v1009_v36, %v915_v23  ;;  %v4887_v4 = vsel %vm4709_vm5, %v994_v5, 0 }
  0x62   : > { %1370 = vmatmul.mubr.bf16.gmra.mxu0 %v4829_v45  ;;  %v4871_v59 = vor.u32 %v1007_v6, %v908_v2  ;;  %v999_v2 = vrot.slane %v883_v55, 1  ;;  %v4892_v23 = vpack.c.bf16 %v750_v11, %v749_v34  ;;  %v4903_v5 = vsel %vm4709_vm5, %v996_v48, 0  ;;  %v4296_v34 = vld [vmem:[%s5811_s2 + $0x50] sm:$0xff]   ;;  %v4299_v48 = vld [vmem:[%s5811_s2 + $0x48] sm:$0xff]  }
  0x63   : > { %4092 = vmatmul.mubr.bf16.gmra.mxu1 %v4811_v22  ;;  %1377 = vmatprep.mubr.bf16.mxu0 %v4771_v58  ;;  %v4897_v33 = vpack.c.bf16 %v752_v62, %v751_v21  ;;  %v722_v25 = vadd.f32 %v4491_v18, %v684_v41  ;;  %v878_v11 = vor.u32 %v876_v15, %v875_v16  ;;  %v4297_v21 = vld [vmem:[%s5811_s2 + $0x10] sm:$0xff]   ;;  %v3546_v6 = vunpack.c.h.bf16 %v4422_v0  ;;  %v4300_v41 = vld [vmem:[%s5811_s2 + $0x8] sm:$0xff]  }
  0x64   : > { %4095 = vmatprep.mubr.bf16.mxu1 %v4818_v47  ;;  %3804 = vmatpush3.bf16.msra.mxu1 %v4289_v32  ;;  %v4294_v32 = vld [vmem:[%s5811_s2 + $0x58] sm:$0xff]   ;;  %v1000_v62 = vor.u32 %v999_v2, %v880_v29  ;;  %v890_v36 = vshll.u32 %v4892_v23, 16  ;;  %v887_v2 = vshrl.u32 %v4892_v23, 16 }
  0x65   : > { %3805 = vmatprep.subr.bf16.mxu1 %v4291_v37  ;;  %v721_v37 = vadd.f32 %v4491_v18, %v683_v40  ;;  %v3545_v40 = vunpack.c.l.bf16 %v4422_v0  ;;  %v754_v38 = vmax.f32 %v722_v25, 0.0  ;;  %v4924_v16 = vsel %vm4552_vm2, 0, %v878_v11 }
  0x66   : > { %v1001_v25 = vrot.slane %v890_v36, 1 }
  0x67   : > { %v753_v15 = vmax.f32 %v721_v37, 0.0  ;;  %v792_v37 = vmul.f32 %v3546_v6, %v4484_v13  ;;  %v4303_v6 = vld [vmem:[%s5811_s2] sm:$0xff]  }
  0x68   : > { %3806 = vmatpush3.bf16.msra.mxu1 %v4292_v35  ;;  %v998_v35 = vor.u32 %v997_v57, %v873_v43  ;;  %v897_v43 = vshll.u32 %v4897_v33, 16  ;;  %v4935_v57 = vsel %vm4709_vm5, %v1000_v62, 0 }
  0x69   : > { %3807 = vmatprep.subr.bf16.mxu1 %v4294_v32  ;;  %v882_v32 = vrot.slane %v880_v29, 7  ;;  %v4302_v29 = vld [vmem:[%s5811_s2 + $0x40] sm:$0xff]  }
  0x6a   : > { %1378 = vmatmul.mubr.bf16.gmra.mxu0 %v4883_v28  ;;  %v4928_v0 = vsel %vm4709_vm5, %v998_v35, 0  ;;  %v1003_v11 = vrot.slane %v897_v43, 1  ;;  %v4941_v35 = vpack.c.bf16 %v754_v38, %v753_v15  ;;  %v4960_v15 = vld [vmem:[%s5813_s4] ss:$0 sm:$0xff] }
  0x6b   : > { %4096 = vmatmul.mubr.bf16.gmra.mxu1 %v4887_v4  ;;  %1385 = vmatprep.mubr.bf16.mxu0 %v4824_v50  ;;  %5827 = vst [vmem:[#allocation11_spill] sm:$0xff] %v4960_v15  ;;  %v794_v38 = vadd.f32 %v4960_v15, %v792_v37  ;;  %v4994_v15 = vsel %vm4709_vm5, %v4871_v59, 0  ;;  %v5007_v59 = vsel %vm4709_vm5, %v4875_v3, 0  ;;  %v5829_v3 = vshrl.u32 %v4672_v51, 16 }
  0x6c   : > { %4099 = vmatprep.mubr.bf16.mxu1 %v4903_v5  ;;  %3808 = vmatpush3.bf16.msra.mxu1 %v4295_v27  ;;  %v791_v27 = vmul.f32 %v3545_v40, %v4484_v13  ;;  %v885_v13 = vor.u32 %v883_v55, %v882_v32  ;;  %v1002_v40 = vor.u32 %v1001_v25, %v887_v2  ;;  %v889_v32 = vrot.slane %v887_v2, 7 }
  0x6d   : > { %3809 = vmatprep.subr.bf16.mxu1 %v4296_v34  ;;  %v894_v34 = vshrl.u32 %v4897_v33, 16  ;;  %v901_v25 = vshrl.u32 %v4941_v35, 16  ;;  %v796_v37 = vmax.f32 %v794_v38, 0.0 }
  0x6e   : > { %v793_v62 = vadd.f32 %v4491_v18, %v791_v27  ;;  %v4304_v18 = vld [vmem:[%s5811_s2 + $0x238] sm:$0xff]   ;;  %v4972_v27 = vsel %vm4709_vm5, %v1002_v40, 0  ;;  %v892_v2 = vor.u32 %v890_v36, %v889_v32 }
  0x6f   : > { %v1004_v55 = vor.u32 %v1003_v11, %v894_v34  ;;  %v903_v32 = vrot.slane %v901_v25, 7 }
  0x70   : > { %3810 = vmatpush3.bf16.msra.mxu1 %v4297_v21  ;;  %v904_v21 = vshll.u32 %v4941_v35, 16  ;;  %v4985_v40 = vsel %vm4552_vm2, 0, %v892_v2 }
  0x71   : > { %3811 = vmatprep.subr.bf16.mxu1 %v4299_v48  ;;  %v4968_v48 = vsel %vm4552_vm2, 0, %v885_v13  ;;  %v4977_v11 = vsel %vm4709_vm5, %v1004_v55, 0 }
  0x72   : > { %1386 = vmatmul.mubr.bf16.gmra.mxu0 %v4924_v16  ;;  %v1005_v17 = vrot.slane %v904_v21, 1 }
  0x73   : > { %4100 = vmatmul.mubr.bf16.gmra.mxu1 %v4928_v0  ;;  %1393 = vmatprep.mubr.bf16.mxu0 %v4831_v8 }
  0x74   : > { %4103 = vmatprep.mubr.bf16.mxu1 %v4935_v57  ;;  %3812 = vmatpush3.bf16.msra.mxu1 %v4300_v41  ;;  %v795_v41 = vmax.f32 %v793_v62, 0.0  ;;  %v799_v62 = vmul.f32 0.0, %v796_v37 }
  0x75   : > { %3813 = vmatprep.subr.bf16.mxu1 %v4302_v29  ;;  %v1006_v29 = vor.u32 %v1005_v17, %v901_v25  ;;  %v906_v25 = vor.u32 %v904_v21, %v903_v32  ;;  %v4306_v32 = vld [vmem:[%s5811_s2 + $0x1b8] sm:$0xff]  }
  0x76   : > { %v798_v13 = vmul.f32 0.0, %v795_v41  ;;  %v5828_v41 = vshll.u32 %v4672_v51, 16 }
  0x77   : > { %v4989_v38 = vsel %vm4709_vm5, %v1006_v29, 0 }
  0x78   : > { %3814 = vmatpush3.bf16.msra.mxu1 %v4303_v6  ;;  %v896_v6 = vrot.slane %v894_v34, 7  ;;  %v800_v55 = vpack.c.bf16 %v799_v62, %v798_v13  ;;  %v1013_v37 = vrot.slane %v5828_v41, 1 }
  0x79   : > { %4167 = vmatprep.subr.bf16.mxu1 %v4304_v18 }
  0x7a   : > { %1394 = vmatmul.mubr.bf16.gmra.mxu0 %v4968_v48  ;;  %v899_v17 = vor.u32 %v897_v43, %v896_v6  ;;  %v820_v36 = vshll.u32 %v800_v55, 16  ;;  %v817_v2 = vshrl.u32 %v800_v55, 16  ;;  %v5014_v43 = vsel %vm4709_vm5, %v4879_v24, 0 }
  0x7b   : > { %4104 = vmatmul.mubr.bf16.gmra.mxu1 %v4972_v27  ;;  %1401 = vmatprep.mubr.bf16.mxu0 %v4892_v23  ;;  %v1014_v13 = vor.u32 %v1013_v37, %v5829_v3  ;;  %v5024_v6 = vsel %vm4552_vm2, 0, %v906_v25  ;;  %v4319_v25 = vld [vmem:[%s5811_s2 + $0x220] sm:$0xff]  }
  0x7c   : > { %4107 = vmatprep.mubr.bf16.mxu1 %v4977_v11  ;;  %v5002_v34 = vsel %vm4552_vm2, 0, %v899_v17  ;;  %v981_v29 = vrot.slane %v820_v36, 1  ;;  %v819_v17 = vrot.slane %v817_v2, 7  ;;  %v4313_v3 = vld [vmem:[%s5811_s2 + $0x1a0] sm:$0xff]  }
  0x7d   : > { %v5028_v24 = vsel %vm4709_vm5, %v1014_v13, 0  ;;  %v4315_v13 = vld [vmem:[%s5811_s2 + $0x1d8] sm:$0xff]  }
  0x7e   : > { %v982_v62 = vor.u32 %v981_v29, %v817_v2  ;;  %v822_v21 = vor.u32 %v820_v36, %v819_v17  ;;  %v4307_v2 = vld [vmem:[%s5811_s2 + $0x1f0] sm:$0xff]   ;;  %v4310_v36 = vld [vmem:[%s5811_s2 + $0x1e8] sm:$0xff]  }
  0x7f   : > { %v4309_v29 = vld [vmem:[%s5811_s2 + $0x230] sm:$0xff]  }
  0x80   : > { %v1038_v41 = vsel %vm4709_vm5, %v982_v62, 0  ;;  %v963_v37 = vsel %vm4552_vm2, 0, %v822_v21  ;;  %v4316_v62 = vld [vmem:[%s5811_s2 + $0x198] sm:$0xff]   ;;  %v4317_v17 = vld [vmem:[%s5811_s2 + $0x1d0] sm:$0xff]  }
  0x81   : > { %v4318_v21 = vld [vmem:[%s5811_s2 + $0x190] sm:$0xff]  }
  0x82   : > { %1402 = vmatmul.mubr.bf16.gmra.mxu0 %v4985_v40 }
  0x83   : > { %4108 = vmatmul.mubr.bf16.gmra.mxu1 %v4989_v38  ;;  %1409 = vmatprep.mubr.bf16.mxu0 %v4897_v33 }
  0x84   : > { %4111 = vmatprep.mubr.bf16.mxu1 %v4994_v15 }
  0x8a   : > { %1410 = vmatmul.mubr.bf16.gmra.mxu0 %v5002_v34 }
  0x8b   : > { %4112 = vmatmul.mubr.bf16.gmra.mxu1 %v5007_v59  ;;  %1417 = vmatprep.mubr.bf16.mxu0 %v4941_v35 }
  0x8c   : > { %4115 = vmatprep.mubr.bf16.mxu1 %v5014_v43 }
  0x92   : > { %1418 = vmatmul.mubr.bf16.gmra.mxu0 %v5024_v6 }
  0x93   : > { %4116 = vmatmul.mubr.bf16.gmra.mxu1 %v5028_v24  ;;  %4135 = vmatprep.mubr.bf16.mxu0 %v1038_v41  ;;  %v4325_v41 = vld [vmem:[%s5811_s2 + $0x210] sm:$0xff]  }
  0x94   : > { %1795 = vmatprep.mubr.bf16.mxu1 %v800_v55  ;;  %v4308_v55 = vld [vmem:[%s5811_s2 + $0x1b0] sm:$0xff]  }
  0x9a   : > { %4136 = vmatmul.mubr.bf16.vlgmr.msra.gmra.mxu0 %v4741_v54  ;;  %v4314_v54 = vld [vmem:[%s5811_s2 + $0x228] sm:$0xff]  }
  0x9b   : > { %1796 = vmatmul.mubr.bf16.vlgmr.msra.gmra.mxu1 %v963_v37  ;;  %3936 = vmatpush3.bf16.msra.mxu0 %v4306_v32  ;;  %v4320_v32 = vld [vmem:[%s5811_s2 + $0x1c8] sm:$0xff]  }
  0x9c   : > { %4168 = vmatpush3.bf16.msra.mxu1 %v4304_v18  ;;  %1803 = vmatprep.mubr.bf16.mxu1 %v4523_v49  ;;  %v4311_v18 = vld [vmem:[%s5811_s2 + $0x1a8] sm:$0xff]   ;;  %v4312_v49 = vld [vmem:[%s5811_s2 + $0x1e0] sm:$0xff]  }
  0x9d   : > { %4139 = vmatprep.mubr.bf16.mxu0 %v4786_v56  ;;  %3937 = vmatprep.subr.bf16.mxu0 %v4307_v2  ;;  %v4326_v37 = vld [vmem:[%s5811_s2 + $0x208] sm:$0xff]  }
  0x9e   : > { %4169 = vmatprep.subr.bf16.mxu1 %v4309_v29  ;;  %v4321_v2 = vld [vmem:[%s5811_s2 + $0x188] sm:$0xff]  }
  0x9f   : > { %3938 = vmatpush3.bf16.msra.mxu0 %v4308_v55  ;;  %v4327_v55 = vld [vmem:[%s5811_s2 + $0x200] sm:$0xff]  }
  0xa0   : > { %4170 = vmatpush3.bf16.msra.mxu1 %v4309_v29  ;;  %3939 = vmatprep.subr.bf16.mxu0 %v4310_v36  ;;  %v4322_v29 = vld [vmem:[%s5811_s2 + $0x1c0] sm:$0xff]  }
  0xa1   : > { %4171 = vmatprep.subr.bf16.mxu1 %v4314_v54  ;;  %v4323_v36 = vld [vmem:[%s5811_s2 + $0x180] sm:$0xff]  }
  0xa2   : > { %4140 = vmatmul.mubr.bf16.gmra.mxu0 %v4793_v19 }
  0xa3   : > { %1804 = vmatmul.mubr.bf16.gmra.mxu1 %v4573_v26  ;;  %4143 = vmatprep.mubr.bf16.mxu0 %v4811_v22  ;;  %v4324_v26 = vld [vmem:[%s5811_s2 + $0x218] sm:$0xff]  }
  0xa4   : > { %1811 = vmatprep.mubr.bf16.mxu1 %v4546_v7  ;;  %3940 = vmatpush3.bf16.msra.mxu0 %v4311_v18 }
  0xa5   : > { %3941 = vmatprep.subr.bf16.mxu0 %v4312_v49  ;;  %4172 = vmatpush3.bf16.msra.mxu1 %v4314_v54 }
  0xa6   : > { %4173 = vmatprep.subr.bf16.mxu1 %v4319_v25 }
  0xa8   : > { %3942 = vmatpush3.bf16.msra.mxu0 %v4313_v3 }
  0xa9   : > { %3943 = vmatprep.subr.bf16.mxu0 %v4315_v13  ;;  %4174 = vmatpush3.bf16.msra.mxu1 %v4319_v25 }
  0xaa   : > { %4144 = vmatmul.mubr.bf16.gmra.mxu0 %v4818_v47  ;;  %4175 = vmatprep.subr.bf16.mxu1 %v4324_v26 }
  0xab   : > { %1812 = vmatmul.mubr.bf16.gmra.mxu1 %v4611_v46  ;;  %4147 = vmatprep.mubr.bf16.mxu0 %v4887_v4 }
  0xac   : > { %1819 = vmatprep.mubr.bf16.mxu1 %v4602_v42  ;;  %3944 = vmatpush3.bf16.msra.mxu0 %v4316_v62 }
  0xad   : > { %3945 = vmatprep.subr.bf16.mxu0 %v4317_v17  ;;  %4176 = vmatpush3.bf16.msra.mxu1 %v4324_v26 }
  0xae   : > { %4177 = vmatprep.subr.bf16.mxu1 %v4325_v41 }
  0xb0   : > { %3946 = vmatpush3.bf16.msra.mxu0 %v4318_v21 }
  0xb1   : > { %3947 = vmatprep.subr.bf16.mxu0 %v4320_v32  ;;  %4178 = vmatpush3.bf16.msra.mxu1 %v4325_v41 }
  0xb2   : > { %4148 = vmatmul.mubr.bf16.gmra.mxu0 %v4903_v5  ;;  %4179 = vmatprep.subr.bf16.mxu1 %v4326_v37 }
  0xb3   : > { %1820 = vmatmul.mubr.bf16.gmra.mxu1 %v4662_v39  ;;  %4151 = vmatprep.mubr.bf16.mxu0 %v4928_v0 }
  0xb4   : > { %1827 = vmatprep.mubr.bf16.mxu1 %v4650_v30  ;;  %3948 = vmatpush3.bf16.msra.mxu0 %v4321_v2 }
  0xb5   : > { %3949 = vmatprep.subr.bf16.mxu0 %v4322_v29  ;;  %4180 = vmatpush3.bf16.msra.mxu1 %v4326_v37 }
  0xb6   : > { %4181 = vmatprep.subr.bf16.mxu1 %v4327_v55 }
  0xb8   : > { %3950 = vmatpush3.bf16.msra.mxu0 %v4323_v36 }
  0xb9   : > { %4182 = vmatpush3.bf16.msra.mxu1 %v4327_v55 }
  0xba   : > { %4152 = vmatmul.mubr.bf16.gmra.mxu0 %v4935_v57 }
  0xbb   : > { %1828 = vmatmul.mubr.bf16.gmra.mxu1 %v4729_v44  ;;  %4155 = vmatprep.mubr.bf16.mxu0 %v4972_v27 }
  0xbc   : > { %1835 = vmatprep.mubr.bf16.mxu1 %v4679_v60 }
  0xc2   : > { %4156 = vmatmul.mubr.bf16.gmra.mxu0 %v4977_v11 }
  0xc3   : > { %1836 = vmatmul.mubr.bf16.gmra.mxu1 %v4782_v14  ;;  %4159 = vmatprep.mubr.bf16.mxu0 %v4989_v38 }
  0xc4   : > { %1843 = vmatprep.mubr.bf16.mxu1 %v4747_v63 }
  0xca   : > { %4160 = vmatmul.mubr.bf16.gmra.mxu0 %v4994_v15 }
  0xcb   : > { %1844 = vmatmul.mubr.bf16.gmra.mxu1 %v4829_v45  ;;  %4163 = vmatprep.mubr.bf16.mxu0 %v5007_v59 }
  0xcc   : > { %1851 = vmatprep.mubr.bf16.mxu1 %v4771_v58 }
  0xd2   : > { %4164 = vmatmul.mubr.bf16.gmra.mxu0 %v5014_v43 }
  0xd3   : > { %1852 = vmatmul.mubr.bf16.gmra.mxu1 %v4883_v28  ;;  %2310 = vmatprep.mubr.bf16.mxu0 %v4546_v7 }
  0xd4   : > { %1859 = vmatprep.mubr.bf16.mxu1 %v4824_v50 }
  0xda   : > { %2311 = vmatmul.mubr.bf16.vlgmr.msra.gmra.mxu0 %v4611_v46 }
  0xdb   : > { %1860 = vmatmul.mubr.bf16.gmra.mxu1 %v4924_v16  ;;  %2318 = vmatprep.mubr.bf16.mxu0 %v4602_v42 }
  0xdc   : > { %1867 = vmatprep.mubr.bf16.mxu1 %v4831_v8 }
  0xe2   : > { %2319 = vmatmul.mubr.bf16.gmra.mxu0 %v4662_v39 }
  0xe3   : > { %1868 = vmatmul.mubr.bf16.gmra.mxu1 %v4968_v48  ;;  %2326 = vmatprep.mubr.bf16.mxu0 %v4650_v30 }
  0xe4   : > { %1875 = vmatprep.mubr.bf16.mxu1 %v4892_v23 }
  0xea   : > { %2327 = vmatmul.mubr.bf16.gmra.mxu0 %v4729_v44 }
  0xeb   : > { %1876 = vmatmul.mubr.bf16.gmra.mxu1 %v4985_v40  ;;  %2334 = vmatprep.mubr.bf16.mxu0 %v4679_v60 }
  0xec   : > { %1883 = vmatprep.mubr.bf16.mxu1 %v4897_v33 }
  0xf2   : > { %2335 = vmatmul.mubr.bf16.gmra.mxu0 %v4782_v14 }
  0xf3   : > { %1884 = vmatmul.mubr.bf16.gmra.mxu1 %v5002_v34  ;;  %2342 = vmatprep.mubr.bf16.mxu0 %v4747_v63 }
  0xf4   : > { %1891 = vmatprep.mubr.bf16.mxu1 %v4941_v35 }
  0xfa   : > { %v3679_v7 = vpop.f32.mrf.mxu0  ;;  %2343 = vmatmul.mubr.bf16.gmra.mxu0 %v4829_v45  ;;  %v3751_v42 = vpop.f32.mrf.mxu1 }
  0xfb   : > { %1892 = vmatmul.mubr.bf16.gmra.mxu1 %v5024_v6  ;;  %2350 = vmatprep.mubr.bf16.mxu0 %v4771_v58 }
  0xfc   : > { %v3680_v46 = vpop.f32.mrf.mxu0  ;;  %1899 = vmatprep.mubr.bf16.mxu1 %v4527_v53  ;;  %v3752_v39 = vpop.f32.mrf.mxu1 }
  0xfd   : > { %v5153_v30 = vadd.f32 %v3680_v46, %v3679_v7  ;;  %v5155_v60 = vadd.f32 %v3752_v39, %v3751_v42 }
  0xfe   : > { %v3682_v44 = vpop.f32.mrf.mxu0  ;;  %v3754_v63 = vpop.f32.mrf.mxu1 }
 0x100   : > { %v3683_v14 = vpop.f32.mrf.mxu0  ;;  %v3755_v18 = vpop.f32.mrf.mxu1 }
 0x101   : > { %v5157_v54 = vadd.f32 %v3683_v14, %v3682_v44  ;;  %v5159_v45 = vadd.f32 %v3755_v18, %v3754_v63 }
 0x102   : > { %v3685_v49 = vpop.f32.mrf.mxu0  ;;  %2351 = vmatmul.mubr.bf16.gmra.mxu0 %v4883_v28  ;;  %v3757_v58 = vpop.f32.mrf.mxu1 }
 0x103   : > { %1900 = vmatmul.mubr.bf16.gmra.mxu1 %v4584_v31  ;;  %2358 = vmatprep.mubr.bf16.mxu0 %v4824_v50 }
 0x104   : > { %v3686_v25 = vpop.f32.mrf.mxu0  ;;  %1907 = vmatprep.mubr.bf16.mxu1 %v4558_v12  ;;  %v3758_v13 = vpop.f32.mrf.mxu1 }
 0x105   : > { %v3687_v3 = vadd.f32 %v3686_v25, %v3685_v49  ;;  %v5165_v26 = vadd.f32 %v3758_v13, %v3757_v58 }
 0x106   : > { %v3688_v62 = vpop.f32.mrf.mxu0  ;;  %v3760_v17 = vpop.f32.mrf.mxu1 }
 0x108   : > { %v3689_v41 = vpop.f32.mrf.mxu0  ;;  %v3761_v32 = vpop.f32.mrf.mxu1 }
 0x109   : > { %v3690_v21 = vadd.f32 %v3689_v41, %v3688_v62  ;;  %v5167_v37 = vadd.f32 %v3761_v32, %v3760_v17 }
 0x10a   : > { %v3691_v28 = vpop.f32.mrf.mxu0  ;;  %2359 = vmatmul.mubr.bf16.gmra.mxu0 %v4924_v16 }
 0x10b   : > { %v3763_v2 = vpop.f32.mrf.mxu1  ;;  %1908 = vmatmul.mubr.bf16.gmra.mxu1 %v4619_v52  ;;  %2366 = vmatprep.mubr.bf16.mxu0 %v4831_v8 }
 0x10c   : > { %v3692_v50 = vpop.f32.mrf.mxu0  ;;  %1915 = vmatprep.mubr.bf16.mxu1 %v4631_v9 }
 0x10d   : > { %v3693_v29 = vadd.f32 %v3692_v50, %v3691_v28  ;;  %v3764_v55 = vpop.f32.mrf.mxu1 }
 0x10e   : > { %v5173_v36 = vadd.f32 %v3764_v55, %v3763_v2  ;;  %v3694_v7 = vpop.f32.mrf.mxu0 }
 0x10f   : > { %v3766_v42 = vpop.f32.mrf.mxu1 }
 0x110   : > { %v3695_v46 = vpop.f32.mrf.mxu0 }
 0x111   : > { %v3696_v39 = vadd.f32 %v3695_v46, %v3694_v7  ;;  %v3767_v44 = vpop.f32.mrf.mxu1 }
 0x112   : > { %v5175_v63 = vadd.f32 %v3767_v44, %v3766_v42  ;;  %v3697_v16 = vpop.f32.mrf.mxu0  ;;  %2367 = vmatmul.mubr.bf16.gmra.mxu0 %v4968_v48 }
 0x113   : > { %v3769_v14 = vpop.f32.mrf.mxu1  ;;  %1916 = vmatmul.mubr.bf16.gmra.mxu1 %v4683_v61  ;;  %2374 = vmatprep.mubr.bf16.mxu0 %v4892_v23 }
 0x114   : > { %v3698_v8 = vpop.f32.mrf.mxu0  ;;  %4183 = vmatprep.mubr.bf16.mxu1 %v4786_v56 }
 0x115   : > { %v3699_v18 = vadd.f32 %v3698_v8, %v3697_v16  ;;  %v3770_v49 = vpop.f32.mrf.mxu1 }
 0x116   : > { %v5181_v58 = vadd.f32 %v3770_v49, %v3769_v14  ;;  %v3700_v25 = vpop.f32.mrf.mxu0 }
 0x117   : > { %v3772_v13 = vpop.f32.mrf.mxu1 }
 0x118   : > { %v3701_v62 = vpop.f32.mrf.mxu0 }
 0x119   : > { %v3702_v17 = vadd.f32 %v3701_v62, %v3700_v25  ;;  %v3773_v41 = vpop.f32.mrf.mxu1 }
 0x11a   : > { %v5183_v32 = vadd.f32 %v3773_v41, %v3772_v13  ;;  %v3703_v48 = vpop.f32.mrf.mxu0  ;;  %2375 = vmatmul.mubr.bf16.gmra.mxu0 %v4985_v40 }
 0x11b   : > { %v4089_v28 = vpop.f32.mrf.mxu1  ;;  %4184 = vmatmul.mubr.bf16.vlgmr.msra.gmra.mxu1 %v4793_v19  ;;  %2382 = vmatprep.mubr.bf16.mxu0 %v4897_v33 }
 0x11c   : > { %v5188_v56 = vadd.f32 %v4089_v28, %v3687_v3  ;;  %v3704_v23 = vpop.f32.mrf.mxu0  ;;  %4187 = vmatprep.mubr.bf16.mxu1 %v4811_v22 }
 0x11d   : > { %v3705_v2 = vadd.f32 %v3704_v23, %v3703_v48  ;;  %v1492_v50 = vpop.f32.mrf.mxu1 }
 0x11e   : > { %v5192_v55 = vadd.f32 %v5153_v30, %v1492_v50  ;;  %v3706_v7 = vpop.f32.mrf.mxu0 }
 0x11f   : > { %v4090_v42 = vpop.f32.mrf.mxu1 }
 0x120   : > { %v5194_v46 = vadd.f32 %v4090_v42, %v3690_v21  ;;  %v3707_v40 = vpop.f32.mrf.mxu0 }
 0x121   : > { %v3708_v44 = vadd.f32 %v3707_v40, %v3706_v7  ;;  %v1495_v16 = vpop.f32.mrf.mxu1 }
 0x122   : > { %v5197_v19 = vadd.f32 %v5157_v54, %v1495_v16  ;;  %v3709_v33 = vpop.f32.mrf.mxu0  ;;  %2383 = vmatmul.mubr.bf16.gmra.mxu0 %v5002_v34 }
 0x123   : > { %v4093_v3 = vpop.f32.mrf.mxu1  ;;  %4188 = vmatmul.mubr.bf16.gmra.mxu1 %v4818_v47  ;;  %2390 = vmatprep.mubr.bf16.mxu0 %v4941_v35 }
 0x124   : > { %v5202_v22 = vadd.f32 %v4093_v3, %v3699_v18  ;;  %v3710_v30 = vpop.f32.mrf.mxu0  ;;  %4191 = vmatprep.mubr.bf16.mxu1 %v4887_v4  ;;  %v3549_v4 = vunpack.c.l.bf16 %v4446_v1 }
 0x125   : > { %v3711_v21 = vadd.f32 %v3710_v30, %v3709_v33  ;;  %v1508_v14 = vpop.f32.mrf.mxu1  ;;  %v5830_v33 = vld [vmem:[#allocation11_spill] sm:$0xff] }
 0x126   : > { %v5205_v8 = vadd.f32 %v3693_v29, %v1508_v14  ;;  %v3712_v49 = vpop.f32.mrf.mxu0  ;;  %v3550_v29 = vunpack.c.h.bf16 %v4446_v1 }
 0x127   : > { %v4094_v54 = vpop.f32.mrf.mxu1 }
 0x128   : > { %v5207_v25 = vadd.f32 %v4094_v54, %v3702_v17  ;;  %v3713_v13 = vpop.f32.mrf.mxu0 }
 0x129   : > { %v3714_v34 = vadd.f32 %v3713_v13, %v3712_v49  ;;  %v1511_v62 = vpop.f32.mrf.mxu1 }
 0x12a   : > { %v5209_v41 = vadd.f32 %v3696_v39, %v1511_v62  ;;  %v3715_v47 = vpop.f32.mrf.mxu0  ;;  %2391 = vmatmul.mubr.bf16.gmra.mxu0 %v5024_v6 }
 0x12b   : > { %v4097_v35 = vpop.f32.mrf.mxu1  ;;  %4192 = vmatmul.mubr.bf16.gmra.mxu1 %v4903_v5  ;;  %2398 = vmatprep.mubr.bf16.mxu0 %v4527_v53  ;;  %v4329_v5 = vld [vmem:[%s5812_s3] ss:$0 sm:$0xff] }
 0x12c   : > { %v5216_v18 = vadd.f32 %v4097_v35, %v3711_v21  ;;  %v3716_v17 = vpop.f32.mrf.mxu0  ;;  %4195 = vmatprep.mubr.bf16.mxu1 %v4928_v0  ;;  %v806_v53 = vmul.f32 %v4329_v5, %v3549_v4  ;;  %v807_v50 = vmul.f32 %v4329_v5, %v3550_v29 }
 0x12d   : > { %v3717_v48 = vadd.f32 %v3716_v17, %v3715_v47  ;;  %v1524_v39 = vpop.f32.mrf.mxu1 }
 0x12e   : > { %v5219_v28 = vadd.f32 %v3705_v2, %v1524_v39  ;;  %v3718_v23 = vpop.f32.mrf.mxu0  ;;  %v808_v3 = vadd.f32 %v5830_v33, %v806_v53  ;;  %v809_v30 = vadd.f32 %v5830_v33, %v807_v50 }
 0x12f   : > { %v4098_v6 = vpop.f32.mrf.mxu1 }
 0x130   : > { %v5224_v7 = vadd.f32 %v4098_v6, %v3714_v34  ;;  %v3719_v1 = vpop.f32.mrf.mxu0  ;;  %v810_v34 = vmax.f32 %v808_v3, 0.0  ;;  %v811_v62 = vmax.f32 %v809_v30, 0.0 }
 0x131   : > { %v3720_v42 = vadd.f32 %v3719_v1, %v3718_v23  ;;  %v1527_v40 = vpop.f32.mrf.mxu1 }
 0x132   : > { %v5226_v16 = vadd.f32 %v3708_v44, %v1527_v40  ;;  %v3721_v0 = vpop.f32.mrf.mxu0  ;;  %2399 = vmatmul.mubr.bf16.gmra.mxu0 %v4584_v31  ;;  %v813_v17 = vmul.f32 0.0, %v810_v34 }
 0x133   : > { %v4101_v2 = vpop.f32.mrf.mxu1  ;;  %4196 = vmatmul.mubr.bf16.gmra.mxu1 %v4935_v57  ;;  %2406 = vmatprep.mubr.bf16.mxu0 %v4558_v12 }
 0x134   : > { %v3722_v21 = vpop.f32.mrf.mxu0  ;;  %4199 = vmatprep.mubr.bf16.mxu1 %v4972_v27 }
 0x135   : > { %v3723_v14 = vadd.f32 %v3722_v21, %v3721_v0  ;;  %v1540_v49 = vpop.f32.mrf.mxu1 }
 0x136   : > { %v5234_v54 = vadd.f32 %v3717_v48, %v1540_v49  ;;  %v3724_v44 = vpop.f32.mrf.mxu0  ;;  %v814_v48 = vmul.f32 0.0, %v811_v62 }
 0x137   : > { %v5236_v13 = vadd.f32 %v4101_v2, %v3723_v14  ;;  %v4102_v31 = vpop.f32.mrf.mxu1 }
 0x138   : > { %v3725_v57 = vpop.f32.mrf.mxu0  ;;  %v815_v1 = vpack.c.bf16 %v814_v48, %v813_v17 }
 0x139   : > { %v3726_v47 = vadd.f32 %v3725_v57, %v3724_v44  ;;  %v1543_v12 = vpop.f32.mrf.mxu1 }
 0x13a   : > { %v5238_v35 = vadd.f32 %v3720_v42, %v1543_v12  ;;  %v3727_v4 = vpop.f32.mrf.mxu0  ;;  %2407 = vmatmul.mubr.bf16.gmra.mxu0 %v4619_v52  ;;  %v939_v33 = vshll.u32 %v815_v1, 16 }
 0x13b   : > { %v5241_v29 = vadd.f32 %v4102_v31, %v3726_v47  ;;  %v4105_v27 = vpop.f32.mrf.mxu1  ;;  %4200 = vmatmul.mubr.bf16.gmra.mxu1 %v4977_v11  ;;  %2414 = vmatprep.mubr.bf16.mxu0 %v4631_v9 }
 0x13c   : > { %v3728_v39 = vpop.f32.mrf.mxu0  ;;  %4203 = vmatprep.mubr.bf16.mxu1 %v4989_v38  ;;  %v936_v38 = vshrl.u32 %v815_v1, 16  ;;  %v1015_v31 = vrot.slane %v939_v33, 1 }
 0x13d   : > { %v3729_v23 = vadd.f32 %v3728_v39, %v3727_v4  ;;  %v1556_v6 = vpop.f32.mrf.mxu1 }
 0x13e   : > { %v3730_v5 = vpop.f32.mrf.mxu0  ;;  %v938_v44 = vrot.slane %v936_v38, 7 }
 0x13f   : > { %v5246_v53 = vadd.f32 %v3729_v23, %v1556_v6  ;;  %v4106_v50 = vpop.f32.mrf.mxu1 }
 0x140   : > { %v3731_v52 = vpop.f32.mrf.mxu0 }
 0x141   : > { %v3732_v42 = vadd.f32 %v3731_v52, %v3730_v5  ;;  %v1559_v40 = vpop.f32.mrf.mxu1 }
 0x142   : > { %v3733_v0 = vpop.f32.mrf.mxu0  ;;  %2415 = vmatmul.mubr.bf16.gmra.mxu0 %v4683_v61 }
 0x143   : > { %v5249_v11 = vadd.f32 %v3732_v42, %v1559_v40  ;;  %v4109_v9 = vpop.f32.mrf.mxu1  ;;  %4204 = vmatmul.mubr.bf16.gmra.mxu1 %v4994_v15  ;;  %2422 = vmatprep.mubr.bf16.mxu0 %v4672_v51  ;;  %v5831_v15 = vld [vmem:[#allocation10_spill] sm:$0xff] }
 0x144   : > { %v3734_v2 = vpop.f32.mrf.mxu0  ;;  %4207 = vmatprep.mubr.bf16.mxu1 %v5007_v59  ;;  %v941_v59 = vor.u32 %v939_v33, %v938_v44 }
 0x145   : > { %v3735_v3 = vadd.f32 %v3734_v2, %v3733_v0  ;;  %v1572_v30 = vpop.f32.mrf.mxu1 }
 0x146   : > { %v3736_v21 = vpop.f32.mrf.mxu0 }
 0x147   : > { %v5254_v14 = vadd.f32 %v4105_v27, %v3735_v3  ;;  %v4110_v49 = vpop.f32.mrf.mxu1  ;;  %v1016_v27 = vor.u32 %v1015_v31, %v936_v38 }
 0x148   : > { %v3737_v61 = vpop.f32.mrf.mxu0 }
 0x149   : > { %v3738_v34 = vadd.f32 %v3737_v61, %v3736_v21  ;;  %v1575_v62 = vpop.f32.mrf.mxu1 }
 0x14a   : > { %v3739_v57 = vpop.f32.mrf.mxu0  ;;  %2423 = vmatmul.mubr.bf16.gmra.mxu0 %v5831_v15 }
 0x14b   : > { %v5257_v51 = vadd.f32 %v4106_v50, %v3738_v34  ;;  %v4113_v47 = vpop.f32.mrf.mxu1  ;;  %4208 = vmatmul.mubr.bf16.gmra.mxu1 %v5014_v43  ;;  %2430 = vmatprep.mubr.bf16.mxu0 %v815_v1  ;;  %v980_v43 = vsel %vm4552_vm2, 0, %v941_v59 }
 0x14c   : > { %v5261_v12 = vadd.f32 %v4113_v47, %v5165_v26  ;;  %v3740_v4 = vpop.f32.mrf.mxu0  ;;  %4211 = vmatprep.mubr.bf16.mxu1 %v5028_v24  ;;  %v1055_v24 = vsel %vm4709_vm5, %v1016_v27, 0 }
 0x14d   : > { %v3741_v17 = vadd.f32 %v3740_v4, %v3739_v57  ;;  %v1588_v48 = vpop.f32.mrf.mxu1 }
 0x14e   : > { %v5265_v39 = vadd.f32 %v5155_v60, %v1588_v48  ;;  %v3742_v23 = vpop.f32.mrf.mxu0 }
 0x14f   : > { %v5267_v6 = vadd.f32 %v3741_v17, %v1572_v30  ;;  %v4114_v5 = vpop.f32.mrf.mxu1 }
 0x150   : > { %v5272_v50 = vadd.f32 %v4114_v5, %v5167_v37  ;;  %v3743_v26 = vpop.f32.mrf.mxu0 }
 0x151   : > { %v3744_v1 = vadd.f32 %v3743_v26, %v3742_v23  ;;  %v1591_v52 = vpop.f32.mrf.mxu1 }
 0x152   : > { %v5277_v42 = vadd.f32 %v5159_v45, %v1591_v52  ;;  %v3745_v60 = vpop.f32.mrf.mxu0  ;;  %2431 = vmatmul.mubr.bf16.gmra.mxu0 %v980_v43 }
 0x153   : > { %v5279_v40 = vadd.f32 %v3744_v1, %v1575_v62  ;;  %v4117_v0 = vpop.f32.mrf.mxu1  ;;  %4212 = vmatmul.mubr.bf16.gmra.mxu1 %v1055_v24 }
 0x154   : > { %v5282_v10 = vadd.f32 %v4117_v0, %v5181_v58  ;;  %v3746_v37 = vpop.f32.mrf.mxu0 }
 0x155   : > { %v3747_v38 = vadd.f32 %v3746_v37, %v3745_v60  ;;  %v1604_v2 = vpop.f32.mrf.mxu1 }
 0x156   : > { %v5285_v20 = vadd.f32 %v5173_v36, %v1604_v2  ;;  %v3748_v33 = vpop.f32.mrf.mxu0 }
 0x157   : > { %v5287_v3 = vadd.f32 %v4109_v9, %v3747_v38  ;;  %v4118_v45 = vpop.f32.mrf.mxu1 }
 0x158   : > { %v5290_v30 = vadd.f32 %v4118_v45, %v5183_v32  ;;  %v3749_v21 = vpop.f32.mrf.mxu0 }
 0x159   : > { %v3750_v44 = vadd.f32 %v3749_v21, %v3748_v33  ;;  %v1607_v61 = vpop.f32.mrf.mxu1 }
 0x15a   : > { %5832 = vst [vmem:[#allocation11_spill] sm:$0xff] %v5290_v30  ;;  %v5293_v31 = vadd.f32 %v5175_v63, %v1607_v61  ;;  %v4137_v58 = vpop.f32.mrf.mxu0 }
 0x15b   : > { %v5295_v34 = vadd.f32 %v4110_v49, %v3750_v44  ;;  %v3815_v62 = vpop.f32.mrf.mxu1 }
 0x15c   : > { %v1958_v57 = vpop.f32.mrf.mxu0 }
 0x15d   : > { %v3816_v36 = vpop.f32.mrf.mxu1 }
 0x15e   : > { %v3817_v15 = vadd.f32 %v3816_v36, %v3815_v62  ;;  %v4138_v47 = vpop.f32.mrf.mxu0 }
 0x15f   : > { %v3818_v9 = vpop.f32.mrf.mxu1 }
 0x160   : > { %v1798_v59 = vadd.f32 %v3817_v15, %v5192_v55  ;;  %v1961_v4 = vpop.f32.mrf.mxu0 }
 0x161   : > { %v3819_v32 = vpop.f32.mrf.mxu1 }
 0x162   : > { %v5298_v27 = vadd.f32 %v1958_v57, %v1798_v59  ;;  %v3820_v17 = vadd.f32 %v3819_v32, %v3818_v9  ;;  %v4141_v48 = vpop.f32.mrf.mxu0 }
 0x163   : > { %v3821_v23 = vpop.f32.mrf.mxu1 }
 0x164   : > { %v1801_v63 = vadd.f32 %v3820_v17, %v5197_v19  ;;  %v1974_v5 = vpop.f32.mrf.mxu0 }
 0x165   : > { %v3822_v49 = vpop.f32.mrf.mxu1 }
 0x166   : > { %v5301_v43 = vadd.f32 %v1961_v4, %v1801_v63  ;;  %v3823_v26 = vadd.f32 %v3822_v49, %v3821_v23  ;;  %v4142_v24 = vpop.f32.mrf.mxu0 }
 0x167   : > { %v3824_v1 = vpop.f32.mrf.mxu1 }
 0x168   : > { %v1806_v52 = vadd.f32 %v3823_v26, %v5188_v56  ;;  %v1977_v60 = vpop.f32.mrf.mxu0 }
 0x169   : > { %v3825_v55 = vpop.f32.mrf.mxu1 }
 0x16a   : > { %v3826_v0 = vadd.f32 %v3825_v55, %v3824_v1  ;;  %v4145_v37 = vpop.f32.mrf.mxu0  ;;  %v5304_v38 = vadd.f32 %v4137_v58, %v1806_v52 }
 0x16b   : > { %v3827_v2 = vpop.f32.mrf.mxu1 }
 0x16c   : > { %v1809_v33 = vadd.f32 %v3826_v0, %v5194_v46  ;;  %v1990_v45 = vpop.f32.mrf.mxu0 }
 0x16d   : > { %v3828_v19 = vpop.f32.mrf.mxu1 }
 0x16e   : > { %v3829_v21 = vadd.f32 %v3828_v19, %v3827_v2  ;;  %v4146_v44 = vpop.f32.mrf.mxu0  ;;  %v5307_v61 = vadd.f32 %v4138_v47, %v1809_v33 }
 0x16f   : > { %v3830_v62 = vpop.f32.mrf.mxu1 }
 0x170   : > { %v1814_v57 = vadd.f32 %v3829_v21, %v5205_v8  ;;  %v1993_v36 = vpop.f32.mrf.mxu0 }
 0x171   : > { %v3831_v56 = vpop.f32.mrf.mxu1 }
 0x172   : > { %v3832_v15 = vadd.f32 %v3831_v56, %v3830_v62  ;;  %v5310_v9 = vpop.f32.mrf.mxu0  ;;  %v5312_v59 = vadd.f32 %v1974_v5, %v1814_v57 }
 0x173   : > { %v3833_v58 = vpop.f32.mrf.mxu1 }
 0x174   : > { %v1817_v4 = vadd.f32 %v3832_v15, %v5209_v41  ;;  %v2006_v46 = vpop.f32.mrf.mxu0 }
 0x175   : > { %v3834_v32 = vpop.f32.mrf.mxu1 }
 0x176   : > { %v3835_v17 = vadd.f32 %v3834_v32, %v3833_v58  ;;  %v5315_v23 = vpop.f32.mrf.mxu0  ;;  %v5317_v47 = vadd.f32 %v1977_v60, %v1817_v4 }
 0x177   : > { %v3836_v63 = vpop.f32.mrf.mxu1 }
 0x178   : > { %v1822_v8 = vadd.f32 %v3835_v17, %v5202_v22  ;;  %v2009_v49 = vpop.f32.mrf.mxu0 }
 0x179   : > { %v3837_v26 = vpop.f32.mrf.mxu1 }
 0x17a   : > { %v3838_v1 = vadd.f32 %v3837_v26, %v3836_v63  ;;  %v5320_v52 = vpop.f32.mrf.mxu0  ;;  %v5322_v5 = vadd.f32 %v4141_v48, %v1822_v8 }
 0x17b   : > { %v3839_v55 = vpop.f32.mrf.mxu1 }
 0x17c   : > { %v1825_v41 = vadd.f32 %v3838_v1, %v5207_v25  ;;  %v5325_v0 = vpop.f32.mrf.mxu0 }
 0x17d   : > { %v3840_v2 = vpop.f32.mrf.mxu1 }
 0x17e   : > { %v3841_v33 = vadd.f32 %v3840_v2, %v3839_v55  ;;  %v5327_v19 = vpop.f32.mrf.mxu0  ;;  %v5329_v60 = vadd.f32 %v4142_v24, %v1825_v41 }
 0x17f   : > { %v3842_v21 = vpop.f32.mrf.mxu1 }
 0x180   : > { %v1830_v22 = vadd.f32 %v3841_v33, %v5219_v28  ;;  %v5332_v62 = vpop.f32.mrf.mxu0 }
 0x181   : > { %v3843_v57 = vpop.f32.mrf.mxu1 }
 0x182   : > { %v3844_v56 = vadd.f32 %v3843_v57, %v3842_v21  ;;  %v5334_v48 = vpop.f32.mrf.mxu0  ;;  %v5336_v15 = vadd.f32 %v1990_v45, %v1830_v22 }
 0x183   : > { %v3845_v25 = vpop.f32.mrf.mxu1 }
 0x184   : > { %v1833_v58 = vadd.f32 %v3844_v56, %v5226_v16  ;;  %v5339_v4 = vpop.f32.mrf.mxu0 }
 0x185   : > { %v3846_v32 = vpop.f32.mrf.mxu1 }
 0x186   : > { %v3847_v17 = vadd.f32 %v3846_v32, %v3845_v25  ;;  %v5341_v24 = vpop.f32.mrf.mxu0  ;;  %v5343_v63 = vadd.f32 %v1993_v36, %v1833_v58 }
 0x187   : > { %v3848_v28 = vpop.f32.mrf.mxu1 }
 0x188   : > { %v1838_v8 = vadd.f32 %v3847_v17, %v5216_v18  ;;  %v5346_v26 = vpop.f32.mrf.mxu0 }
 0x189   : > { %v3849_v1 = vpop.f32.mrf.mxu1 }
 0x18a   : > { %v3850_v55 = vadd.f32 %v3849_v1, %v3848_v28  ;;  %v5348_v45 = vpop.f32.mrf.mxu0  ;;  %v5350_v41 = vadd.f32 %v4145_v37, %v1838_v8 }
 0x18b   : > { %v3851_v16 = vpop.f32.mrf.mxu1 }
 0x18c   : > { %v1841_v2 = vadd.f32 %v3850_v55, %v5224_v7  ;;  %v5353_v33 = vpop.f32.mrf.mxu0 }
 0x18d   : > { %v3852_v21 = vpop.f32.mrf.mxu1 }
 0x18e   : > { %v3853_v22 = vadd.f32 %v3852_v21, %v3851_v16  ;;  %v5355_v36 = vpop.f32.mrf.mxu0  ;;  %v5357_v57 = vadd.f32 %v4146_v44, %v1841_v2 }
 0x18f   : > { %v3854_v18 = vpop.f32.mrf.mxu1 }
 0x190   : > { %v1846_v56 = vadd.f32 %v3853_v22, %v5234_v54  ;;  %v5360_v25 = vpop.f32.mrf.mxu0 }
 0x191   : > { %v3855_v58 = vpop.f32.mrf.mxu1 }
 0x192   : > { %v3856_v32 = vadd.f32 %v3855_v58, %v3854_v18  ;;  %v5362_v37 = vpop.f32.mrf.mxu0  ;;  %v5364_v17 = vadd.f32 %v2006_v46, %v1846_v56 }
 0x193   : > { %5833 = vst [vmem:[#allocation10_spill] sm:$0xff] %v5362_v37  ;;  %v3857_v7 = vpop.f32.mrf.mxu1 }
 0x194   : > { %v1849_v28 = vadd.f32 %v3856_v32, %v5238_v35  ;;  %v5367_v8 = vpop.f32.mrf.mxu0 }
 0x195   : > { %v3858_v1 = vpop.f32.mrf.mxu1 }
 0x196   : > { %v3859_v55 = vadd.f32 %v3858_v1, %v3857_v7  ;;  %v5369_v44 = vpop.f32.mrf.mxu0  ;;  %v5371_v16 = vadd.f32 %v2009_v49, %v1849_v28 }
 0x197   : > { %5834 = vst [vmem:[#allocation12_spill] sm:$0xff] %v5369_v44  ;;  %v3860_v54 = vpop.f32.mrf.mxu1 }
 0x198   : > { %v1854_v2 = vadd.f32 %v3859_v55, %v5236_v13  ;;  %v5374_v21 = vpop.f32.mrf.mxu0 }
 0x199   : > { %v3861_v22 = vpop.f32.mrf.mxu1 }
 0x19a   : > { %v3862_v18 = vadd.f32 %v3861_v22, %v3860_v54  ;;  %v3951_v46 = vpop.f32.mrf.mxu0  ;;  %v5377_v56 = vadd.f32 %v5310_v9, %v1854_v2 }
 0x19b   : > { %v3863_v35 = vpop.f32.mrf.mxu1 }
 0x19c   : > { %v1857_v58 = vadd.f32 %v3862_v18, %v5241_v29  ;;  %v3952_v32 = vpop.f32.mrf.mxu0 }
 0x19d   : > { %v3864_v7 = vpop.f32.mrf.mxu1  ;;  %v5380_v1 = vadd.f32 %v3952_v32, %v3951_v46 }
 0x19e   : > { %v3865_v49 = vadd.f32 %v3864_v7, %v3863_v35  ;;  %v5382_v28 = vpop.f32.mrf.mxu0  ;;  %v5385_v13 = vadd.f32 %v5315_v23, %v1857_v58 }
 0x19f   : > { %v3866_v55 = vpop.f32.mrf.mxu1 }
 0x1a0   : > { %v1862_v54 = vadd.f32 %v3865_v49, %v5246_v53  ;;  %v5388_v22 = vpop.f32.mrf.mxu0 }
 0x1a1   : > { %v3867_v9 = vpop.f32.mrf.mxu1 }
 0x1a2   : > { %v3868_v2 = vadd.f32 %v3867_v9, %v3866_v55  ;;  %v5390_v44 = vpop.f32.mrf.mxu0  ;;  %v5393_v29 = vadd.f32 %v5325_v0, %v1862_v54 }
 0x1a3   : > { %v3869_v18 = vpop.f32.mrf.mxu1 }
 0x1a4   : > { %v1865_v46 = vadd.f32 %v3868_v2, %v5249_v11  ;;  %v5396_v35 = vpop.f32.mrf.mxu0 }
 0x1a5   : > { %v3870_v32 = vpop.f32.mrf.mxu1 }
 0x1a6   : > { %v3871_v23 = vadd.f32 %v3870_v32, %v3869_v18  ;;  %v5398_v58 = vpop.f32.mrf.mxu0  ;;  %v5401_v53 = vadd.f32 %v5332_v62, %v1865_v46 }
 0x1a7   : > { %v3872_v7 = vpop.f32.mrf.mxu1 }
 0x1a8   : > { %5835 = vst [vmem:[#allocation13_spill] sm:$0xff] %v5401_v53  ;;  %v1870_v49 = vadd.f32 %v3871_v23, %v5254_v14  ;;  %v5404_v55 = vpop.f32.mrf.mxu0 }
 0x1a9   : > { %v3873_v9 = vpop.f32.mrf.mxu1 }
 0x1aa   : > { %v3874_v0 = vadd.f32 %v3873_v9, %v3872_v7  ;;  %v5406_v54 = vpop.f32.mrf.mxu0  ;;  %v5409_v11 = vadd.f32 %v5320_v52, %v1870_v49 }
 0x1ab   : > { %v3875_v2 = vpop.f32.mrf.mxu1 }
 0x1ac   : > { %v1873_v18 = vadd.f32 %v3874_v0, %v5257_v51  ;;  %v5412_v32 = vpop.f32.mrf.mxu0 }
 0x1ad   : > { %v3876_v37 = vpop.f32.mrf.mxu1 }
 0x1ae   : > { %v3877_v62 = vadd.f32 %v3876_v37, %v3875_v2  ;;  %v5414_v46 = vpop.f32.mrf.mxu0  ;;  %v5417_v14 = vadd.f32 %v5327_v19, %v1873_v18 }
 0x1af   : > { %v3878_v23 = vpop.f32.mrf.mxu1 }
 0x1b0   : > { %5836 = vst [vmem:[#allocation14_spill] sm:$0xff] %v5417_v14  ;;  %v1878_v7 = vadd.f32 %v3877_v62, %v5267_v6  ;;  %v5420_v9 = vpop.f32.mrf.mxu0 }
 0x1b1   : > { %v3879_v30 = vpop.f32.mrf.mxu1 }
 0x1b2   : > { %v3880_v52 = vadd.f32 %v3879_v30, %v3878_v23  ;;  %v5422_v49 = vpop.f32.mrf.mxu0  ;;  %v5425_v51 = vadd.f32 %v5339_v4, %v1878_v7 }
 0x1b3   : > { %v3881_v0 = vpop.f32.mrf.mxu1 }
 0x1b4   : > { %5837 = vst [vmem:[#allocation15_spill] sm:$0xff] %v5425_v51  ;;  %v1881_v37 = vadd.f32 %v3880_v52, %v5279_v40  ;;  %v5428_v2 = vpop.f32.mrf.mxu0 }
 0x1b5   : > { %v3882_v53 = vpop.f32.mrf.mxu1 }
 0x1b6   : > { %v3883_v19 = vadd.f32 %v3882_v53, %v3881_v0  ;;  %v5430_v18 = vpop.f32.mrf.mxu0  ;;  %v5433_v6 = vadd.f32 %v5346_v26, %v1881_v37 }
 0x1b7   : > { %v3884_v62 = vpop.f32.mrf.mxu1 }
 0x1b8   : > { %5838 = vst [vmem:[#allocation16_spill] sm:$0xff] %v5433_v6  ;;  %v1886_v30 = vadd.f32 %v3883_v19, %v5287_v3  ;;  %v5436_v23 = vpop.f32.mrf.mxu0 }
 0x1b9   : > { %v3885_v14 = vpop.f32.mrf.mxu1 }
 0x1ba   : > { %v3886_v4 = vadd.f32 %v3885_v14, %v3884_v62  ;;  %v5438_v7 = vpop.f32.mrf.mxu0  ;;  %v5441_v40 = vadd.f32 %v5334_v48, %v1886_v30 }
 0x1bb   : > { %v3887_v52 = vpop.f32.mrf.mxu1 }
 0x1bc   : > { %5839 = vst [vmem:[#allocation17_spill] sm:$0xff] %v5441_v40  ;;  %v1889_v53 = vadd.f32 %v3886_v4, %v5295_v34  ;;  %v5444_v0 = vpop.f32.mrf.mxu0 }
 0x1bd   : > { %v3888_v51 = vpop.f32.mrf.mxu1 }
 0x1be   : > { %v3889_v26 = vadd.f32 %v3888_v51, %v3887_v52  ;;  %v5446_v37 = vpop.f32.mrf.mxu0  ;;  %v5449_v3 = vadd.f32 %v5341_v24, %v1889_v53 }
 0x1bf   : > { %v3890_v19 = vpop.f32.mrf.mxu1 }
 0x1c0   : > { %5840 = vst [vmem:[#allocation18_spill] sm:$0xff] %v5449_v3  ;;  %v1894_v14 = vadd.f32 %v3889_v26, %v5265_v39  ;;  %v5452_v62 = vpop.f32.mrf.mxu0 }
 0x1c1   : > { %v3891_v6 = vpop.f32.mrf.mxu1 }
 0x1c2   : > { %v3892_v48 = vadd.f32 %v3891_v6, %v3890_v19  ;;  %v5454_v30 = vpop.f32.mrf.mxu0  ;;  %v5457_v34 = vadd.f32 %v5353_v33, %v1894_v14 }
 0x1c3   : > { %v3893_v4 = vpop.f32.mrf.mxu1 }
 0x1c4   : > { %5841 = vst [vmem:[#allocation19_spill] sm:$0xff] %v5457_v34  ;;  %v1897_v51 = vadd.f32 %v3892_v48, %v5277_v42  ;;  %v5460_v52 = vpop.f32.mrf.mxu0 }
 0x1c5   : > { %v3894_v40 = vpop.f32.mrf.mxu1 }
 0x1c6   : > { %v3895_v24 = vadd.f32 %v3894_v40, %v3893_v4  ;;  %v5462_v53 = vpop.f32.mrf.mxu0  ;;  %v5465_v39 = vadd.f32 %v5360_v25, %v1897_v51 }
 0x1c7   : > { %v3896_v26 = vpop.f32.mrf.mxu1 }
 0x1c8   : > { %5842 = vst [vmem:[#allocation20_spill] sm:$0xff] %v5465_v39  ;;  %v1902_v6 = vadd.f32 %v3895_v24, %v5261_v12  ;;  %v5468_v19 = vpop.f32.mrf.mxu0 }
 0x1c9   : > { %v3897_v3 = vpop.f32.mrf.mxu1 }
 0x1ca   : > { %v3898_v33 = vadd.f32 %v3897_v3, %v3896_v26  ;;  %v5470_v14 = vpop.f32.mrf.mxu0  ;;  %v5473_v42 = vadd.f32 %v5348_v45, %v1902_v6 }
 0x1cb   : > { %v3899_v48 = vpop.f32.mrf.mxu1 }
 0x1cc   : > { %5843 = vst [vmem:[#allocation21_spill] sm:$0xff] %v5473_v42  ;;  %v1905_v40 = vadd.f32 %v3898_v33, %v5272_v50  ;;  %v5476_v4 = vpop.f32.mrf.mxu0 }
 0x1cd   : > { %v3900_v34 = vpop.f32.mrf.mxu1 }
 0x1ce   : > { %v3901_v25 = vadd.f32 %v3900_v34, %v3899_v48  ;;  %v5478_v51 = vpop.f32.mrf.mxu0  ;;  %v5481_v12 = vadd.f32 %v5355_v36, %v1905_v40 }
 0x1cf   : > { %v3902_v24 = vpop.f32.mrf.mxu1 }
 0x1d0   : > { %v1910_v3 = vadd.f32 %v3901_v25, %v5285_v20  ;;  %v5484_v26 = vpop.f32.mrf.mxu0 }
 0x1d1   : > { %v3903_v39 = vpop.f32.mrf.mxu1 }
 0x1d2   : > { %v3904_v45 = vadd.f32 %v3903_v39, %v3902_v24  ;;  %v5486_v6 = vpop.f32.mrf.mxu0  ;;  %v5489_v50 = vadd.f32 %v5367_v8, %v1910_v3 }
 0x1d3   : > { %v3905_v33 = vpop.f32.mrf.mxu1 }
 0x1d4   : > { %5844 = vst [vmem:[#allocation22_spill] sm:$0xff] %v5489_v50  ;;  %v1913_v34 = vadd.f32 %v3904_v45, %v5293_v31  ;;  %v5492_v48 = vpop.f32.mrf.mxu0 }
 0x1d5   : > { %v3906_v42 = vpop.f32.mrf.mxu1 }
 0x1d6   : > { %v3907_v36 = vadd.f32 %v3906_v42, %v3905_v33  ;;  %v5494_v40 = vpop.f32.mrf.mxu0  ;;  %v5497_v20 = vadd.f32 %v5374_v21, %v1913_v34  ;;  %v3959_v42 = vadd.f32 %v5396_v35, %v5390_v44  ;;  %v3962_v21 = vadd.f32 %v5404_v55, %v5398_v58 }
 0x1d7   : > { %v5499_v25 = vpop.f32.mrf.mxu1 }
 0x1d8   : > { %5845 = vst [vmem:[#allocation23_spill] sm:$0xff] %v5497_v20  ;;  %5846 = vst [vmem:[#allocation24_spill] sm:$0xff] %v5499_v25  ;;  %v5502_v39 = vadd.f32 %v3907_v36, %v5282_v10  ;;  %v5504_v24 = vpop.f32.mrf.mxu0 }
 0x1d9   : > { %v5506_v8 = vpop.f32.mrf.mxu1 }
 0x1da   : > { %5847 = vst [vmem:[#allocation25_spill] sm:$0xff] %v5502_v39  ;;  %5848 = vst [vmem:[#allocation26_spill] sm:$0xff] %v5506_v8  ;;  %v5508_v3 = vpop.f32.mrf.mxu0  ;;  %v3956_v39 = vadd.f32 %v5388_v22, %v5382_v28  ;;  %v3971_v28 = vadd.f32 %v5428_v2, %v5422_v49 }
 0x1db   : > { %v4185_v31 = vpop.f32.mrf.mxu1 }
 0x1dc   : > { %v5512_v45 = vpop.f32.mrf.mxu0  ;;  %v2482_v34 = vadd.f32 %v4185_v31, %v3959_v42 }
 0x1dd   : > { %v2473_v33 = vpop.f32.mrf.mxu1 }
 0x1de   : > { %v2474_v10 = vadd.f32 %v5380_v1, %v2473_v33  ;;  %v5517_v36 = vpop.f32.mrf.mxu0  ;;  %v5527_v25 = vadd.f32 %v2482_v34, %v5304_v38 }
 0x1df   : > { %v4186_v20 = vpop.f32.mrf.mxu1 }
 0x1e0   : > { %v5522_v50 = vadd.f32 %v2474_v10, %v5298_v27  ;;  %v2485_v8 = vadd.f32 %v4186_v20, %v3962_v21  ;;  %v5524_v44 = vpop.f32.mrf.mxu0  ;;  %v3965_v27 = vadd.f32 %v5412_v32, %v5406_v54 }
 0x1e1   : > { %v2476_v35 = vpop.f32.mrf.mxu1 }
 0x1e2   : > { %v5530_v58 = vadd.f32 %v2485_v8, %v5307_v61  ;;  %v2477_v1 = vadd.f32 %v3956_v39, %v2476_v35  ;;  %v5532_v55 = vpop.f32.mrf.mxu0  ;;  %v3974_v8 = vadd.f32 %v5436_v23, %v5430_v18 }
 0x1e3   : > { %v4189_v22 = vpop.f32.mrf.mxu1 }
 0x1e4   : > { %v3559_v20 = vpack.c.bf16 %v5530_v58, %v5527_v25  ;;  %v5541_v38 = vadd.f32 %v2477_v1, %v5301_v43  ;;  %v5543_v31 = vpop.f32.mrf.mxu0  ;;  %v2498_v61 = vadd.f32 %v4189_v22, %v3971_v28  ;;  %v3968_v43 = vadd.f32 %v5420_v9, %v5414_v46 }
 0x1e5   : > { %v2489_v39 = vpop.f32.mrf.mxu1  ;;  %v3983_v28 = vadd.f32 %v5460_v52, %v5454_v30  ;;  %v3986_v30 = vadd.f32 %v5468_v19, %v5462_v53 }
 0x1e6   : > { %3648 = vst [vmem:[%s4437_s18 + $0x8] sm:$0xff] %v3559_v20   ;;  %v2632_v49 = vadd.f32 %v5541_v38, %v5522_v50  ;;  %v3554_v54 = vpack.c.bf16 %v5541_v38, %v5522_v50  ;;  %v2490_v32 = vadd.f32 %v3965_v27, %v2489_v39  ;;  %v5552_v2 = vpop.f32.mrf.mxu0  ;;  %v5561_v18 = vadd.f32 %v2498_v61, %v5322_v5 }
 0x1e7   : > { %v4190_v42 = vpop.f32.mrf.mxu1  ;;  %v3977_v5 = vadd.f32 %v5444_v0, %v5438_v7 }
 0x1e8   : > { %v2633_v33 = vadd.f32 %v2632_v49, %v5527_v25  ;;  %3555 = vst [vmem:[%s4437_s18] sm:$0xff] %v3554_v54   ;;  %v2501_v21 = vadd.f32 %v4190_v42, %v3974_v8  ;;  %v5558_v34 = vpop.f32.mrf.mxu0  ;;  %v5564_v10 = vadd.f32 %v2490_v32, %v5312_v59 }
 0x1e9   : > { %v2492_v23 = vpop.f32.mrf.mxu1 }
 0x1ea   : > { %v2634_v35 = vadd.f32 %v2633_v33, %v5530_v58  ;;  %v5568_v1 = vadd.f32 %v2501_v21, %v5329_v60  ;;  %v2493_v46 = vadd.f32 %v3968_v43, %v2492_v23  ;;  %v5570_v9 = vpop.f32.mrf.mxu0  ;;  %v3995_v23 = vadd.f32 %v5492_v48, %v5486_v6 }
 0x1eb   : > { %v4193_v22 = vpop.f32.mrf.mxu1 }
 0x1ec   : > { %v2635_v27 = vadd.f32 %v2634_v35, %v5564_v10  ;;  %v3569_v59 = vpack.c.bf16 %v5568_v1, %v5561_v18  ;;  %v5580_v20 = vadd.f32 %v2493_v46, %v5317_v47  ;;  %v5582_v60 = vpop.f32.mrf.mxu0  ;;  %v2514_v61 = vadd.f32 %v4193_v22, %v3983_v28 }
 0x1ed   : > { %v2505_v39 = vpop.f32.mrf.mxu1  ;;  %v3980_v47 = vadd.f32 %v5452_v62, %v5446_v37 }
 0x1ee   : > { %3650 = vst [vmem:[%s4437_s18 + $0x18] sm:$0xff] %v3569_v59   ;;  %v2636_v52 = vadd.f32 %v2635_v27, %v5580_v20  ;;  %v3564_v7 = vpack.c.bf16 %v5580_v20, %v5564_v10  ;;  %v2506_v0 = vadd.f32 %v3977_v5, %v2505_v39  ;;  %v5590_v8 = vpop.f32.mrf.mxu0  ;;  %v5599_v53 = vadd.f32 %v2514_v61, %v5350_v41 }
 0x1ef   : > { %v4194_v49 = vpop.f32.mrf.mxu1  ;;  %v3989_v41 = vadd.f32 %v5476_v4, %v5470_v14  ;;  %v3998_v27 = vadd.f32 %v5504_v24, %v5494_v40  ;;  %v3992_v61 = vadd.f32 %v5484_v26, %v5478_v51  ;;  %v4007_v26 = vadd.f32 %v5543_v31, %v5532_v55 }
 0x1f0   : > { %v2637_v54 = vadd.f32 %v2636_v52, %v5561_v18  ;;  %3649 = vst [vmem:[%s4437_s18 + $0x10] sm:$0xff] %v3564_v7   ;;  %v2517_v32 = vadd.f32 %v4194_v49, %v3986_v30  ;;  %v5596_v42 = vpop.f32.mrf.mxu0  ;;  %v5602_v43 = vadd.f32 %v2506_v0, %v5336_v15 }
 0x1f1   : > { %v2508_v19 = vpop.f32.mrf.mxu1 }
 0x1f2   : > { %v2638_v33 = vadd.f32 %v2637_v54, %v5568_v1  ;;  %v5606_v21 = vadd.f32 %v2517_v32, %v5357_v57  ;;  %v2509_v37 = vadd.f32 %v3980_v47, %v2508_v19  ;;  %v4017_v62 = vpop.f32.mrf.mxu0 }
 0x1f3   : > { %v4197_v35 = vpop.f32.mrf.mxu1 }
 0x1f4   : > { %v2639_v46 = vadd.f32 %v2638_v33, %v5602_v43  ;;  %v3579_v15 = vpack.c.bf16 %v5606_v21, %v5599_v53  ;;  %v5616_v28 = vadd.f32 %v2509_v37, %v5343_v63  ;;  %v4018_v57 = vpop.f32.mrf.mxu0  ;;  %v2530_v22 = vadd.f32 %v4197_v35, %v3995_v23 }
 0x1f5   : > { %v2521_v5 = vpop.f32.mrf.mxu1  ;;  %v4010_v37 = vadd.f32 %v5558_v34, %v5552_v2  ;;  %v4004_v35 = vadd.f32 %v5524_v44, %v5517_v36  ;;  %v4019_v44 = vadd.f32 %v4018_v57, %v4017_v62 }
 0x1f6   : > { %3652 = vst [vmem:[%s4437_s18 + $0x28] sm:$0xff] %v3579_v15   ;;  %v2640_v6 = vadd.f32 %v2639_v46, %v5616_v28  ;;  %v3574_v14 = vpack.c.bf16 %v5616_v28, %v5602_v43  ;;  %v2522_v4 = vadd.f32 %v3989_v41, %v2521_v5  ;;  %v4020_v48 = vpop.f32.mrf.mxu0  ;;  %v5629_v52 = vadd.f32 %v2530_v22, %v5377_v56  ;;  %v5849_v5 = vld [vmem:[#allocation14_spill] sm:$0xff] }
 0x1f7   : > { %v4198_v59 = vpop.f32.mrf.mxu1  ;;  %v4001_v56 = vadd.f32 %v5512_v45, %v5508_v3 }
 0x1f8   : > { %v2641_v63 = vadd.f32 %v2640_v6, %v5599_v53  ;;  %3651 = vst [vmem:[%s4437_s18 + $0x20] sm:$0xff] %v3574_v14   ;;  %v2533_v39 = vadd.f32 %v4198_v59, %v3998_v27  ;;  %v4021_v30 = vpop.f32.mrf.mxu0  ;;  %v5632_v24 = vadd.f32 %v2522_v4, %v5364_v17  ;;  %v4013_v4 = vadd.f32 %v5582_v60, %v5570_v9 }
 0x1f9   : > { %v2524_v40 = vpop.f32.mrf.mxu1 }
 0x1fa   : > { %v2642_v7 = vadd.f32 %v2641_v63, %v5606_v21  ;;  %v5636_v0 = vadd.f32 %v2533_v39, %v5385_v13  ;;  %v2525_v49 = vadd.f32 %v3992_v61, %v2524_v40  ;;  %v4023_v51 = vpop.f32.mrf.mxu0 }
 0x1fb   : > { %v4201_v47 = vpop.f32.mrf.mxu1 }
 0x1fc   : > { %v2643_v54 = vadd.f32 %v2642_v7, %v5632_v24  ;;  %v3589_v17 = vpack.c.bf16 %v5636_v0, %v5629_v52  ;;  %v5646_v32 = vadd.f32 %v2525_v49, %v5371_v16  ;;  %v4024_v13 = vpop.f32.mrf.mxu0  ;;  %v2546_v19 = vadd.f32 %v4201_v47, %v4007_v26 }
 0x1fd   : > { %v2537_v33 = vpop.f32.mrf.mxu1  ;;  %v4022_v7 = vadd.f32 %v4021_v30, %v4020_v48  ;;  %v4016_v26 = vadd.f32 %v5596_v42, %v5590_v8  ;;  %v5852_v30 = vld [vmem:[#allocation15_spill] sm:$0xff] }
 0x1fe   : > { %3654 = vst [vmem:[%s4437_s18 + $0x38] sm:$0xff] %v3589_v17   ;;  %v2644_v55 = vadd.f32 %v2643_v54, %v5646_v32  ;;  %v3584_v3 = vpack.c.bf16 %v5646_v32, %v5632_v24  ;;  %v2538_v45 = vadd.f32 %v4001_v56, %v2537_v33  ;;  %v4026_v31 = vpop.f32.mrf.mxu0  ;;  %v5659_v15 = vadd.f32 %v2546_v19, %v5409_v11  ;;  %v5851_v17 = vld [vmem:[#allocation17_spill] sm:$0xff] }
 0x1ff   : > { %v4202_v23 = vpop.f32.mrf.mxu1 }
 0x200   : > { %v2645_v16 = vadd.f32 %v2644_v55, %v5629_v52  ;;  %3653 = vst [vmem:[%s4437_s18 + $0x30] sm:$0xff] %v3584_v3   ;;  %v2549_v41 = vadd.f32 %v4202_v23, %v4010_v37  ;;  %v4027_v46 = vpop.f32.mrf.mxu0  ;;  %v5662_v34 = vadd.f32 %v2538_v45, %v5393_v29  ;;  %v5850_v29 = vld [vmem:[#allocation13_spill] sm:$0xff]  ;;  %v5853_v55 = vld [vmem:[#allocation18_spill] sm:$0xff] }
 0x201   : > { %v2540_v2 = vpop.f32.mrf.mxu1 }
 0x202   : > { %v2646_v22 = vadd.f32 %v2645_v16, %v5636_v0  ;;  %v5666_v27 = vadd.f32 %v2549_v41, %v5849_v5  ;;  %v2541_v6 = vadd.f32 %v4004_v35, %v2540_v2  ;;  %v4029_v36 = vpop.f32.mrf.mxu0  ;;  %v4025_v35 = vadd.f32 %v4024_v13, %v4023_v51  ;;  %v5854_v2 = vld [vmem:[#allocation16_spill] sm:$0xff] }
 0x203   : > { %v4205_v14 = vpop.f32.mrf.mxu1 }
 0x204   : > { %v2647_v11 = vadd.f32 %v2646_v22, %v5662_v34  ;;  %v3599_v59 = vpack.c.bf16 %v5666_v27, %v5659_v15  ;;  %v5674_v61 = vadd.f32 %v2541_v6, %v5850_v29  ;;  %v4030_v63 = vpop.f32.mrf.mxu0  ;;  %v2562_v39 = vadd.f32 %v4205_v14, %v4019_v44 }
 0x205   : > { %v2553_v40 = vpop.f32.mrf.mxu1  ;;  %v4031_v42 = vadd.f32 %v4030_v63, %v4029_v36 }
 0x206   : > { %3656 = vst [vmem:[%s4437_s18 + $0x48] sm:$0xff] %v3599_v59   ;;  %v2648_v62 = vadd.f32 %v2647_v11, %v5674_v61  ;;  %v3594_v57 = vpack.c.bf16 %v5674_v61, %v5662_v34  ;;  %v2554_v9 = vadd.f32 %v4013_v4, %v2553_v40  ;;  %v4032_v60 = vpop.f32.mrf.mxu0  ;;  %v5685_v19 = vadd.f32 %v2562_v39, %v5851_v17  ;;  %v5855_v40 = vld [vmem:[#allocation21_spill] sm:$0xff] }
 0x207   : > { %v4206_v49 = vpop.f32.mrf.mxu1  ;;  %v4028_v59 = vadd.f32 %v4027_v46, %v4026_v31  ;;  %v5857_v46 = vld [vmem:[#allocation24_spill] sm:$0xff] }
 0x208   : > { %v2649_v47 = vadd.f32 %v2648_v62, %v5659_v15  ;;  %3655 = vst [vmem:[%s4437_s18 + $0x40] sm:$0xff] %v3594_v57   ;;  %v2565_v56 = vadd.f32 %v4206_v49, %v4022_v7  ;;  %v4033_v54 = vpop.f32.mrf.mxu0  ;;  %v5688_v33 = vadd.f32 %v2554_v9, %v5852_v30  ;;  %v5856_v57 = vld [vmem:[#allocation19_spill] sm:$0xff] }
 0x209   : > { %v2556_v48 = vpop.f32.mrf.mxu1  ;;  %v4034_v14 = vadd.f32 %v4033_v54, %v4032_v60 }
 0x20a   : > { %v2650_v37 = vadd.f32 %v2649_v47, %v5666_v27  ;;  %v5692_v3 = vadd.f32 %v2565_v56, %v5853_v55  ;;  %v2557_v45 = vadd.f32 %v4016_v26, %v2556_v48  ;;  %v4035_v8 = vpop.f32.mrf.mxu0  ;;  %v5858_v47 = vld [vmem:[#allocation26_spill] sm:$0xff] }
 0x20b   : > { %v4209_v23 = vpop.f32.mrf.mxu1  ;;  %v3910_v56 = vadd.f32 %v5858_v47, %v5857_v46 }
 0x20c   : > { %v2651_v16 = vadd.f32 %v2650_v37, %v5688_v33  ;;  %v3609_v41 = vpack.c.bf16 %v5692_v3, %v5685_v19  ;;  %v5698_v22 = vadd.f32 %v2557_v45, %v5854_v2  ;;  %v4036_v5 = vpop.f32.mrf.mxu0  ;;  %v2578_v6 = vadd.f32 %v4209_v23, %v4031_v42  ;;  %v5859_v37 = vld [vmem:[#allocation20_spill] sm:$0xff]  ;;  %v5860_v2 = vld [vmem:[#allocation11_spill] sm:$0xff] }
 0x20d   : > { %v2569_v44 = vpop.f32.mrf.mxu1  ;;  %v4037_v17 = vadd.f32 %v4036_v5, %v4035_v8 }
 0x20e   : > { %3658 = vst [vmem:[%s4437_s18 + $0x58] sm:$0xff] %v3609_v41   ;;  %v2652_v4 = vadd.f32 %v2651_v16, %v5698_v22  ;;  %v3604_v36 = vpack.c.bf16 %v5698_v22, %v5688_v33  ;;  %v2570_v51 = vadd.f32 %v4025_v35, %v2569_v44  ;;  %v4038_v13 = vpop.f32.mrf.mxu0  ;;  %v5707_v7 = vadd.f32 %v2578_v6, %v5855_v40  ;;  %v5862_v40 = vld [vmem:[#allocation25_spill] sm:$0xff] }
 0x20f   : > { %v4210_v11 = vpop.f32.mrf.mxu1  ;;  %v1921_v6 = vadd.f32 %v3910_v56, %v5860_v2 }
 0x210   : > { %v2653_v29 = vadd.f32 %v2652_v4, %v5685_v19  ;;  %3657 = vst [vmem:[%s4437_s18 + $0x50] sm:$0xff] %v3604_v36   ;;  %v2581_v63 = vadd.f32 %v4210_v11, %v4034_v14  ;;  %v4039_v39 = vpop.f32.mrf.mxu0  ;;  %v5710_v9 = vadd.f32 %v2570_v51, %v5856_v57  ;;  %v5861_v11 = vld [vmem:[#allocation22_spill] sm:$0xff] }
 0x211   : > { %v2572_v62 = vpop.f32.mrf.mxu1  ;;  %v4040_v5 = vadd.f32 %v4039_v39, %v4038_v13 }
 0x212   : > { %v2654_v60 = vadd.f32 %v2653_v29, %v5692_v3  ;;  %v5714_v49 = vadd.f32 %v2581_v63, %v5481_v12  ;;  %v2573_v26 = vadd.f32 %v4028_v59, %v2572_v62  ;;  %v4041_v31 = vpop.f32.mrf.mxu0  ;;  %v5863_v62 = vld [vmem:[#allocation10_spill] sm:$0xff] }
 0x213   : > { %v4213_v54 = vpop.f32.mrf.mxu1  ;;  %v2079_v57 = vadd.f32 %v5863_v62, %v5862_v40 }
 0x214   : > { %v2655_v48 = vadd.f32 %v2654_v60, %v5710_v9  ;;  %v3619_v30 = vpack.c.bf16 %v5714_v49, %v5707_v7  ;;  %v2625_v55 = vadd.f32 %v2573_v26, %v5859_v37  ;;  %v4042_v45 = vpop.f32.mrf.mxu0  ;;  %v5864_v60 = vld [vmem:[#allocation12_spill] sm:$0xff] }
 0x215   : > { %v4043_v42 = vadd.f32 %v4042_v45, %v4041_v31  ;;  %v2585_v23 = vpop.f32.mrf.mxu1  ;;  %v2082_v26 = vadd.f32 %v5864_v60, %v1921_v6  ;;  %v5865_v31 = vld [vmem:[#allocation23_spill] sm:$0xff] }
 0x216   : > { %3660 = vst [vmem:[%s4437_s18 + $0x68] sm:$0xff] %v3619_v30   ;;  %v2656_v12 = vadd.f32 %v2655_v48, %v2625_v55  ;;  %v3614_v35 = vpack.c.bf16 %v2625_v55, %v5710_v9  ;;  %v2586_v16 = vadd.f32 %v4037_v17, %v2585_v23  ;;  %v4044_v41 = vpop.f32.mrf.mxu0 }
 0x217   : > { %v4214_v8 = vpop.f32.mrf.mxu1  ;;  %v2594_v4 = vadd.f32 %v4213_v54, %v4043_v42 }
 0x218   : > { %v2657_v44 = vadd.f32 %v2656_v12, %v5707_v7  ;;  %3659 = vst [vmem:[%s4437_s18 + $0x60] sm:$0xff] %v3614_v35   ;;  %v4045_v14 = vpop.f32.mrf.mxu0  ;;  %v2628_v59 = vadd.f32 %v2586_v16, %v5861_v11 }
 0x219   : > { %v4046_v36 = vadd.f32 %v4045_v14, %v4044_v41  ;;  %v2588_v51 = vpop.f32.mrf.mxu1  ;;  %v2630_v47 = vadd.f32 %v2594_v4, %v2079_v57 }
 0x21a   : > { %v2658_v29 = vadd.f32 %v2657_v44, %v5714_v49  ;;  %v2589_v63 = vadd.f32 %v4040_v5, %v2588_v51 }
 0x21b   : > { %v2597_v13 = vadd.f32 %v4214_v8, %v4046_v36 }
 0x21c   : > { %v2659_v39 = vadd.f32 %v2658_v29, %v2628_v59  ;;  %v2629_v46 = vadd.f32 %v2589_v63, %v5865_v31 }
 0x21d   : > { %v2631_v56 = vadd.f32 %v2597_v13, %v2082_v26 }
 0x21e   : > { %v2660_v54 = vadd.f32 %v2659_v39, %v2629_v46  ;;  %v3624_v17 = vpack.c.bf16 %v2629_v46, %v2628_v59 }
 0x21f   : > { %v3629_v48 = vpack.c.bf16 %v2631_v56, %v2630_v47 }
 0x220   : > { %v2661_v30 = vadd.f32 %v2660_v54, %v2630_v47  ;;  %3661 = vst [vmem:[%s4437_s18 + $0x70] sm:$0xff] %v3624_v17  }
 0x221   : > { %3662 = vst [vmem:[%s4437_s18 + $0x78] sm:$0xff] %v3629_v48  }
 0x222   : > { %v2662_v37 = vadd.f32 %v2661_v30, %v2631_v56 }
 0x224   : > { %v2663_v45 = vrot.slane %v2662_v37, 4 }
 0x226   : > { %v2664_v42 = vadd.f32 %v2663_v45, %v2662_v37 }
 0x228   : > { %v2665_v23 = vrot.slane %v2664_v42, 2 }
 0x22a   : > { %v2666_v12 = vadd.f32 %v2665_v23, %v2664_v42 }
 0x22c   : > { %v2667_v35 = vrot.slane %v2666_v12, 1 }
 0x22e   : > { %v2668_v16 = vadd.f32 %v2667_v35, %v2666_v12 }
 0x230   : > { %v2669_v41 = vmul.f32 0.00390625, %v2668_v16  ;;  %2771 = vst [vmem:[%s323_s12] sm:$0x1] %v2668_v16 }
 0x232   : > { %v2678_v2 = vsub.f32 %v5602_v43, %v2669_v41  ;;  %v2679_v6 = vsub.f32 %v5616_v28, %v2669_v41  ;;  %v2680_v8 = vsub.f32 %v5599_v53, %v2669_v41  ;;  %v2681_v5 = vsub.f32 %v5606_v21, %v2669_v41 }
 0x233   : > { %v2682_v44 = vsub.f32 %v5632_v24, %v2669_v41  ;;  %v2683_v14 = vsub.f32 %v5646_v32, %v2669_v41  ;;  %v2684_v4 = vsub.f32 %v5629_v52, %v2669_v41  ;;  %v2685_v36 = vsub.f32 %v5636_v0, %v2669_v41 }
 0x234   : > { %v2686_v51 = vsub.f32 %v5662_v34, %v2669_v41  ;;  %v2687_v11 = vsub.f32 %v5674_v61, %v2669_v41  ;;  %v2688_v43 = vsub.f32 %v5659_v15, %v2669_v41  ;;  %v2689_v28 = vsub.f32 %v5666_v27, %v2669_v41 }
 0x235   : > { %v2690_v53 = vsub.f32 %v5688_v33, %v2669_v41  ;;  %v2691_v21 = vsub.f32 %v5698_v22, %v2669_v41  ;;  %v2692_v24 = vsub.f32 %v5685_v19, %v2669_v41  ;;  %v2693_v32 = vsub.f32 %v5692_v3, %v2669_v41 }
 0x236   : > { %v2694_v52 = vsub.f32 %v5710_v9, %v2669_v41  ;;  %v5757_v29 = vsub.f32 %v2625_v55, %v2669_v41  ;;  %v5760_v0 = vsub.f32 %v5707_v7, %v2669_v41  ;;  %v5763_v34 = vsub.f32 %v5714_v49, %v2669_v41 }
 0x237   : > { %v5765_v15 = vsub.f32 %v2628_v59, %v2669_v41  ;;  %v5767_v27 = vsub.f32 %v2629_v46, %v2669_v41  ;;  %v5769_v61 = vsub.f32 %v2630_v47, %v2669_v41  ;;  %v5771_v33 = vsub.f32 %v2631_v56, %v2669_v41 }
 0x238   : > { %v2670_v19 = vsub.f32 %v5522_v50, %v2669_v41  ;;  %v2671_v3 = vsub.f32 %v5541_v38, %v2669_v41  ;;  %v2672_v22 = vsub.f32 %v5527_v25, %v2669_v41  ;;  %v2673_v55 = vsub.f32 %v5530_v58, %v2669_v41 }
 0x239   : > { %v2674_v49 = vsub.f32 %v5564_v10, %v2669_v41  ;;  %v2675_v40 = vsub.f32 %v5580_v20, %v2669_v41  ;;  %v2676_v60 = vsub.f32 %v5561_v18, %v2669_v41  ;;  %v2677_v38 = vsub.f32 %v5568_v1, %v2669_v41 }
 0x23a   : > { %v2702_v9 = vmul.f32 %v2670_v19, %v2670_v19  ;;  %v2703_v7 = vmul.f32 %v2671_v3, %v2671_v3  ;;  %v2704_v59 = vmul.f32 %v2672_v22, %v2672_v22  ;;  %v2705_v62 = vmul.f32 %v2673_v55, %v2673_v55 }
 0x23b   : > { %v2706_v26 = vmul.f32 %v2674_v49, %v2674_v49  ;;  %v2707_v13 = vmul.f32 %v2675_v40, %v2675_v40  ;;  %v2708_v39 = vmul.f32 %v2676_v60, %v2676_v60  ;;  %v2709_v46 = vmul.f32 %v2677_v38, %v2677_v38 }
 0x23c   : > { %v2734_v63 = vadd.f32 %v2703_v7, %v2702_v9  ;;  %v2710_v47 = vmul.f32 %v2678_v2, %v2678_v2  ;;  %v2711_v56 = vmul.f32 %v2679_v6, %v2679_v6  ;;  %v2712_v17 = vmul.f32 %v2680_v8, %v2680_v8 }
 0x23d   : > { %v2713_v48 = vmul.f32 %v2681_v5, %v2681_v5  ;;  %v2714_v37 = vmul.f32 %v2682_v44, %v2682_v44  ;;  %v2715_v45 = vmul.f32 %v2683_v14, %v2683_v14  ;;  %v2716_v23 = vmul.f32 %v2684_v4, %v2684_v4 }
 0x23e   : > { %v2735_v57 = vadd.f32 %v2734_v63, %v2704_v59  ;;  %v2717_v12 = vmul.f32 %v2685_v36, %v2685_v36  ;;  %v2718_v16 = vmul.f32 %v2686_v51, %v2686_v51  ;;  %v2719_v19 = vmul.f32 %v2687_v11, %v2687_v11 }
 0x23f   : > { %v2720_v2 = vmul.f32 %v2688_v43, %v2688_v43  ;;  %v2721_v6 = vmul.f32 %v2689_v28, %v2689_v28  ;;  %v2722_v8 = vmul.f32 %v2690_v53, %v2690_v53  ;;  %v2723_v5 = vmul.f32 %v2691_v21, %v2691_v21 }
 0x240   : > { %v2736_v50 = vadd.f32 %v2735_v57, %v2705_v62  ;;  %v2724_v44 = vmul.f32 %v2692_v24, %v2692_v24  ;;  %v2725_v14 = vmul.f32 %v2693_v32, %v2693_v32  ;;  %v2726_v4 = vmul.f32 %v2694_v52, %v2694_v52 }
 0x241   : > { %v2727_v36 = vmul.f32 %v5757_v29, %v5757_v29  ;;  %v2728_v11 = vmul.f32 %v5760_v0, %v5760_v0  ;;  %v2729_v28 = vmul.f32 %v5763_v34, %v5763_v34  ;;  %v2730_v21 = vmul.f32 %v5765_v15, %v5765_v15 }
 0x242   : > { %v2737_v25 = vadd.f32 %v2736_v50, %v2706_v26  ;;  %v2731_v32 = vmul.f32 %v5767_v27, %v5767_v27  ;;  %v2732_v29 = vmul.f32 %v5769_v61, %v5769_v61  ;;  %v2733_v0 = vmul.f32 %v5771_v33, %v5771_v33 }
 0x244   : > { %v2738_v31 = vadd.f32 %v2737_v25, %v2707_v13 }
 0x246   : > { %v2739_v58 = vadd.f32 %v2738_v31, %v2708_v39 }
 0x248   : > { %v2740_v10 = vadd.f32 %v2739_v58, %v2709_v46 }
 0x24a   : > { %v2741_v54 = vadd.f32 %v2740_v10, %v2710_v47 }
 0x24c   : > { %v2742_v20 = vadd.f32 %v2741_v54, %v2711_v56 }
 0x24e   : > { %v2743_v30 = vadd.f32 %v2742_v20, %v2712_v17 }
 0x250   : > { %v2744_v18 = vadd.f32 %v2743_v30, %v2713_v48 }
 0x252   : > { %v2745_v42 = vadd.f32 %v2744_v18, %v2714_v37 }
 0x254   : > { %v2746_v1 = vadd.f32 %v2745_v42, %v2715_v45 }
 0x256   : > { %v2747_v35 = vadd.f32 %v2746_v1, %v2716_v23 }
 0x258   : > { %v2748_v41 = vadd.f32 %v2747_v35, %v2717_v12 }
 0x25a   : > { %v2749_v3 = vadd.f32 %v2748_v41, %v2718_v16 }
 0x25c   : > { %v2750_v22 = vadd.f32 %v2749_v3, %v2719_v19 }
 0x25e   : > { %v2751_v9 = vadd.f32 %v2750_v22, %v2720_v2 }
 0x260   : > { %v2752_v7 = vadd.f32 %v2751_v9, %v2721_v6 }
 0x262   : > { %v2753_v55 = vadd.f32 %v2752_v7, %v2722_v8 }
 0x264   : > { %v2754_v49 = vadd.f32 %v2753_v55, %v2723_v5 }
 0x266   : > { %v2755_v59 = vadd.f32 %v2754_v49, %v2724_v44 }
 0x268   : > { %v2756_v63 = vadd.f32 %v2755_v59, %v2725_v14 }
 0x26a   : > { %v2757_v51 = vadd.f32 %v2756_v63, %v2726_v4 }
 0x26c   : > { %v2758_v43 = vadd.f32 %v2757_v51, %v2727_v36 }
 0x26e   : > { %v2759_v53 = vadd.f32 %v2758_v43, %v2728_v11 }
 0x270   : > { %v2760_v24 = vadd.f32 %v2759_v53, %v2729_v28 }
 0x272   : > { %v2761_v52 = vadd.f32 %v2760_v24, %v2730_v21 }
 0x274   : > { %v2762_v40 = vadd.f32 %v2761_v52, %v2731_v32 }
 0x276   : > { %v2763_v62 = vadd.f32 %v2762_v40, %v2732_v29 }
 0x278   : > { %v2764_v57 = vadd.f32 %v2763_v62, %v2733_v0 }
 0x27a   : > { %v2765_v34 = vrot.slane %v2764_v57, 4 }
 0x27c   : > { %v2766_v60 = vadd.f32 %v2765_v34, %v2764_v57 }
 0x27e   : > { %v2767_v26 = vrot.slane %v2766_v60, 2 }
 0x280   : > { %v2768_v50 = vadd.f32 %v2767_v26, %v2766_v60 }
 0x282   : > { %v2769_v38 = vrot.slane %v2768_v50, 1 }
 0x284   : > { %v2770_v15 = vadd.f32 %v2769_v38, %v2768_v50 }
 0x286   : > { %2772 = vst [vmem:[%s329_s21] sm:$0x1] %v2770_v15 }
 0x287 PF: > { %s18_s26 = sadd.s32 1, %s4356_s26   ;;  %s5866_s24 = smov %s4352_s25 }
 0x288   : > { %p15_p5 = scmp.ge.s32.totalorder %s18_s26, 4   ;;  %s5867_s25 = smov %s5869_s27 }
 0x28a   :  { %17 = sbr.rel (!%p15_p5) target bundleno = 2 (0x2), region = 286 }
 0x28f   :  { %3001 = vsyncmov [#allocation3] }
 0x292   :  { %s3002_s10 = vpop.sfrf %3001 }
 0x293   :  { %p3434_p6 = scmp.ne.s32.totalorder %s3002_s10, 0 }
 0x295   :  { %3006 = shalt.err (%p3434_p6)  }
 0x296   :  { %3008 = vsyncmov [#allocation3 + $0x1] }
 0x299   :  { %s3009_s9 = vpop.sfrf %3008 }
 0x29a   :  { %p3435_p7 = scmp.ne.s32.totalorder %s3009_s9, 0 }
 0x29c   :  { %3013 = shalt.err (%p3435_p7)  }
 0x29d   :  { %3015 = vsyncmov [#allocation3 + $0x2] }
 0x2a0   :  { %s3016_s21 = vpop.sfrf %3015 }
 0x2a1   :  { %p3436_p8 = scmp.ne.s32.totalorder %s3016_s21, 0 }
 0x2a3   :  { %3020 = shalt.err (%p3436_p8)  }
 0x2a4   :  { %3022 = vsyncmov [#allocation3 + $0x3] }
 0x2a7   :  { %s3023_s11 = vpop.sfrf %3022 }
 0x2a8   :  { %p3437_p9 = scmp.ne.s32.totalorder %s3023_s11, 0 }
 0x2aa   :  { %3027 = shalt.err (%p3437_p9)  }

// kernel: unet_up_block.4
= control target key start
LH: loop header
LB: loop body
LE: loop exit
PB: predicated region body
PF: predicated region fallthrough
CT: control target
= control target key end

     0   :  { %s4215_s18 = smov 0   ;;  %s4217_s19 = smov 0   ;;  %s5530_s0 = inlined_call_operand.vmem [shape: bf16[2,16,16,128], index: 0, kind: input, shape index: {}, may-alias: {0,1}]   ;;  %s5531_s1 = inlined_call_operand.vmem [shape: bf16[2,16,16,128], index: 1, kind: input, shape index: {}, may-alias: {0,1}]   ;;  %s5532_s2 = inlined_call_operand.vmem [shape: bf16[3,384,128], index: 2, kind: input, shape index: {}]   ;;  %s5533_s3 = inlined_call_operand.vmem [shape: bf16[2,16,16,128], index: 3, kind: output, shape index: {0}]   ;;  %s5534_s4 = inlined_call_operand.vmem [shape: f32[2,1,1,128], index: 4, kind: output, shape index: {1}]   ;;  %s5535_s5 = inlined_call_operand.vmem [shape: f32[2,1,1,128], index: 5, kind: output, shape index: {2}]  }
   0x1   :  { %s4219_s20 = smov 0  }
   0x2 LB: > { %s28_s21 = sadd.s32 1, %s4178_s19  ;;  %p3083_p0 = scmp.ge.s32.totalorder %s4182_s20, 1  ;;  %s4182_s20 = sphi %s4219_s20, %s16_s20   ;;  %s4178_s19 = sphi %s4217_s19, %s5571_s19   ;;  %s4174_s18 = sphi %s4215_s18, %s5570_s18  }
   0x3   : > { %p30_p1 = scmp.ge.s32.totalorder %s28_s21, 2  ;;  %p194_p2 = scmp.lt.s32.totalorder %s4182_s20, 3 }
   0x5   : > { %s5573_s21 = smov (%p30_p1, %s28_s21), 0  ;;  %p195_p3 = pnand %p3083_p0, %p194_p2 }
   0x7   : > { %198 = sbr.rel (%p195_p3) target bundleno = 646 (0x286), region = 28 }
   0xc   : > { %p243_p4 = scmp.lt.s32.totalorder %s4174_s18, 1  ;;  %s3326_s22 = sshll.u32 %s4174_s18, 7 }
   0xd   : > { %s304_s25 = scalar_lea.vmem %s5531_s1, %s3326_s22 }
   0xe   : > { %s5575_s18 = smov (!%p243_p4, %s4174_s18), 1  ;;  %v4238_v0 = vld [vmem:[%s304_s25] sm:$0xff] }
   0xf   : > { %s3324_s26 = sshll.u32 %s5575_s18, 7  ;;  %s269_s29 = scalar_lea.vmem %s5534_s4, %s5575_s18 }
  0x10   : > { %s4248_s7 = scalar_lea.vmem %s5530_s0, %s3324_s26  ;;  %s4253_s10 = scalar_lea.vmem %s5533_s3, %s3324_s26 }
  0x11   : > { %s275_s13 = scalar_lea.vmem %s5535_s5, %s5575_s18 }
  0x12   : > { %352 = vsyncadd [#allocation3], 128  ;;  %s3328_s14 = sadd.s32 120, %s3326_s22  ;;  %s4184_s23 = smov [#allocation3]  }
  0x13   : > { %s356_s17 = scalar_lea.vmem %s5531_s1, %s3328_s14  ;;  %s2953_s24 = scalar_lea.sflag %s4184_s23, 1 }
  0x14   : > { %v4262_v1 = vld [vmem:[%s356_s17] sm:$0xff] }
  0x15   : > { %404 = vsyncadd %s2953_s24, 128 }
  0x16   : > { %4168 = dma.done.wait [#allocation3], 128 }
  0x17   : > { %4169 = vsyncadd [#allocation3], 4294967168 }
  0x18   : > { %4170 = dma.done.wait %s2953_s24, 128 }
  0x19   : > { %4171 = vsyncadd %s2953_s24, 4294967168  ;;  %v4063_v2 = vld [vmem:[%s5532_s2 + $0x138] sm:$0xff]   ;;  %v4065_v4 = vld [vmem:[%s5532_s2 + $0x130] sm:$0xff]   ;;  %vm833_vm0 = vsmask.f32 256  ;;  %vm832_vm1 = vcmask 1040384  }
  0x1a   : > { %v4064_v3 = vld [vmem:[%s5532_s2 + $0xf8] sm:$0xff]   ;;  %3470 = vmatprep.subr.bf16.mxu0 %v4063_v2  ;;  %4022 = vmatprep.subr.bf16.mxu1 %v4063_v2  ;;  %v4066_v5 = vld [vmem:[%s5532_s2 + $0xf0] sm:$0xff]   ;;  %v4067_v6 = vld [vmem:[%s5532_s2 + $0x128] sm:$0xff]   ;;  %vm908_vm3 = vsmask.f32 7424  ;;  %vm907_vm4 = vcmask 1047552  }
  0x1b   : > { %3471 = vmatpush3.bf16.msra.mxu0 %v4064_v3  ;;  %4030 = vmatpush3.bf16.msra.mxu1 %v4064_v3  ;;  %v4068_v7 = vld [vmem:[%s5532_s2 + $0xe8] sm:$0xff]   ;;  %v4069_v8 = vld [vmem:[%s5532_s2 + $0x120] sm:$0xff]   ;;  %v4071_v10 = vld [vmem:[%s5532_s2 + $0x118] sm:$0xff]  }
  0x1c   : > { %3472 = vmatprep.subr.bf16.mxu0 %v4065_v4  ;;  %4023 = vmatprep.subr.bf16.mxu1 %v4065_v4  ;;  %v4070_v9 = vld [vmem:[%s5532_s2 + $0xe0] sm:$0xff]   ;;  %v4072_v11 = vld [vmem:[%s5532_s2 + $0xd8] sm:$0xff]   ;;  %v4073_v12 = vld [vmem:[%s5532_s2 + $0x110] sm:$0xff]  }
  0x1d   : > { %v4298_v13 = vld [vmem:[%s4248_s7] sm:$0xff]   ;;  %v4074_v16 = vld [vmem:[%s5532_s2 + $0xd0] sm:$0xff]   ;;  %v4075_v18 = vld [vmem:[%s5532_s2 + $0x108] sm:$0xff]  }
  0x1e   : > { %v4301_v14 = vld [vmem:[%s4248_s7 + $0x60] sm:$0xff]   ;;  %1201 = vmatprep.mubr.bf16.mxu0 %v4298_v13  ;;  %v696_v15 = vshrl.u32 %v4298_v13, 16  ;;  %v699_v19 = vshll.u32 %v4298_v13, 16  ;;  %v4076_v20 = vld [vmem:[%s5532_s2 + $0xc8] sm:$0xff]   ;;  %v4081_v30 = vld [vmem:[%s5532_s2 + $0x178] sm:$0xff]  }
  0x1f   : > { %3473 = vmatpush3.bf16.msra.mxu0 %v4066_v5  ;;  %4031 = vmatpush3.bf16.msra.mxu1 %v4066_v5  ;;  %v780_v17 = vshrl.u32 %v4301_v14, 16  ;;  %v4320_v22 = vld [vmem:[%s4248_s7 + $0x8] sm:$0xff]   ;;  %v783_v24 = vshll.u32 %v4301_v14, 16  ;;  %v4077_v27 = vld [vmem:[%s5532_s2 + $0x100] sm:$0xff]   ;;  %vm4342_vm2 = vmand %vm832_vm1, %vm833_vm0 }
  0x20   : > { %3474 = vmatprep.subr.bf16.mxu0 %v4067_v6  ;;  %4024 = vmatprep.subr.bf16.mxu1 %v4067_v6  ;;  %v698_v21 = vrot.slane %v696_v15, 7  ;;  %v4326_v25 = vld [vmem:[%s4248_s7 + $0x68] sm:$0xff]   ;;  %v703_v26 = vshrl.u32 %v4320_v22, 16  ;;  %v4078_v28 = vld [vmem:[%s5532_s2 + $0xc0] sm:$0xff]   ;;  %v706_v31 = vshll.u32 %v4320_v22, 16  ;;  %v4082_v36 = vld [vmem:[%s5532_s2 + $0xb8] sm:$0xff]  }
  0x21   : > { %1297 = vmatprep.mubr.bf16.mxu1 %v4301_v14  ;;  %v782_v23 = vrot.slane %v780_v17, 7  ;;  %v787_v35 = vshrl.u32 %v4326_v25, 16  ;;  %v4359_v38 = vld [vmem:[%s4248_s7 + $0x10] sm:$0xff]   ;;  %v790_v42 = vshll.u32 %v4326_v25, 16  ;;  %v4086_v49 = vld [vmem:[%s5532_s2 + $0x168] sm:$0xff]   ;;  %v4400_v54 = vld [vmem:[%s4248_s7 + $0x18] sm:$0xff]  }
  0x22   : > { %v701_v29 = vor.u32 %v699_v19, %v698_v21  ;;  %v705_v34 = vrot.slane %v703_v26, 7  ;;  %v4371_v43 = vld [vmem:[%s4248_s7 + $0x70] sm:$0xff]   ;;  %v710_v46 = vshrl.u32 %v4359_v38, 16  ;;  %v713_v51 = vshll.u32 %v4359_v38, 16  ;;  %v4096_v52 = vld [vmem:[%s5532_s2 + $0xa8] sm:$0xff]   ;;  %v4405_v56 = vld [vmem:[%s4248_s7 + $0x78] sm:$0xff]  }
  0x23   : > { %3475 = vmatpush3.bf16.msra.mxu0 %v4068_v7  ;;  %4032 = vmatpush3.bf16.msra.mxu1 %v4068_v7  ;;  %v785_v33 = vor.u32 %v783_v24, %v782_v23  ;;  %v789_v41 = vrot.slane %v787_v35, 7  ;;  %v4083_v44 = vld [vmem:[%s5532_s2 + $0x170] sm:$0xff]   ;;  %v794_v50 = vshrl.u32 %v4371_v43, 16  ;;  %v797_v53 = vshll.u32 %v4371_v43, 16  ;;  %v4087_v59 = vld [vmem:[%s5532_s2 + $0x160] sm:$0xff]   ;;  %v4091_v3 = vld [vmem:[%s5532_s2 + $0x158] sm:$0xff]  }
  0x24   : > { %3476 = vmatprep.subr.bf16.mxu0 %v4069_v8  ;;  %4025 = vmatprep.subr.bf16.mxu1 %v4069_v8  ;;  %v4356_v37 = vsel %vm4342_vm2, 0, %v701_v29  ;;  %v708_v40 = vor.u32 %v706_v31, %v705_v34  ;;  %v4088_v45 = vld [vmem:[%s5532_s2 + $0xb0] sm:$0xff]   ;;  %v712_v55 = vrot.slane %v710_v46, 7  ;;  %v717_v60 = vshrl.u32 %v4400_v54, 16  ;;  %v4101_v63 = vld [vmem:[%s5532_s2 + $0xa0] sm:$0xff]   ;;  %vm4477_vm5 = vmand %vm907_vm4, %vm908_vm3 }
  0x25   : > { %v4363_v39 = vsel %vm4342_vm2, 0, %v785_v33  ;;  %v792_v48 = vor.u32 %v790_v42, %v789_v41  ;;  %v796_v58 = vrot.slane %v794_v50, 7  ;;  %v801_v62 = vshrl.u32 %v4405_v56, 16  ;;  %v4097_v34 = vld [vmem:[%s5532_s2 + $0x140] sm:$0xff]  }
  0x26   : > { %v4384_v47 = vsel %vm4342_vm2, 0, %v708_v40  ;;  %v715_v61 = vor.u32 %v713_v51, %v712_v55  ;;  %v720_v4 = vshll.u32 %v4400_v54, 16  ;;  %v719_v6 = vrot.slane %v717_v60, 7 }
  0x27   : > { %3477 = vmatpush3.bf16.msra.mxu0 %v4070_v9  ;;  %4033 = vmatpush3.bf16.msra.mxu1 %v4070_v9  ;;  %v4409_v57 = vsel %vm4342_vm2, 0, %v792_v48  ;;  %v799_v2 = vor.u32 %v797_v53, %v796_v58  ;;  %v803_v7 = vrot.slane %v801_v62, 7  ;;  %v804_v8 = vshll.u32 %v4405_v56, 16  ;;  %v4099_v48 = vld [vmem:[%s5532_s2 + $0x78] sm:$0xff]  }
  0x28   : > { %3478 = vmatprep.subr.bf16.mxu0 %v4071_v10  ;;  %4026 = vmatprep.subr.bf16.mxu1 %v4071_v10  ;;  %v4435_v5 = vsel %vm4342_vm2, 0, %v715_v61  ;;  %v4447_v10 = vld [vmem:[%s4248_s7 + $0x20] sm:$0xff]  }
  0x29   : > { %v4444_v9 = vsel %vm4342_vm2, 0, %v799_v2  ;;  %v806_v21 = vor.u32 %v804_v8, %v803_v7 }
  0x2b   : > { %3479 = vmatpush3.bf16.msra.mxu0 %v4072_v11  ;;  %4034 = vmatpush3.bf16.msra.mxu1 %v4072_v11  ;;  %v4092_v11 = vld [vmem:[%s5532_s2 + $0x150] sm:$0xff]   ;;  %v4489_v29 = vsel %vm4342_vm2, 0, %v806_v21 }
  0x2c   : > { %3480 = vmatprep.subr.bf16.mxu0 %v4073_v12  ;;  %4027 = vmatprep.subr.bf16.mxu1 %v4073_v12  ;;  %v855_v12 = vrot.slane %v699_v19, 1  ;;  %v724_v19 = vshrl.u32 %v4447_v10, 16 }
  0x2e   : > { %v856_v14 = vor.u32 %v855_v12, %v696_v15  ;;  %v726_v33 = vrot.slane %v724_v19, 7  ;;  %v727_v15 = vshll.u32 %v4447_v10, 16  ;;  %v4104_v12 = vld [vmem:[%s5532_s2 + $0x30] sm:$0xff]  }
  0x2f   : > { %3481 = vmatpush3.bf16.msra.mxu0 %v4074_v16  ;;  %4035 = vmatpush3.bf16.msra.mxu1 %v4074_v16  ;;  %v4108_v16 = vld [vmem:[%s5532_s2 + $0x98] sm:$0xff]  }
  0x30   : > { %3482 = vmatprep.subr.bf16.mxu0 %v4075_v18  ;;  %4028 = vmatprep.subr.bf16.mxu1 %v4075_v18  ;;  %v879_v18 = vrot.slane %v783_v24, 1  ;;  %v857_v24 = vrot.slane %v706_v31, 1  ;;  %v4112_v31 = vld [vmem:[%s5532_s2 + $0x90] sm:$0xff]   ;;  %v4505_v40 = vsel %vm4477_vm5, %v856_v14, 0  ;;  %v863_v2 = vrot.slane %v727_v15, 1  ;;  %v4124_v14 = vld [vmem:[%s5532_s2 + $0x80] sm:$0xff]  }
  0x32   : > { %v4467_v23 = vor.u32 %v879_v18, %v780_v17  ;;  %v881_v18 = vrot.slane %v790_v42, 1 }
  0x33   : > { %3483 = vmatpush3.bf16.msra.mxu0 %v4076_v20  ;;  %4036 = vmatpush3.bf16.msra.mxu1 %v4076_v20  ;;  %v722_v20 = vor.u32 %v720_v4, %v719_v6  ;;  %v4121_v6 = vld [vmem:[%s5532_s2 + $0x88] sm:$0xff]  }
  0x34   : > { %3484 = vmatprep.subr.bf16.mxu0 %v4077_v27  ;;  %4029 = vmatprep.subr.bf16.mxu1 %v4077_v27  ;;  %v4095_v27 = vld [vmem:[%s5532_s2 + $0x148] sm:$0xff]  }
  0x35   : > { %v4485_v17 = vsel %vm4342_vm2, 0, %v722_v20  ;;  %v864_v20 = vor.u32 %v863_v2, %v724_v19  ;;  %v883_v19 = vrot.slane %v797_v53, 1 }
  0x37   : > { %3485 = vmatpush3.bf16.msra.mxu0 %v4078_v28  ;;  %4037 = vmatpush3.bf16.msra.mxu1 %v4078_v28  ;;  %v4590_v53 = vor.u32 %v883_v19, %v794_v50 }
  0x38   : > { %3878 = vmatprep.subr.bf16.mxu1 %v4081_v30  ;;  %3926 = vmatprep.subr.bf16.mxu0 %v4082_v36 }
  0x3a   : > { %1202 = vmatmul.mubr.bf16.vlgmr.msra.gmra.mxu0 %v4356_v37  ;;  %1298 = vmatmul.mubr.bf16.vlgmr.msra.gmra.mxu1 %v4363_v39 }
  0x3b   : > { %3879 = vmatpush3.bf16.msra.mxu1 %v4081_v30  ;;  %3927 = vmatpush3.bf16.msra.mxu0 %v4082_v36  ;;  %v4492_v30 = vld [vmem:[%s4248_s7 + $0x28] sm:$0xff]   ;;  %v859_v36 = vrot.slane %v713_v51, 1  ;;  %v861_v51 = vrot.slane %v720_v4, 1 }
  0x3c   : > { %3880 = vmatprep.subr.bf16.mxu1 %v4083_v44  ;;  %1209 = vmatprep.mubr.bf16.mxu0 %v4320_v22  ;;  %v731_v41 = vshrl.u32 %v4492_v30, 16  ;;  %v734_v58 = vshll.u32 %v4492_v30, 16 }
  0x3d   : > { %1305 = vmatprep.mubr.bf16.mxu1 %v4326_v25  ;;  %3928 = vmatprep.subr.bf16.mxu0 %v4088_v45 }
  0x3e   : > { %v733_v55 = vrot.slane %v731_v41, 7 }
  0x3f   : > { %3881 = vmatpush3.bf16.msra.mxu1 %v4083_v44  ;;  %3929 = vmatpush3.bf16.msra.mxu0 %v4088_v45  ;;  %v729_v44 = vor.u32 %v727_v15, %v726_v33  ;;  %v858_v45 = vor.u32 %v857_v24, %v703_v26  ;;  %v4565_v24 = vor.u32 %v881_v18, %v787_v35  ;;  %v4107_v35 = vld [vmem:[%s5532_s2 + $0x28] sm:$0xff]   ;;  %v4586_v15 = vld [vmem:[%s4248_s7 + $0x40] sm:$0xff]   ;;  %v4633_v18 = vld [vmem:[%s4248_s7 + $0x50] sm:$0xff]  }
  0x40   : > { %3882 = vmatprep.subr.bf16.mxu1 %v4086_v49  ;;  %3930 = vmatprep.subr.bf16.mxu0 %v4096_v52  ;;  %v736_v7 = vor.u32 %v734_v58, %v733_v55  ;;  %v755_v50 = vshll.u32 %v4586_v15, 16  ;;  %v769_v19 = vshll.u32 %v4633_v18, 16 }
  0x41   : > { %v4525_v26 = vsel %vm4342_vm2, 0, %v729_v44 }
  0x42   : > { %1210 = vmatmul.mubr.bf16.gmra.mxu0 %v4384_v47  ;;  %1306 = vmatmul.mubr.bf16.gmra.mxu1 %v4409_v57 }
  0x43   : > { %3883 = vmatpush3.bf16.msra.mxu1 %v4086_v49  ;;  %1217 = vmatprep.mubr.bf16.mxu0 %v4359_v38  ;;  %v860_v49 = vor.u32 %v859_v36, %v710_v46  ;;  %v4100_v46 = vld [vmem:[%s5532_s2 + $0x38] sm:$0xff]  }
  0x44   : > { %3884 = vmatprep.subr.bf16.mxu1 %v4087_v59  ;;  %1313 = vmatprep.mubr.bf16.mxu1 %v4371_v43 }
  0x45   : > { %3931 = vmatpush3.bf16.msra.mxu0 %v4096_v52  ;;  %v4520_v52 = vld [vmem:[%s4248_s7 + $0x30] sm:$0xff]   ;;  %v4536_v61 = vsel %vm4477_vm5, %v860_v49, 0  ;;  %v4110_v49 = vld [vmem:[%s5532_s2 + $0x60] sm:$0xff]  }
  0x46   : > { %3932 = vmatprep.subr.bf16.mxu0 %v4101_v63  ;;  %v738_v4 = vshrl.u32 %v4520_v52, 16  ;;  %v741_v21 = vshll.u32 %v4520_v52, 16 }
  0x47   : > { %3885 = vmatpush3.bf16.msra.mxu1 %v4087_v59  ;;  %v4529_v59 = vsel %vm4477_vm5, %v858_v45, 0 }
  0x48   : > { %3886 = vmatprep.subr.bf16.mxu1 %v4091_v3  ;;  %v867_v44 = vrot.slane %v741_v21, 1 }
  0x49   : > { %3933 = vmatpush3.bf16.msra.mxu0 %v4101_v63  ;;  %v4103_v63 = vld [vmem:[%s5532_s2 + $0x70] sm:$0xff]  }
  0x4a   : > { %1218 = vmatmul.mubr.bf16.gmra.mxu0 %v4435_v5  ;;  %1314 = vmatmul.mubr.bf16.gmra.mxu1 %v4444_v9  ;;  %v868_v55 = vor.u32 %v867_v44, %v738_v4 }
  0x4b   : > { %3887 = vmatpush3.bf16.msra.mxu1 %v4091_v3  ;;  %1225 = vmatprep.mubr.bf16.mxu0 %v4400_v54  ;;  %v4542_v3 = vld [vmem:[%s4248_s7 + $0x38] sm:$0xff]  }
  0x4c   : > { %3888 = vmatprep.subr.bf16.mxu1 %v4092_v11  ;;  %1321 = vmatprep.mubr.bf16.mxu1 %v4405_v56  ;;  %v745_v42 = vshrl.u32 %v4542_v3, 16  ;;  %v748_v33 = vshll.u32 %v4542_v3, 16 }
  0x4d   : > { %3934 = vmatprep.subr.bf16.mxu0 %v4108_v16 }
  0x4e   : > { %3935 = vmatpush3.bf16.msra.mxu0 %v4108_v16  ;;  %v865_v16 = vrot.slane %v734_v58, 1  ;;  %v869_v43 = vrot.slane %v748_v33, 1  ;;  %v4111_v58 = vld [vmem:[%s5532_s2 + $0x20] sm:$0xff]  }
  0x4f   : > { %3889 = vmatpush3.bf16.msra.mxu1 %v4092_v11  ;;  %3936 = vmatprep.subr.bf16.mxu0 %v4112_v31  ;;  %v862_v11 = vor.u32 %v861_v51, %v717_v60  ;;  %v4106_v60 = vld [vmem:[%s5532_s2 + $0x68] sm:$0xff]   ;;  %v4128_v51 = vld [vmem:[%s5532_s2 + $0x1f8] sm:$0xff]  }
  0x50   : > { %3890 = vmatprep.subr.bf16.mxu1 %v4095_v27  ;;  %v866_v36 = vor.u32 %v865_v16, %v731_v41  ;;  %v4630_v16 = vsel %vm4477_vm5, %v868_v55, 0  ;;  %v4125_v55 = vld [vmem:[%s5532_s2 + $0x40] sm:$0xff]  }
  0x51   : > { %v4579_v25 = vsel %vm4477_vm5, %v862_v11, 0  ;;  %v871_v11 = vrot.slane %v755_v50, 1 }
  0x52   : > { %1226 = vmatmul.mubr.bf16.gmra.mxu0 %v4485_v17  ;;  %1322 = vmatmul.mubr.bf16.gmra.mxu1 %v4489_v29  ;;  %v4609_v41 = vsel %vm4477_vm5, %v866_v36, 0  ;;  %v4122_v36 = vld [vmem:[%s5532_s2 + $0x48] sm:$0xff]  }
  0x53   : > { %3891 = vmatpush3.bf16.msra.mxu1 %v4095_v27  ;;  %1233 = vmatprep.mubr.bf16.mxu0 %v4447_v10  ;;  %v740_v27 = vrot.slane %v738_v4, 7  ;;  %v870_v4 = vor.u32 %v869_v43, %v745_v42  ;;  %v4123_v43 = vld [vmem:[%s5532_s2 + $0x8] sm:$0xff]  }
  0x54   : > { %3892 = vmatprep.subr.bf16.mxu1 %v4097_v34  ;;  %3894 = vmatprep.mubr.bf16.mxu1 %v4505_v40 }
  0x55   : > { %3937 = vmatpush3.bf16.msra.mxu0 %v4112_v31  ;;  %v4575_v31 = vsel %vm4342_vm2, 0, %v736_v7  ;;  %v743_v45 = vor.u32 %v741_v21, %v740_v27  ;;  %v4623_v7 = vld [vmem:[%s4248_s7 + $0x48] sm:$0xff]   ;;  %v4649_v27 = vsel %vm4477_vm5, %v870_v4, 0  ;;  %v4126_v4 = vld [vmem:[%s5532_s2] sm:$0xff]  }
  0x56   : > { %3938 = vmatprep.subr.bf16.mxu0 %v4121_v6 }
  0x57   : > { %3893 = vmatpush3.bf16.msra.mxu1 %v4097_v34  ;;  %v4594_v34 = vsel %vm4477_vm5, %v864_v20, 0  ;;  %v4119_v20 = vld [vmem:[%s5532_s2 + $0x50] sm:$0xff]  }
  0x58   : > { %3606 = vmatprep.subr.bf16.mxu1 %v4099_v48  ;;  %v747_v48 = vrot.slane %v745_v42, 7 }
  0x59   : > { %3939 = vmatpush3.bf16.msra.mxu0 %v4121_v6  ;;  %v752_v6 = vshrl.u32 %v4586_v15, 16 }
  0x5a   : > { %1234 = vmatmul.mubr.bf16.gmra.mxu0 %v4525_v26  ;;  %3895 = vmatmul.mubr.bf16.vlgmr.msra.gmra.mxu1 %v4529_v59  ;;  %v750_v2 = vor.u32 %v748_v33, %v747_v48 }
  0x5b   : > { %3607 = vmatpush3.bf16.msra.mxu1 %v4100_v46  ;;  %1241 = vmatprep.mubr.bf16.mxu0 %v4492_v30  ;;  %v4616_v46 = vsel %vm4342_vm2, 0, %v743_v45  ;;  %v872_v42 = vor.u32 %v871_v11, %v752_v6  ;;  %v754_v33 = vrot.slane %v752_v6, 7  ;;  %v4660_v45 = vld [vmem:[%s4248_s7 + $0x58] sm:$0xff]  }
  0x5c   : > { %3898 = vmatprep.mubr.bf16.mxu1 %v4536_v61  ;;  %3608 = vmatprep.subr.bf16.mxu1 %v4103_v63  ;;  %v4115_v63 = vld [vmem:[%s5532_s2 + $0x58] sm:$0xff]   ;;  %v4642_v21 = vsel %vm4342_vm2, 0, %v750_v2  ;;  %v776_v2 = vshll.u32 %v4660_v45, 16 }
  0x5d   : > { %3940 = vmatprep.subr.bf16.mxu0 %v4124_v14  ;;  %v4664_v48 = vsel %vm4477_vm5, %v872_v42, 0 }
  0x5e   : > { %3941 = vmatpush3.bf16.msra.mxu0 %v4124_v14  ;;  %v759_v14 = vshrl.u32 %v4623_v7, 16 }
  0x5f   : > { %3609 = vmatpush3.bf16.msra.mxu1 %v4104_v12  ;;  %3742 = vmatprep.subr.bf16.mxu0 %v4128_v51  ;;  %v4116_v12 = vld [vmem:[%s5532_s2 + $0x18] sm:$0xff]   ;;  %v875_v51 = vrot.slane %v769_v19, 1 }
  0x60   : > { %3610 = vmatprep.subr.bf16.mxu1 %v4106_v60  ;;  %v762_v60 = vshll.u32 %v4623_v7, 16  ;;  %v761_v11 = vrot.slane %v759_v14, 7 }
  0x62   : > { %1242 = vmatmul.mubr.bf16.gmra.mxu0 %v4575_v31  ;;  %3899 = vmatmul.mubr.bf16.gmra.mxu1 %v4579_v25  ;;  %v873_v44 = vrot.slane %v762_v60, 1 }
  0x63   : > { %1249 = vmatprep.mubr.bf16.mxu0 %v4520_v52  ;;  %3902 = vmatprep.mubr.bf16.mxu1 %v4594_v34 }
  0x64   : > { %3611 = vmatpush3.bf16.msra.mxu1 %v4107_v35  ;;  %v4120_v35 = vld [vmem:[%s5532_s2 + $0x10] sm:$0xff]  }
  0x65   : > { %3612 = vmatprep.subr.bf16.mxu1 %v4110_v49  ;;  %v766_v49 = vshrl.u32 %v4633_v18, 16 }
  0x67   : > { %v876_v6 = vor.u32 %v875_v51, %v766_v49 }
  0x68   : > { %3613 = vmatpush3.bf16.msra.mxu1 %v4111_v58  ;;  %v757_v58 = vor.u32 %v755_v50, %v754_v33 }
  0x69   : > { %3614 = vmatprep.subr.bf16.mxu1 %v4115_v63  ;;  %v874_v63 = vor.u32 %v873_v44, %v759_v14  ;;  %v4695_v33 = vsel %vm4477_vm5, %v876_v6, 0  ;;  %v3367_v14 = vunpack.c.l.bf16 %v4238_v0  ;;  %v764_v44 = vor.u32 %v762_v60, %v761_v11 }
  0x6a   : > { %1250 = vmatmul.mubr.bf16.gmra.mxu0 %v4616_v46  ;;  %3903 = vmatmul.mubr.bf16.gmra.mxu1 %v4609_v41  ;;  %v4686_v50 = vsel %vm4342_vm2, 0, %v757_v58  ;;  %v4714_v6 = vsel %vm4477_vm5, %v4467_v23, 0  ;;  %v4727_v23 = vsel %vm4477_vm5, %v4565_v24, 0 }
  0x6b   : > { %1257 = vmatprep.mubr.bf16.mxu0 %v4542_v3  ;;  %3906 = vmatprep.mubr.bf16.mxu1 %v4630_v16  ;;  %v4691_v42 = vsel %vm4477_vm5, %v874_v63, 0  ;;  %v4705_v58 = vsel %vm4342_vm2, 0, %v764_v44  ;;  %v768_v63 = vrot.slane %v766_v49, 7 }
  0x6c   : > { %3615 = vmatpush3.bf16.msra.mxu1 %v4116_v12  ;;  %v4127_v12 = vld [vmem:[%s5532_s2 + $0x238] sm:$0xff]  }
  0x6d   : > { %3616 = vmatprep.subr.bf16.mxu1 %v4119_v20  ;;  %v773_v20 = vshrl.u32 %v4660_v45, 16  ;;  %v771_v60 = vor.u32 %v769_v19, %v768_v63  ;;  %v4130_v63 = vld [vmem:[%s5532_s2 + $0x1f0] sm:$0xff]  }
  0x6f   : > { %v775_v49 = vrot.slane %v773_v20, 7 }
  0x70   : > { %3617 = vmatpush3.bf16.msra.mxu1 %v4120_v35  ;;  %v877_v35 = vrot.slane %v776_v2, 1 }
  0x71   : > { %3618 = vmatprep.subr.bf16.mxu1 %v4122_v36  ;;  %v3368_v36 = vunpack.c.h.bf16 %v4238_v0  ;;  %v778_v24 = vor.u32 %v776_v2, %v775_v49  ;;  %v4129_v2 = vld [vmem:[%s5532_s2 + $0x1b8] sm:$0xff]   ;;  %v4137_v49 = vld [vmem:[%s5532_s2 + $0x228] sm:$0xff]  }
  0x72   : > { %1258 = vmatmul.mubr.bf16.gmra.mxu0 %v4642_v21  ;;  %3907 = vmatmul.mubr.bf16.gmra.mxu1 %v4649_v27  ;;  %v878_v51 = vor.u32 %v877_v35, %v773_v20  ;;  %v4722_v35 = vsel %vm4342_vm2, 0, %v771_v60  ;;  %v4132_v60 = vld [vmem:[%s5532_s2 + $0x230] sm:$0xff]  }
  0x73   : > { %1265 = vmatprep.mubr.bf16.mxu0 %v4586_v15  ;;  %3910 = vmatprep.mubr.bf16.mxu1 %v4664_v48 }
  0x74   : > { %3619 = vmatpush3.bf16.msra.mxu1 %v4123_v43  ;;  %v580_v43 = vmul.f32 0.0, %v3367_v14  ;;  %v4709_v0 = vsel %vm4477_vm5, %v878_v51, 0  ;;  %v885_v14 = vrot.slane %v804_v8, 1  ;;  %v4744_v51 = vsel %vm4342_vm2, 0, %v778_v24  ;;  %v4148_v24 = vld [vmem:[%s5532_s2 + $0x210] sm:$0xff]  }
  0x75   : > { %3620 = vmatprep.subr.bf16.mxu1 %v4125_v55  ;;  %v581_v55 = vmul.f32 0.0, %v3368_v36  ;;  %v4734_v36 = vsel %vm4477_vm5, %v4590_v53, 0 }
  0x76   : > { %v886_v20 = vor.u32 %v885_v14, %v801_v62  ;;  %v4136_v14 = vld [vmem:[%s5532_s2 + $0x1a0] sm:$0xff]  }
  0x78   : > { %3621 = vmatpush3.bf16.msra.mxu1 %v4126_v4  ;;  %v582_v4 = vpack.c.bf16 %v581_v55, %v580_v43  ;;  %v4748_v53 = vsel %vm4477_vm5, %v886_v20, 0  ;;  %v4141_v20 = vld [vmem:[%s5532_s2 + $0x190] sm:$0xff]  }
  0x79   : > { %3974 = vmatprep.subr.bf16.mxu1 %v4127_v12 }
  0x7a   : > { %1266 = vmatmul.mubr.bf16.gmra.mxu0 %v4686_v50  ;;  %3911 = vmatmul.mubr.bf16.gmra.mxu1 %v4691_v42  ;;  %v692_v11 = vshll.u32 %v582_v4, 16  ;;  %v689_v19 = vshrl.u32 %v582_v4, 16 }
  0x7b   : > { %1273 = vmatprep.mubr.bf16.mxu0 %v4623_v7  ;;  %3914 = vmatprep.mubr.bf16.mxu1 %v4695_v33 }
  0x7c   : > { %v853_v44 = vrot.slane %v692_v11, 1  ;;  %v691_v43 = vrot.slane %v689_v19, 7 }
  0x7e   : > { %v854_v8 = vor.u32 %v853_v44, %v689_v19  ;;  %v694_v56 = vor.u32 %v692_v11, %v691_v43  ;;  %v4133_v11 = vld [vmem:[%s5532_s2 + $0x1e8] sm:$0xff]   ;;  %v4138_v19 = vld [vmem:[%s5532_s2 + $0x1d8] sm:$0xff]   ;;  %v4140_v44 = vld [vmem:[%s5532_s2 + $0x1d0] sm:$0xff]  }
  0x7f   : > { %v4149_v43 = vld [vmem:[%s5532_s2 + $0x208] sm:$0xff]  }
  0x80   : > { %v910_v55 = vsel %vm4477_vm5, %v854_v8, 0  ;;  %v835_v62 = vsel %vm4342_vm2, 0, %v694_v56  ;;  %v4143_v8 = vld [vmem:[%s5532_s2 + $0x1c8] sm:$0xff]   ;;  %v4145_v56 = vld [vmem:[%s5532_s2 + $0x1c0] sm:$0xff]  }
  0x82   : > { %1274 = vmatmul.mubr.bf16.gmra.mxu0 %v4705_v58  ;;  %3915 = vmatmul.mubr.bf16.gmra.mxu1 %v4709_v0 }
  0x83   : > { %1281 = vmatprep.mubr.bf16.mxu0 %v4633_v18  ;;  %3918 = vmatprep.mubr.bf16.mxu1 %v4714_v6 }
  0x8a   : > { %1282 = vmatmul.mubr.bf16.gmra.mxu0 %v4722_v35  ;;  %3919 = vmatmul.mubr.bf16.gmra.mxu1 %v4727_v23 }
  0x8b   : > { %1289 = vmatprep.mubr.bf16.mxu0 %v4660_v45  ;;  %3922 = vmatprep.mubr.bf16.mxu1 %v4734_v36 }
  0x92   : > { %1290 = vmatmul.mubr.bf16.gmra.mxu0 %v4744_v51  ;;  %3923 = vmatmul.mubr.bf16.gmra.mxu1 %v4748_v53 }
  0x93   : > { %1667 = vmatprep.mubr.bf16.mxu1 %v582_v4  ;;  %3942 = vmatprep.mubr.bf16.mxu0 %v910_v55  ;;  %v4131_v4 = vld [vmem:[%s5532_s2 + $0x1b0] sm:$0xff]   ;;  %v4144_v55 = vld [vmem:[%s5532_s2 + $0x188] sm:$0xff]  }
  0x9a   : > { %1668 = vmatmul.mubr.bf16.vlgmr.msra.gmra.mxu1 %v835_v62  ;;  %3943 = vmatmul.mubr.bf16.vlgmr.msra.gmra.mxu0 %v4505_v40  ;;  %v4134_v40 = vld [vmem:[%s5532_s2 + $0x1a8] sm:$0xff]   ;;  %v4150_v62 = vld [vmem:[%s5532_s2 + $0x200] sm:$0xff]  }
  0x9b   : > { %3975 = vmatpush3.bf16.msra.mxu1 %v4127_v12  ;;  %3743 = vmatpush3.bf16.msra.mxu0 %v4129_v2  ;;  %v4142_v12 = vld [vmem:[%s5532_s2 + $0x220] sm:$0xff]  }
  0x9c   : > { %1675 = vmatprep.mubr.bf16.mxu1 %v4298_v13  ;;  %3946 = vmatprep.mubr.bf16.mxu0 %v4529_v59  ;;  %v4135_v13 = vld [vmem:[%s5532_s2 + $0x1e0] sm:$0xff]  }
  0x9d   : > { %3744 = vmatprep.subr.bf16.mxu0 %v4130_v63  ;;  %3976 = vmatprep.subr.bf16.mxu1 %v4132_v60  ;;  %v4146_v2 = vld [vmem:[%s5532_s2 + $0x180] sm:$0xff]   ;;  %v4151_v63 = vld [vmem:[%s4248_s7 + $0x8] sm:$0xff]  }
  0x9f   : > { %3745 = vmatpush3.bf16.msra.mxu0 %v4131_v4  ;;  %3977 = vmatpush3.bf16.msra.mxu1 %v4132_v60 }
  0xa0   : > { %3746 = vmatprep.subr.bf16.mxu0 %v4133_v11  ;;  %3978 = vmatprep.subr.bf16.mxu1 %v4137_v49 }
  0xa2   : > { %1676 = vmatmul.mubr.bf16.gmra.mxu1 %v4356_v37  ;;  %3947 = vmatmul.mubr.bf16.gmra.mxu0 %v4536_v61  ;;  %v4147_v37 = vld [vmem:[%s5532_s2 + $0x218] sm:$0xff]  }
  0xa3   : > { %1683 = vmatprep.mubr.bf16.mxu1 %v4320_v22  ;;  %3950 = vmatprep.mubr.bf16.mxu0 %v4579_v25  ;;  %v4139_v22 = vld [vmem:[%s5532_s2 + $0x198] sm:$0xff]  }
  0xa4   : > { %3747 = vmatpush3.bf16.msra.mxu0 %v4134_v40  ;;  %3979 = vmatpush3.bf16.msra.mxu1 %v4137_v49 }
  0xa5   : > { %3748 = vmatprep.subr.bf16.mxu0 %v4135_v13  ;;  %3980 = vmatprep.subr.bf16.mxu1 %v4142_v12 }
  0xa8   : > { %3749 = vmatpush3.bf16.msra.mxu0 %v4136_v14  ;;  %3981 = vmatpush3.bf16.msra.mxu1 %v4142_v12 }
  0xa9   : > { %3750 = vmatprep.subr.bf16.mxu0 %v4138_v19  ;;  %3982 = vmatprep.subr.bf16.mxu1 %v4147_v37 }
  0xaa   : > { %1684 = vmatmul.mubr.bf16.gmra.mxu1 %v4384_v47  ;;  %3951 = vmatmul.mubr.bf16.gmra.mxu0 %v4594_v34 }
  0xab   : > { %1691 = vmatprep.mubr.bf16.mxu1 %v4359_v38  ;;  %3954 = vmatprep.mubr.bf16.mxu0 %v4609_v41 }
  0xac   : > { %3751 = vmatpush3.bf16.msra.mxu0 %v4139_v22  ;;  %3983 = vmatpush3.bf16.msra.mxu1 %v4147_v37 }
  0xad   : > { %3752 = vmatprep.subr.bf16.mxu0 %v4140_v44  ;;  %3984 = vmatprep.subr.bf16.mxu1 %v4148_v24 }
  0xb0   : > { %3753 = vmatpush3.bf16.msra.mxu0 %v4141_v20  ;;  %3985 = vmatpush3.bf16.msra.mxu1 %v4148_v24 }
  0xb1   : > { %3754 = vmatprep.subr.bf16.mxu0 %v4143_v8  ;;  %3986 = vmatprep.subr.bf16.mxu1 %v4149_v43 }
  0xb2   : > { %1692 = vmatmul.mubr.bf16.gmra.mxu1 %v4435_v5  ;;  %3955 = vmatmul.mubr.bf16.gmra.mxu0 %v4630_v16 }
  0xb3   : > { %1699 = vmatprep.mubr.bf16.mxu1 %v4400_v54  ;;  %3958 = vmatprep.mubr.bf16.mxu0 %v4649_v27 }
  0xb4   : > { %3755 = vmatpush3.bf16.msra.mxu0 %v4144_v55  ;;  %3987 = vmatpush3.bf16.msra.mxu1 %v4149_v43 }
  0xb5   : > { %3756 = vmatprep.subr.bf16.mxu0 %v4145_v56  ;;  %3988 = vmatprep.subr.bf16.mxu1 %v4150_v62  ;;  %v4898_v56 = vld [vmem:[%s4248_s7 + $0x70] sm:$0xff]  }
  0xb8   : > { %3757 = vmatpush3.bf16.msra.mxu0 %v4146_v2  ;;  %3989 = vmatpush3.bf16.msra.mxu1 %v4150_v62 }
  0xba   : > { %1700 = vmatmul.mubr.bf16.gmra.mxu1 %v4485_v17  ;;  %3959 = vmatmul.mubr.bf16.gmra.mxu0 %v4664_v48 }
  0xbb   : > { %1707 = vmatprep.mubr.bf16.mxu1 %v4447_v10  ;;  %3962 = vmatprep.mubr.bf16.mxu0 %v4691_v42 }
  0xc2   : > { %1708 = vmatmul.mubr.bf16.gmra.mxu1 %v4525_v26  ;;  %3963 = vmatmul.mubr.bf16.gmra.mxu0 %v4695_v33 }
  0xc3   : > { %1715 = vmatprep.mubr.bf16.mxu1 %v4492_v30  ;;  %3966 = vmatprep.mubr.bf16.mxu0 %v4709_v0 }
  0xca   : > { %1716 = vmatmul.mubr.bf16.gmra.mxu1 %v4575_v31  ;;  %3967 = vmatmul.mubr.bf16.gmra.mxu0 %v4714_v6 }
  0xcb   : > { %1723 = vmatprep.mubr.bf16.mxu1 %v4520_v52  ;;  %3970 = vmatprep.mubr.bf16.mxu0 %v4727_v23 }
  0xd2   : > { %1724 = vmatmul.mubr.bf16.gmra.mxu1 %v4616_v46  ;;  %3971 = vmatmul.mubr.bf16.gmra.mxu0 %v4734_v36 }
  0xd3   : > { %1731 = vmatprep.mubr.bf16.mxu1 %v4542_v3  ;;  %2182 = vmatprep.mubr.bf16.mxu0 %v4151_v63 }
  0xda   : > { %1732 = vmatmul.mubr.bf16.gmra.mxu1 %v4642_v21  ;;  %2183 = vmatmul.mubr.bf16.vlgmr.msra.gmra.mxu0 %v4384_v47 }
  0xdb   : > { %1739 = vmatprep.mubr.bf16.mxu1 %v4586_v15  ;;  %2190 = vmatprep.mubr.bf16.mxu0 %v4359_v38 }
  0xe2   : > { %1740 = vmatmul.mubr.bf16.gmra.mxu1 %v4686_v50  ;;  %2191 = vmatmul.mubr.bf16.gmra.mxu0 %v4435_v5 }
  0xe3   : > { %1747 = vmatprep.mubr.bf16.mxu1 %v4623_v7  ;;  %2198 = vmatprep.mubr.bf16.mxu0 %v4400_v54  ;;  %v4872_v54 = vld [vmem:[%s4248_s7 + $0x60] sm:$0xff]  }
  0xea   : > { %1748 = vmatmul.mubr.bf16.gmra.mxu1 %v4705_v58  ;;  %2199 = vmatmul.mubr.bf16.gmra.mxu0 %v4485_v17 }
  0xeb   : > { %1755 = vmatprep.mubr.bf16.mxu1 %v4633_v18  ;;  %2206 = vmatprep.mubr.bf16.mxu0 %v4447_v10 }
  0xf2   : > { %1756 = vmatmul.mubr.bf16.gmra.mxu1 %v4722_v35  ;;  %2207 = vmatmul.mubr.bf16.gmra.mxu0 %v4525_v26 }
  0xf3   : > { %1763 = vmatprep.mubr.bf16.mxu1 %v4660_v45  ;;  %2214 = vmatprep.mubr.bf16.mxu0 %v4492_v30 }
  0xfa   : > { %v3486_v38 = vpop.f32.mrf.mxu0  ;;  %v3558_v47 = vpop.f32.mrf.mxu1  ;;  %1764 = vmatmul.mubr.bf16.gmra.mxu1 %v4744_v51  ;;  %2215 = vmatmul.mubr.bf16.gmra.mxu0 %v4575_v31 }
  0xfb   : > { %1771 = vmatprep.mubr.bf16.mxu1 %v4872_v54  ;;  %2222 = vmatprep.mubr.bf16.mxu0 %v4520_v52  ;;  %v4887_v52 = vld [vmem:[%s4248_s7 + $0x68] sm:$0xff]  }
  0xfc   : > { %v3487_v5 = vpop.f32.mrf.mxu0  ;;  %v3559_v10 = vpop.f32.mrf.mxu1 }
  0xfd   : > { %v4876_v17 = vadd.f32 %v3487_v5, %v3486_v38  ;;  %v4878_v26 = vadd.f32 %v3559_v10, %v3558_v47 }
  0xfe   : > { %v3489_v30 = vpop.f32.mrf.mxu0  ;;  %v3561_v60 = vpop.f32.mrf.mxu1 }
 0x100   : > { %v3490_v4 = vpop.f32.mrf.mxu0  ;;  %v3562_v11 = vpop.f32.mrf.mxu1 }
 0x101   : > { %v4880_v49 = vadd.f32 %v3490_v4, %v3489_v30  ;;  %v4882_v31 = vadd.f32 %v3562_v11, %v3561_v60 }
 0x102   : > { %v3492_v40 = vpop.f32.mrf.mxu0  ;;  %v3564_v13 = vpop.f32.mrf.mxu1  ;;  %1772 = vmatmul.mubr.bf16.gmra.mxu1 %v4363_v39  ;;  %2223 = vmatmul.mubr.bf16.gmra.mxu0 %v4616_v46 }
 0x103   : > { %1779 = vmatprep.mubr.bf16.mxu1 %v4887_v52  ;;  %2230 = vmatprep.mubr.bf16.mxu0 %v4542_v3 }
 0x104   : > { %v3493_v12 = vpop.f32.mrf.mxu0  ;;  %v3565_v14 = vpop.f32.mrf.mxu1 }
 0x105   : > { %v3494_v19 = vadd.f32 %v3493_v12, %v3492_v40  ;;  %v4891_v37 = vadd.f32 %v3565_v14, %v3564_v13 }
 0x106   : > { %v3495_v22 = vpop.f32.mrf.mxu0  ;;  %v3567_v44 = vpop.f32.mrf.mxu1 }
 0x108   : > { %v3496_v24 = vpop.f32.mrf.mxu0  ;;  %v3568_v20 = vpop.f32.mrf.mxu1 }
 0x109   : > { %v3497_v8 = vadd.f32 %v3496_v24, %v3495_v22  ;;  %v4893_v43 = vadd.f32 %v3568_v20, %v3567_v44 }
 0x10a   : > { %v3498_v46 = vpop.f32.mrf.mxu0  ;;  %v3570_v55 = vpop.f32.mrf.mxu1  ;;  %1780 = vmatmul.mubr.bf16.gmra.mxu1 %v4409_v57  ;;  %2231 = vmatmul.mubr.bf16.gmra.mxu0 %v4642_v21 }
 0x10b   : > { %1787 = vmatprep.mubr.bf16.mxu1 %v4898_v56  ;;  %2238 = vmatprep.mubr.bf16.mxu0 %v4586_v15 }
 0x10c   : > { %v3499_v3 = vpop.f32.mrf.mxu0  ;;  %v3571_v62 = vpop.f32.mrf.mxu1 }
 0x10d   : > { %v3500_v2 = vadd.f32 %v3499_v3, %v3498_v46  ;;  %v4902_v63 = vadd.f32 %v3571_v62, %v3570_v55 }
 0x10e   : > { %v3501_v38 = vpop.f32.mrf.mxu0  ;;  %v3573_v47 = vpop.f32.mrf.mxu1 }
 0x110   : > { %v3502_v5 = vpop.f32.mrf.mxu0  ;;  %v3574_v10 = vpop.f32.mrf.mxu1 }
 0x111   : > { %v3503_v30 = vadd.f32 %v3502_v5, %v3501_v38  ;;  %v4904_v60 = vadd.f32 %v3574_v10, %v3573_v47 }
 0x112   : > { %v3504_v4 = vpop.f32.mrf.mxu0  ;;  %v3576_v21 = vpop.f32.mrf.mxu1  ;;  %1788 = vmatmul.mubr.bf16.gmra.mxu1 %v4444_v9  ;;  %2239 = vmatmul.mubr.bf16.gmra.mxu0 %v4686_v50 }
 0x113   : > { %2246 = vmatprep.mubr.bf16.mxu0 %v4623_v7  ;;  %3990 = vmatprep.mubr.bf16.mxu1 %v4529_v59 }
 0x114   : > { %v3505_v15 = vpop.f32.mrf.mxu0  ;;  %v3577_v11 = vpop.f32.mrf.mxu1 }
 0x115   : > { %v3506_v40 = vadd.f32 %v3505_v15, %v3504_v4  ;;  %v4910_v13 = vadd.f32 %v3577_v11, %v3576_v21 }
 0x116   : > { %v3507_v12 = vpop.f32.mrf.mxu0  ;;  %v3579_v14 = vpop.f32.mrf.mxu1 }
 0x118   : > { %v3508_v22 = vpop.f32.mrf.mxu0  ;;  %v3580_v44 = vpop.f32.mrf.mxu1 }
 0x119   : > { %v3509_v24 = vadd.f32 %v3508_v22, %v3507_v12  ;;  %v4912_v20 = vadd.f32 %v3580_v44, %v3579_v14 }
 0x11a   : > { %v3510_v46 = vpop.f32.mrf.mxu0  ;;  %v3896_v55 = vpop.f32.mrf.mxu1  ;;  %2247 = vmatmul.mubr.bf16.gmra.mxu0 %v4705_v58  ;;  %3991 = vmatmul.mubr.bf16.vlgmr.msra.gmra.mxu1 %v4536_v61 }
 0x11b   : > { %v4916_v7 = vadd.f32 %v3896_v55, %v3494_v19  ;;  %2254 = vmatprep.mubr.bf16.mxu0 %v4633_v18  ;;  %3994 = vmatprep.mubr.bf16.mxu1 %v4579_v25 }
 0x11c   : > { %v3511_v59 = vpop.f32.mrf.mxu0  ;;  %v1364_v50 = vpop.f32.mrf.mxu1 }
 0x11d   : > { %v3512_v3 = vadd.f32 %v3511_v59, %v3510_v46  ;;  %v4921_v62 = vadd.f32 %v4876_v17, %v1364_v50 }
 0x11e   : > { %v3513_v38 = vpop.f32.mrf.mxu0  ;;  %v3897_v47 = vpop.f32.mrf.mxu1 }
 0x11f   : > { %v4923_v5 = vadd.f32 %v3897_v47, %v3497_v8 }
 0x120   : > { %v3514_v10 = vpop.f32.mrf.mxu0  ;;  %v1367_v58 = vpop.f32.mrf.mxu1 }
 0x121   : > { %v3515_v4 = vadd.f32 %v3514_v10, %v3513_v38  ;;  %v4926_v61 = vadd.f32 %v4880_v49, %v1367_v58 }
 0x122   : > { %v3516_v19 = vpop.f32.mrf.mxu0  ;;  %v3900_v18 = vpop.f32.mrf.mxu1  ;;  %2255 = vmatmul.mubr.bf16.gmra.mxu0 %v4722_v35  ;;  %3995 = vmatmul.mubr.bf16.gmra.mxu1 %v4594_v34 }
 0x123   : > { %v4930_v25 = vadd.f32 %v3900_v18, %v3506_v40  ;;  %2262 = vmatprep.mubr.bf16.mxu0 %v4660_v45  ;;  %3998 = vmatprep.mubr.bf16.mxu1 %v4609_v41 }
 0x124   : > { %v3517_v17 = vpop.f32.mrf.mxu0  ;;  %v1380_v8 = vpop.f32.mrf.mxu1 }
 0x125   : > { %v3518_v21 = vadd.f32 %v3517_v17, %v3516_v19  ;;  %v4934_v15 = vadd.f32 %v3500_v2, %v1380_v8  ;;  %v3372_v17 = vunpack.c.h.bf16 %v4262_v1 }
 0x126   : > { %v3519_v11 = vpop.f32.mrf.mxu0  ;;  %v3901_v49 = vpop.f32.mrf.mxu1 }
 0x127   : > { %v4936_v12 = vadd.f32 %v3901_v49, %v3509_v24 }
 0x128   : > { %v3520_v14 = vpop.f32.mrf.mxu0  ;;  %v1383_v22 = vpop.f32.mrf.mxu1 }
 0x129   : > { %v3521_v35 = vadd.f32 %v3520_v14, %v3519_v11  ;;  %v4938_v44 = vadd.f32 %v3503_v30, %v1383_v22  ;;  %v590_v14 = vmul.f32 0.0, %v3372_v17 }
 0x12a   : > { %v3522_v34 = vpop.f32.mrf.mxu0  ;;  %v3904_v40 = vpop.f32.mrf.mxu1  ;;  %2263 = vmatmul.mubr.bf16.gmra.mxu0 %v4744_v51  ;;  %3999 = vmatmul.mubr.bf16.gmra.mxu1 %v4630_v16 }
 0x12b   : > { %v4942_v41 = vadd.f32 %v3904_v40, %v3518_v21  ;;  %2270 = vmatprep.mubr.bf16.mxu0 %v4872_v54  ;;  %4002 = vmatprep.mubr.bf16.mxu1 %v4649_v27 }
 0x12c   : > { %v3523_v45 = vpop.f32.mrf.mxu0  ;;  %v1396_v2 = vpop.f32.mrf.mxu1 }
 0x12d   : > { %v3524_v24 = vadd.f32 %v3523_v45, %v3522_v34  ;;  %v4946_v46 = vadd.f32 %v3512_v3, %v1396_v2 }
 0x12e   : > { %v3525_v55 = vpop.f32.mrf.mxu0  ;;  %v3905_v30 = vpop.f32.mrf.mxu1 }
 0x12f   : > { %v4948_v59 = vadd.f32 %v3905_v30, %v3521_v35 }
 0x130   : > { %v3526_v50 = vpop.f32.mrf.mxu0  ;;  %v1399_v38 = vpop.f32.mrf.mxu1 }
 0x131   : > { %v3527_v51 = vadd.f32 %v3526_v50, %v3525_v55  ;;  %v4950_v47 = vadd.f32 %v3515_v4, %v1399_v38  ;;  %v3371_v4 = vunpack.c.l.bf16 %v4262_v1  ;;  %v4155_v38 = vld [vmem:[%s4248_s7 + $0x78] sm:$0xff]  }
 0x132   : > { %v3528_v16 = vpop.f32.mrf.mxu0  ;;  %v3908_v10 = vpop.f32.mrf.mxu1  ;;  %2271 = vmatmul.mubr.bf16.gmra.mxu0 %v4363_v39  ;;  %4003 = vmatmul.mubr.bf16.gmra.mxu1 %v4664_v48 }
 0x133   : > { %2278 = vmatprep.mubr.bf16.mxu0 %v4887_v52  ;;  %4006 = vmatprep.mubr.bf16.mxu1 %v4691_v42  ;;  %v589_v49 = vmul.f32 0.0, %v3371_v4 }
 0x134   : > { %v3529_v27 = vpop.f32.mrf.mxu0  ;;  %v1412_v54 = vpop.f32.mrf.mxu1 }
 0x135   : > { %v3530_v3 = vadd.f32 %v3529_v27, %v3528_v16  ;;  %v4956_v58 = vadd.f32 %v3524_v24, %v1412_v54  ;;  %v591_v2 = vpack.c.bf16 %v590_v14, %v589_v49 }
 0x136   : > { %v3531_v19 = vpop.f32.mrf.mxu0  ;;  %v3909_v18 = vpop.f32.mrf.mxu1 }
 0x137   : > { %v4960_v8 = vadd.f32 %v3908_v10, %v3530_v3 }
 0x138   : > { %v3532_v39 = vpop.f32.mrf.mxu0  ;;  %v1415_v21 = vpop.f32.mrf.mxu1 }
 0x139   : > { %v3533_v48 = vadd.f32 %v3532_v39, %v3531_v19  ;;  %v4962_v11 = vadd.f32 %v3527_v51, %v1415_v21  ;;  %v811_v51 = vshll.u32 %v591_v2, 16 }
 0x13a   : > { %v3534_v52 = vpop.f32.mrf.mxu0  ;;  %v3912_v42 = vpop.f32.mrf.mxu1  ;;  %2279 = vmatmul.mubr.bf16.gmra.mxu0 %v4409_v57  ;;  %4007 = vmatmul.mubr.bf16.gmra.mxu1 %v4695_v33 }
 0x13b   : > { %v4966_v22 = vadd.f32 %v3909_v18, %v3533_v48  ;;  %2286 = vmatprep.mubr.bf16.mxu0 %v4898_v56  ;;  %4010 = vmatprep.mubr.bf16.mxu1 %v4709_v0  ;;  %v808_v56 = vshrl.u32 %v591_v2, 16  ;;  %v887_v4 = vrot.slane %v811_v51, 1 }
 0x13c   : > { %v3535_v1 = vpop.f32.mrf.mxu0  ;;  %v1428_v35 = vpop.f32.mrf.mxu1 }
 0x13d   : > { %v3536_v34 = vadd.f32 %v3535_v1, %v3534_v52  ;;  %v810_v19 = vrot.slane %v808_v56, 7 }
 0x13e   : > { %v3537_v40 = vpop.f32.mrf.mxu0  ;;  %v3913_v45 = vpop.f32.mrf.mxu1 }
 0x13f   : > { %v4970_v24 = vadd.f32 %v3536_v34, %v1428_v35 }
 0x140   : > { %v3538_v57 = vpop.f32.mrf.mxu0  ;;  %v1431_v55 = vpop.f32.mrf.mxu1 }
 0x141   : > { %v3539_v33 = vadd.f32 %v3538_v57, %v3537_v40 }
 0x142   : > { %v3540_v30 = vpop.f32.mrf.mxu0  ;;  %v3916_v50 = vpop.f32.mrf.mxu1  ;;  %2287 = vmatmul.mubr.bf16.gmra.mxu0 %v4444_v9  ;;  %4011 = vmatmul.mubr.bf16.gmra.mxu1 %v4714_v6 }
 0x143   : > { %v4974_v0 = vadd.f32 %v3539_v33, %v1431_v55  ;;  %2294 = vmatprep.mubr.bf16.mxu0 %v4155_v38  ;;  %4014 = vmatprep.mubr.bf16.mxu1 %v4727_v23  ;;  %v813_v23 = vor.u32 %v811_v51, %v810_v19 }
 0x144   : > { %v3541_v16 = vpop.f32.mrf.mxu0  ;;  %v1444_v10 = vpop.f32.mrf.mxu1 }
 0x145   : > { %v3542_v27 = vadd.f32 %v3541_v16, %v3540_v30 }
 0x146   : > { %v3543_v54 = vpop.f32.mrf.mxu0  ;;  %v3917_v3 = vpop.f32.mrf.mxu1 }
 0x147   : > { %v4978_v18 = vadd.f32 %v3912_v42, %v3542_v27  ;;  %v888_v42 = vor.u32 %v887_v4, %v808_v56 }
 0x148   : > { %v3544_v9 = vpop.f32.mrf.mxu0  ;;  %v1447_v17 = vpop.f32.mrf.mxu1 }
 0x149   : > { %v3545_v6 = vadd.f32 %v3544_v9, %v3543_v54 }
 0x14a   : > { %v3546_v39 = vpop.f32.mrf.mxu0  ;;  %v3920_v21 = vpop.f32.mrf.mxu1  ;;  %2295 = vmatmul.mubr.bf16.gmra.mxu0 %v4489_v29  ;;  %4015 = vmatmul.mubr.bf16.gmra.mxu1 %v4734_v36 }
 0x14b   : > { %v4982_v48 = vadd.f32 %v3913_v45, %v3545_v6  ;;  %v4985_v52 = vadd.f32 %v3920_v21, %v4891_v37  ;;  %2302 = vmatprep.mubr.bf16.mxu0 %v591_v2  ;;  %4018 = vmatprep.mubr.bf16.mxu1 %v4748_v53  ;;  %v852_v37 = vsel %vm4342_vm2, 0, %v813_v23  ;;  %v927_v53 = vsel %vm4477_vm5, %v888_v42, 0 }
 0x14c   : > { %v3547_v49 = vpop.f32.mrf.mxu0  ;;  %v1460_v14 = vpop.f32.mrf.mxu1 }
 0x14d   : > { %v3548_v1 = vadd.f32 %v3547_v49, %v3546_v39  ;;  %v4989_v35 = vadd.f32 %v4878_v26, %v1460_v14 }
 0x14e   : > { %v3549_v34 = vpop.f32.mrf.mxu0  ;;  %v3921_v29 = vpop.f32.mrf.mxu1 }
 0x14f   : > { %v4991_v40 = vadd.f32 %v3548_v1, %v1444_v10  ;;  %v4994_v36 = vadd.f32 %v3921_v29, %v4893_v43 }
 0x150   : > { %v3550_v45 = vpop.f32.mrf.mxu0  ;;  %v1463_v2 = vpop.f32.mrf.mxu1 }
 0x151   : > { %v3551_v57 = vadd.f32 %v3550_v45, %v3549_v34  ;;  %v5001_v55 = vadd.f32 %v4882_v31, %v1463_v2 }
 0x152   : > { %v3552_v26 = vpop.f32.mrf.mxu0  ;;  %v3924_v33 = vpop.f32.mrf.mxu1  ;;  %2303 = vmatmul.mubr.bf16.gmra.mxu0 %v852_v37  ;;  %4019 = vmatmul.mubr.bf16.gmra.mxu1 %v927_v53 }
 0x153   : > { %v5003_v30 = vadd.f32 %v3551_v57, %v1447_v17  ;;  %v5006_v43 = vadd.f32 %v3924_v33, %v4910_v13 }
 0x154   : > { %v3553_v32 = vpop.f32.mrf.mxu0  ;;  %v1476_v56 = vpop.f32.mrf.mxu1 }
 0x155   : > { %v3554_v38 = vadd.f32 %v3553_v32, %v3552_v26  ;;  %v5009_v28 = vadd.f32 %v4902_v63, %v1476_v56 }
 0x156   : > { %v3555_v51 = vpop.f32.mrf.mxu0  ;;  %v3925_v16 = vpop.f32.mrf.mxu1 }
 0x157   : > { %v5011_v10 = vadd.f32 %v3916_v50, %v3554_v38  ;;  %v5014_v31 = vadd.f32 %v3925_v16, %v4912_v20 }
 0x158   : > { %v3556_v27 = vpop.f32.mrf.mxu0  ;;  %v1479_v54 = vpop.f32.mrf.mxu1 }
 0x159   : > { %v3557_v19 = vadd.f32 %v3556_v27, %v3555_v51  ;;  %v5017_v4 = vadd.f32 %v4904_v60, %v1479_v54 }
 0x15a   : > { %v3622_v13 = vpop.f32.mrf.mxu1  ;;  %v3944_v9 = vpop.f32.mrf.mxu0 }
 0x15b   : > { %v5019_v17 = vadd.f32 %v3917_v3, %v3557_v19 }
 0x15c   : > { %v3623_v6 = vpop.f32.mrf.mxu1  ;;  %v1830_v63 = vpop.f32.mrf.mxu0 }
 0x15d   : > { %v3624_v39 = vadd.f32 %v3623_v6, %v3622_v13 }
 0x15e   : > { %v3625_v21 = vpop.f32.mrf.mxu1  ;;  %v3945_v23 = vpop.f32.mrf.mxu0 }
 0x15f   : > { %v1670_v50 = vadd.f32 %v3624_v39, %v4921_v62 }
 0x160   : > { %v3626_v42 = vpop.f32.mrf.mxu1  ;;  %v1833_v20 = vpop.f32.mrf.mxu0 }
 0x161   : > { %v5022_v49 = vadd.f32 %v1830_v63, %v1670_v50  ;;  %v3627_v14 = vadd.f32 %v3626_v42, %v3625_v21 }
 0x162   : > { %v3628_v1 = vpop.f32.mrf.mxu1  ;;  %v3948_v34 = vpop.f32.mrf.mxu0 }
 0x163   : > { %v1673_v60 = vadd.f32 %v3627_v14, %v4926_v61 }
 0x164   : > { %v3629_v29 = vpop.f32.mrf.mxu1  ;;  %v1846_v37 = vpop.f32.mrf.mxu0 }
 0x165   : > { %v5025_v3 = vadd.f32 %v1833_v20, %v1673_v60  ;;  %v3630_v53 = vadd.f32 %v3629_v29, %v3628_v1 }
 0x166   : > { %v3631_v45 = vpop.f32.mrf.mxu1  ;;  %v3949_v2 = vpop.f32.mrf.mxu0 }
 0x167   : > { %v1678_v57 = vadd.f32 %v3630_v53, %v4916_v7 }
 0x168   : > { %v3632_v26 = vpop.f32.mrf.mxu1  ;;  %v1849_v62 = vpop.f32.mrf.mxu0 }
 0x169   : > { %v3633_v33 = vadd.f32 %v3632_v26, %v3631_v45  ;;  %v5028_v32 = vadd.f32 %v3944_v9, %v1678_v57 }
 0x16a   : > { %v3634_v56 = vpop.f32.mrf.mxu1  ;;  %v3952_v38 = vpop.f32.mrf.mxu0 }
 0x16b   : > { %v1681_v51 = vadd.f32 %v3633_v33, %v4923_v5 }
 0x16c   : > { %v3635_v16 = vpop.f32.mrf.mxu1  ;;  %v1862_v61 = vpop.f32.mrf.mxu0 }
 0x16d   : > { %v3636_v27 = vadd.f32 %v3635_v16, %v3634_v56  ;;  %v5031_v54 = vadd.f32 %v3945_v23, %v1681_v51 }
 0x16e   : > { %v3637_v19 = vpop.f32.mrf.mxu1  ;;  %v3953_v13 = vpop.f32.mrf.mxu0 }
 0x16f   : > { %v1686_v6 = vadd.f32 %v3636_v27, %v4934_v15 }
 0x170   : > { %v3638_v63 = vpop.f32.mrf.mxu1  ;;  %v1865_v7 = vpop.f32.mrf.mxu0 }
 0x171   : > { %v3639_v39 = vadd.f32 %v3638_v63, %v3637_v19  ;;  %v5034_v21 = vadd.f32 %v1846_v37, %v1686_v6 }
 0x172   : > { %v3640_v9 = vpop.f32.mrf.mxu1  ;;  %v5036_v50 = vpop.f32.mrf.mxu0 }
 0x173   : > { %v1689_v42 = vadd.f32 %v3639_v39, %v4938_v44 }
 0x174   : > { %v3641_v5 = vpop.f32.mrf.mxu1  ;;  %v1878_v20 = vpop.f32.mrf.mxu0 }
 0x175   : > { %v3642_v14 = vadd.f32 %v3641_v5, %v3640_v9  ;;  %v5039_v1 = vadd.f32 %v1849_v62, %v1689_v42 }
 0x176   : > { %v3643_v23 = vpop.f32.mrf.mxu1  ;;  %v5041_v60 = vpop.f32.mrf.mxu0 }
 0x177   : > { %v1694_v15 = vadd.f32 %v3642_v14, %v4930_v25 }
 0x178   : > { %v3644_v29 = vpop.f32.mrf.mxu1  ;;  %v1881_v53 = vpop.f32.mrf.mxu0 }
 0x179   : > { %v3645_v45 = vadd.f32 %v3644_v29, %v3643_v23  ;;  %v5044_v37 = vadd.f32 %v3948_v34, %v1694_v15 }
 0x17a   : > { %v3646_v57 = vpop.f32.mrf.mxu1  ;;  %v5046_v26 = vpop.f32.mrf.mxu0 }
 0x17b   : > { %v1697_v44 = vadd.f32 %v3645_v45, %v4936_v12 }
 0x17c   : > { %v3647_v33 = vpop.f32.mrf.mxu1  ;;  %v5049_v56 = vpop.f32.mrf.mxu0 }
 0x17d   : > { %v3648_v62 = vadd.f32 %v3647_v33, %v3646_v57  ;;  %v5051_v51 = vadd.f32 %v3949_v2, %v1697_v44 }
 0x17e   : > { %v3649_v16 = vpop.f32.mrf.mxu1  ;;  %v5053_v27 = vpop.f32.mrf.mxu0 }
 0x17f   : > { %v1702_v25 = vadd.f32 %v3648_v62, %v4946_v46 }
 0x180   : > { %v3650_v19 = vpop.f32.mrf.mxu1  ;;  %v5056_v6 = vpop.f32.mrf.mxu0 }
 0x181   : > { %v3651_v34 = vadd.f32 %v3650_v19, %v3649_v16  ;;  %v5058_v63 = vadd.f32 %v1862_v61, %v1702_v25 }
 0x182   : > { %v3652_v39 = vpop.f32.mrf.mxu1  ;;  %v5060_v9 = vpop.f32.mrf.mxu0 }
 0x183   : > { %v1705_v12 = vadd.f32 %v3651_v34, %v4950_v47 }
 0x184   : > { %v3653_v42 = vpop.f32.mrf.mxu1  ;;  %v5063_v5 = vpop.f32.mrf.mxu0 }
 0x185   : > { %v3654_v2 = vadd.f32 %v3653_v42, %v3652_v39  ;;  %v5065_v14 = vadd.f32 %v1865_v7, %v1705_v12 }
 0x186   : > { %v3655_v23 = vpop.f32.mrf.mxu1  ;;  %v5067_v15 = vpop.f32.mrf.mxu0 }
 0x187   : > { %v1710_v46 = vadd.f32 %v3654_v2, %v4942_v41 }
 0x188   : > { %v3656_v29 = vpop.f32.mrf.mxu1  ;;  %v5070_v45 = vpop.f32.mrf.mxu0 }
 0x189   : > { %v3657_v61 = vadd.f32 %v3656_v29, %v3655_v23  ;;  %v5072_v57 = vadd.f32 %v3952_v38, %v1710_v46 }
 0x18a   : > { %v3658_v44 = vpop.f32.mrf.mxu1  ;;  %v5074_v33 = vpop.f32.mrf.mxu0 }
 0x18b   : > { %v1713_v47 = vadd.f32 %v3657_v61, %v4948_v59 }
 0x18c   : > { %v3659_v62 = vpop.f32.mrf.mxu1  ;;  %v5077_v16 = vpop.f32.mrf.mxu0 }
 0x18d   : > { %v3660_v7 = vadd.f32 %v3659_v62, %v3658_v44  ;;  %v5079_v25 = vadd.f32 %v3953_v13, %v1713_v47 }
 0x18e   : > { %v3661_v19 = vpop.f32.mrf.mxu1  ;;  %v5081_v34 = vpop.f32.mrf.mxu0 }
 0x18f   : > { %v1718_v41 = vadd.f32 %v3660_v7, %v4956_v58 }
 0x190   : > { %v3662_v39 = vpop.f32.mrf.mxu1  ;;  %v5084_v12 = vpop.f32.mrf.mxu0 }
 0x191   : > { %v3663_v38 = vadd.f32 %v3662_v39, %v3661_v19  ;;  %v5086_v42 = vadd.f32 %v1878_v20, %v1718_v41 }
 0x192   : > { %v3664_v2 = vpop.f32.mrf.mxu1  ;;  %v5088_v23 = vpop.f32.mrf.mxu0 }
 0x193   : > { %5540 = vst [vmem:[#allocation10_spill] sm:$0xff] %v5088_v23  ;;  %v1721_v59 = vadd.f32 %v3663_v38, %v4962_v11 }
 0x194   : > { %v3665_v46 = vpop.f32.mrf.mxu1  ;;  %v5091_v29 = vpop.f32.mrf.mxu0 }
 0x195   : > { %v3666_v13 = vadd.f32 %v3665_v46, %v3664_v2  ;;  %v5093_v61 = vadd.f32 %v1881_v53, %v1721_v59 }
 0x196   : > { %v3667_v44 = vpop.f32.mrf.mxu1  ;;  %v5095_v47 = vpop.f32.mrf.mxu0 }
 0x197   : > { %5541 = vst [vmem:[#allocation11_spill] sm:$0xff] %v5095_v47  ;;  %v1726_v58 = vadd.f32 %v3666_v13, %v4960_v8 }
 0x198   : > { %v3668_v62 = vpop.f32.mrf.mxu1  ;;  %v5098_v7 = vpop.f32.mrf.mxu0 }
 0x199   : > { %v3669_v20 = vadd.f32 %v3668_v62, %v3667_v44  ;;  %v5101_v19 = vadd.f32 %v5036_v50, %v1726_v58 }
 0x19a   : > { %v3670_v41 = vpop.f32.mrf.mxu1  ;;  %v3758_v11 = vpop.f32.mrf.mxu0 }
 0x19b   : > { %v1729_v39 = vadd.f32 %v3669_v20, %v4966_v22 }
 0x19c   : > { %v3671_v38 = vpop.f32.mrf.mxu1  ;;  %v3759_v2 = vpop.f32.mrf.mxu0 }
 0x19d   : > { %v3672_v53 = vadd.f32 %v3671_v38, %v3670_v41  ;;  %v5104_v59 = vadd.f32 %v3759_v2, %v3758_v11  ;;  %v5107_v46 = vadd.f32 %v5041_v60, %v1729_v39 }
 0x19e   : > { %v3673_v8 = vpop.f32.mrf.mxu1  ;;  %v5109_v13 = vpop.f32.mrf.mxu0 }
 0x19f   : > { %v1734_v44 = vadd.f32 %v3672_v53, %v4970_v24 }
 0x1a0   : > { %v3674_v62 = vpop.f32.mrf.mxu1  ;;  %v5112_v50 = vpop.f32.mrf.mxu0 }
 0x1a1   : > { %v3675_v58 = vadd.f32 %v3674_v62, %v3673_v8  ;;  %v5115_v47 = vadd.f32 %v5049_v56, %v1734_v44 }
 0x1a2   : > { %v3676_v22 = vpop.f32.mrf.mxu1  ;;  %v5117_v20 = vpop.f32.mrf.mxu0 }
 0x1a3   : > { %v1737_v41 = vadd.f32 %v3675_v58, %v4974_v0 }
 0x1a4   : > { %v3677_v11 = vpop.f32.mrf.mxu1  ;;  %v5120_v60 = vpop.f32.mrf.mxu0 }
 0x1a5   : > { %v3678_v39 = vadd.f32 %v3677_v11, %v3676_v22  ;;  %v5123_v38 = vadd.f32 %v5056_v6, %v1737_v41 }
 0x1a6   : > { %v3679_v24 = vpop.f32.mrf.mxu1  ;;  %v5125_v2 = vpop.f32.mrf.mxu0 }
 0x1a7   : > { %5542 = vst [vmem:[#allocation12_spill] sm:$0xff] %v5123_v38  ;;  %v1742_v53 = vadd.f32 %v3678_v39, %v4978_v18 }
 0x1a8   : > { %v3680_v8 = vpop.f32.mrf.mxu1  ;;  %v5128_v56 = vpop.f32.mrf.mxu0 }
 0x1a9   : > { %v3681_v44 = vadd.f32 %v3680_v8, %v3679_v24  ;;  %v5131_v62 = vadd.f32 %v5046_v26, %v1742_v53 }
 0x1aa   : > { %v3682_v0 = vpop.f32.mrf.mxu1  ;;  %v5133_v58 = vpop.f32.mrf.mxu0 }
 0x1ab   : > { %v1745_v22 = vadd.f32 %v3681_v44, %v4982_v48 }
 0x1ac   : > { %v3683_v11 = vpop.f32.mrf.mxu1  ;;  %v5136_v6 = vpop.f32.mrf.mxu0 }
 0x1ad   : > { %v3684_v41 = vadd.f32 %v3683_v11, %v3682_v0  ;;  %v5139_v23 = vadd.f32 %v5053_v27, %v1745_v22 }
 0x1ae   : > { %v3685_v18 = vpop.f32.mrf.mxu1  ;;  %v5141_v39 = vpop.f32.mrf.mxu0 }
 0x1af   : > { %5543 = vst [vmem:[#allocation13_spill] sm:$0xff] %v5139_v23  ;;  %v1750_v24 = vadd.f32 %v3684_v41, %v4991_v40 }
 0x1b0   : > { %v3686_v8 = vpop.f32.mrf.mxu1  ;;  %v5144_v26 = vpop.f32.mrf.mxu0 }
 0x1b1   : > { %v3687_v53 = vadd.f32 %v3686_v8, %v3685_v18  ;;  %v5147_v38 = vadd.f32 %v5063_v5, %v1750_v24 }
 0x1b2   : > { %v3688_v48 = vpop.f32.mrf.mxu1  ;;  %v5149_v44 = vpop.f32.mrf.mxu0 }
 0x1b3   : > { %5544 = vst [vmem:[#allocation14_spill] sm:$0xff] %v5147_v38  ;;  %v1753_v0 = vadd.f32 %v3687_v53, %v5003_v30 }
 0x1b4   : > { %v3689_v11 = vpop.f32.mrf.mxu1  ;;  %v5152_v27 = vpop.f32.mrf.mxu0 }
 0x1b5   : > { %v3690_v22 = vadd.f32 %v3689_v11, %v3688_v48  ;;  %v5155_v23 = vadd.f32 %v5070_v45, %v1753_v0 }
 0x1b6   : > { %v3691_v40 = vpop.f32.mrf.mxu1  ;;  %v5157_v41 = vpop.f32.mrf.mxu0 }
 0x1b7   : > { %5545 = vst [vmem:[#allocation15_spill] sm:$0xff] %v5155_v23  ;;  %v1758_v18 = vadd.f32 %v3690_v22, %v5011_v10 }
 0x1b8   : > { %v3692_v8 = vpop.f32.mrf.mxu1  ;;  %v5160_v5 = vpop.f32.mrf.mxu0 }
 0x1b9   : > { %v3693_v24 = vadd.f32 %v3692_v8, %v3691_v40  ;;  %v5163_v38 = vadd.f32 %v5060_v9, %v1758_v18 }
 0x1ba   : > { %v3694_v30 = vpop.f32.mrf.mxu1  ;;  %v5165_v53 = vpop.f32.mrf.mxu0 }
 0x1bb   : > { %5546 = vst [vmem:[#allocation16_spill] sm:$0xff] %v5163_v38  ;;  %v1761_v48 = vadd.f32 %v3693_v24, %v5019_v17 }
 0x1bc   : > { %v3695_v11 = vpop.f32.mrf.mxu1  ;;  %v5168_v45 = vpop.f32.mrf.mxu0 }
 0x1bd   : > { %v3696_v0 = vadd.f32 %v3695_v11, %v3694_v30  ;;  %v5171_v23 = vadd.f32 %v5067_v15, %v1761_v48 }
 0x1be   : > { %v3697_v10 = vpop.f32.mrf.mxu1  ;;  %v5173_v22 = vpop.f32.mrf.mxu0 }
 0x1bf   : > { %5547 = vst [vmem:[#allocation17_spill] sm:$0xff] %v5171_v23  ;;  %v1766_v40 = vadd.f32 %v3696_v0, %v4989_v35 }
 0x1c0   : > { %v3698_v8 = vpop.f32.mrf.mxu1  ;;  %v5176_v9 = vpop.f32.mrf.mxu0 }
 0x1c1   : > { %v3699_v18 = vadd.f32 %v3698_v8, %v3697_v10  ;;  %v5179_v38 = vadd.f32 %v5077_v16, %v1766_v40 }
 0x1c2   : > { %v3700_v17 = vpop.f32.mrf.mxu1  ;;  %v5181_v24 = vpop.f32.mrf.mxu0 }
 0x1c3   : > { %5548 = vst [vmem:[#allocation18_spill] sm:$0xff] %v5179_v38  ;;  %v1769_v30 = vadd.f32 %v3699_v18, %v5001_v55 }
 0x1c4   : > { %v3701_v11 = vpop.f32.mrf.mxu1  ;;  %v5184_v15 = vpop.f32.mrf.mxu0 }
 0x1c5   : > { %v3702_v48 = vadd.f32 %v3701_v11, %v3700_v17  ;;  %v5187_v23 = vadd.f32 %v5084_v12, %v1769_v30 }
 0x1c6   : > { %v3703_v35 = vpop.f32.mrf.mxu1  ;;  %v5189_v0 = vpop.f32.mrf.mxu0 }
 0x1c7   : > { %5549 = vst [vmem:[#allocation19_spill] sm:$0xff] %v5187_v23  ;;  %v1774_v10 = vadd.f32 %v3702_v48, %v4985_v52 }
 0x1c8   : > { %v3704_v8 = vpop.f32.mrf.mxu1  ;;  %v5192_v16 = vpop.f32.mrf.mxu0 }
 0x1c9   : > { %v3705_v40 = vadd.f32 %v3704_v8, %v3703_v35  ;;  %v5195_v38 = vadd.f32 %v5074_v33, %v1774_v10 }
 0x1ca   : > { %v3706_v55 = vpop.f32.mrf.mxu1  ;;  %v5197_v18 = vpop.f32.mrf.mxu0 }
 0x1cb   : > { %5550 = vst [vmem:[#allocation20_spill] sm:$0xff] %v5195_v38  ;;  %v1777_v17 = vadd.f32 %v3705_v40, %v4994_v36 }
 0x1cc   : > { %v3707_v11 = vpop.f32.mrf.mxu1  ;;  %v5200_v12 = vpop.f32.mrf.mxu0 }
 0x1cd   : > { %v3708_v30 = vadd.f32 %v3707_v11, %v3706_v55  ;;  %v5203_v23 = vadd.f32 %v5081_v34, %v1777_v17 }
 0x1ce   : > { %v3709_v52 = vpop.f32.mrf.mxu1  ;;  %v5205_v48 = vpop.f32.mrf.mxu0 }
 0x1cf   : > { %5551 = vst [vmem:[#allocation21_spill] sm:$0xff] %v5203_v23  ;;  %v1782_v35 = vadd.f32 %v3708_v30, %v5009_v28 }
 0x1d0   : > { %v3710_v8 = vpop.f32.mrf.mxu1  ;;  %v5208_v33 = vpop.f32.mrf.mxu0 }
 0x1d1   : > { %v3711_v10 = vadd.f32 %v3710_v8, %v3709_v52  ;;  %v5211_v38 = vadd.f32 %v5091_v29, %v1782_v35 }
 0x1d2   : > { %v3712_v36 = vpop.f32.mrf.mxu1  ;;  %v5213_v40 = vpop.f32.mrf.mxu0 }
 0x1d3   : > { %5552 = vst [vmem:[#allocation22_spill] sm:$0xff] %v5211_v38  ;;  %v1785_v55 = vadd.f32 %v3711_v10, %v5017_v4  ;;  %v3766_v10 = vadd.f32 %v5120_v60, %v5117_v20 }
 0x1d4   : > { %v3713_v11 = vpop.f32.mrf.mxu1  ;;  %v5216_v34 = vpop.f32.mrf.mxu0 }
 0x1d5   : > { %v3714_v17 = vadd.f32 %v3713_v11, %v3712_v36  ;;  %v5219_v23 = vadd.f32 %v5098_v7, %v1785_v55 }
 0x1d6   : > { %v3715_v28 = vpop.f32.mrf.mxu1  ;;  %v5221_v30 = vpop.f32.mrf.mxu0 }
 0x1d7   : > { %5553 = vst [vmem:[#allocation23_spill] sm:$0xff] %v5219_v23  ;;  %v5224_v52 = vadd.f32 %v3714_v17, %v5006_v43  ;;  %v3769_v43 = vadd.f32 %v5128_v56, %v5125_v2  ;;  %v3778_v56 = vadd.f32 %v5152_v27, %v5149_v44  ;;  %v3781_v44 = vadd.f32 %v5160_v5, %v5157_v41 }
 0x1d8   : > { %v3716_v29 = vpop.f32.mrf.mxu1  ;;  %v5226_v35 = vpop.f32.mrf.mxu0 }
 0x1d9   : > { %v3717_v8 = vadd.f32 %v3716_v29, %v3715_v28  ;;  %v3763_v29 = vadd.f32 %v5112_v50, %v5109_v13 }
 0x1da   : > { %v5228_v38 = vpop.f32.mrf.mxu0  ;;  %v3992_v4 = vpop.f32.mrf.mxu1 }
 0x1db   : > { %v5233_v36 = vadd.f32 %v3717_v8, %v5014_v31  ;;  %v2354_v11 = vadd.f32 %v3992_v4, %v3766_v10 }
 0x1dc   : > { %v5235_v7 = vpop.f32.mrf.mxu0  ;;  %v2345_v55 = vpop.f32.mrf.mxu1 }
 0x1dd   : > { %5554 = vst [vmem:[#allocation24_spill] sm:$0xff] %v5233_v36  ;;  %v2346_v17 = vadd.f32 %v5104_v59, %v2345_v55  ;;  %v5250_v36 = vadd.f32 %v2354_v11, %v5028_v32  ;;  %v3772_v32 = vadd.f32 %v5136_v6, %v5133_v58  ;;  %v3775_v58 = vadd.f32 %v5144_v26, %v5141_v39 }
 0x1de   : > { %v5240_v23 = vpop.f32.mrf.mxu0  ;;  %v3993_v28 = vpop.f32.mrf.mxu1  ;;  %v3790_v26 = vadd.f32 %v5184_v15, %v5181_v24  ;;  %v3793_v24 = vadd.f32 %v5192_v16, %v5189_v0 }
 0x1df   : > { %v5245_v20 = vadd.f32 %v2346_v17, %v5022_v49  ;;  %v2357_v31 = vadd.f32 %v3993_v28, %v3769_v43 }
 0x1e0   : > { %v5247_v60 = vpop.f32.mrf.mxu0  ;;  %v2348_v8 = vpop.f32.mrf.mxu1 }
 0x1e1   : > { %v5253_v2 = vadd.f32 %v2357_v31, %v5031_v54  ;;  %v2349_v59 = vadd.f32 %v3763_v29, %v2348_v8 }
 0x1e2   : > { %v5257_v4 = vpop.f32.mrf.mxu0  ;;  %v3996_v13 = vpop.f32.mrf.mxu1 }
 0x1e3   : > { %v3381_v49 = vpack.c.bf16 %v5253_v2, %v5250_v36  ;;  %v5262_v50 = vadd.f32 %v2349_v59, %v5025_v3  ;;  %v2370_v10 = vadd.f32 %v3996_v13, %v3778_v56 }
 0x1e4   : > { %v5266_v54 = vpop.f32.mrf.mxu0  ;;  %v2361_v55 = vpop.f32.mrf.mxu1 }
 0x1e5   : > { %3455 = vst [vmem:[%s4253_s10 + $0x8] sm:$0xff] %v3381_v49   ;;  %v2504_v27 = vadd.f32 %v5262_v50, %v5245_v20  ;;  %v3376_v43 = vpack.c.bf16 %v5262_v50, %v5245_v20  ;;  %v2362_v11 = vadd.f32 %v3772_v32, %v2361_v55  ;;  %v5282_v41 = vadd.f32 %v2370_v10, %v5044_v37 }
 0x1e6   : > { %v5275_v3 = vpop.f32.mrf.mxu0  ;;  %v3997_v17 = vpop.f32.mrf.mxu1 }
 0x1e7   : > { %v2505_v6 = vadd.f32 %v2504_v27, %v5250_v36  ;;  %3377 = vst [vmem:[%s4253_s10] sm:$0xff] %v3376_v43   ;;  %v2373_v28 = vadd.f32 %v3997_v17, %v3781_v44  ;;  %v5287_v31 = vadd.f32 %v2362_v11, %v5034_v21 }
 0x1e8   : > { %v5284_v5 = vpop.f32.mrf.mxu0  ;;  %v2364_v29 = vpop.f32.mrf.mxu1 }
 0x1e9   : > { %v2506_v8 = vadd.f32 %v2505_v6, %v5253_v2  ;;  %v5291_v59 = vadd.f32 %v2373_v28, %v5051_v51  ;;  %v2365_v39 = vadd.f32 %v3775_v58, %v2364_v29  ;;  %v3784_v51 = vadd.f32 %v5168_v45, %v5165_v53 }
 0x1ea   : > { %v5295_v56 = vpop.f32.mrf.mxu0  ;;  %v4000_v37 = vpop.f32.mrf.mxu1  ;;  %v3787_v53 = vadd.f32 %v5176_v9, %v5173_v22  ;;  %v3802_v9 = vadd.f32 %v5216_v34, %v5213_v40  ;;  %v3805_v40 = vadd.f32 %v5226_v35, %v5221_v30 }
 0x1eb   : > { %v2507_v13 = vadd.f32 %v2506_v8, %v5287_v31  ;;  %v3391_v49 = vpack.c.bf16 %v5291_v59, %v5282_v41  ;;  %v5301_v21 = vadd.f32 %v2365_v39, %v5039_v1  ;;  %v2386_v32 = vadd.f32 %v4000_v37, %v3790_v26 }
 0x1ec   : > { %v5305_v10 = vpop.f32.mrf.mxu0  ;;  %v2377_v55 = vpop.f32.mrf.mxu1  ;;  %v3796_v26 = vadd.f32 %v5200_v12, %v5197_v18 }
 0x1ed   : > { %3457 = vst [vmem:[%s4253_s10 + $0x18] sm:$0xff] %v3391_v49   ;;  %v2508_v15 = vadd.f32 %v2507_v13, %v5301_v21  ;;  %v3386_v44 = vpack.c.bf16 %v5301_v21, %v5287_v31  ;;  %v2378_v27 = vadd.f32 %v3784_v51, %v2377_v55  ;;  %v5320_v17 = vadd.f32 %v2386_v32, %v5072_v57 }
 0x1ee   : > { %v5313_v43 = vpop.f32.mrf.mxu0  ;;  %v4001_v1 = vpop.f32.mrf.mxu1 }
 0x1ef   : > { %v2509_v45 = vadd.f32 %v2508_v15, %v5282_v41  ;;  %3456 = vst [vmem:[%s4253_s10 + $0x10] sm:$0xff] %v3386_v44   ;;  %v2389_v11 = vadd.f32 %v4001_v1, %v3793_v24  ;;  %v5325_v58 = vadd.f32 %v2378_v27, %v5058_v63 }
 0x1f0   : > { %v5322_v0 = vpop.f32.mrf.mxu0  ;;  %v2380_v16 = vpop.f32.mrf.mxu1 }
 0x1f1   : > { %v2510_v6 = vadd.f32 %v2509_v45, %v5291_v59  ;;  %v5329_v28 = vadd.f32 %v2389_v11, %v5079_v25  ;;  %v2381_v22 = vadd.f32 %v3787_v53, %v2380_v16  ;;  %v3808_v11 = vadd.f32 %v5235_v7, %v5228_v38 }
 0x1f2   : > { %v3824_v29 = vpop.f32.mrf.mxu0  ;;  %v4004_v8 = vpop.f32.mrf.mxu1 }
 0x1f3   : > { %v2511_v57 = vadd.f32 %v2510_v6, %v5325_v58  ;;  %v3401_v39 = vpack.c.bf16 %v5329_v28, %v5320_v17  ;;  %v5337_v63 = vadd.f32 %v2381_v22, %v5065_v14  ;;  %v2402_v25 = vadd.f32 %v4004_v8, %v3802_v9 }
 0x1f4   : > { %v3825_v37 = vpop.f32.mrf.mxu0  ;;  %v2393_v13 = vpop.f32.mrf.mxu1  ;;  %v3799_v14 = vadd.f32 %v5208_v33, %v5205_v48  ;;  %v3814_v48 = vadd.f32 %v5266_v54, %v5257_v4  ;;  %v3817_v4 = vadd.f32 %v5284_v5, %v5275_v3 }
 0x1f5   : > { %3459 = vst [vmem:[%s4253_s10 + $0x28] sm:$0xff] %v3401_v39   ;;  %v2512_v34 = vadd.f32 %v2511_v57, %v5337_v63  ;;  %v3396_v49 = vpack.c.bf16 %v5337_v63, %v5325_v58  ;;  %v2394_v51 = vadd.f32 %v3796_v26, %v2393_v13  ;;  %v5352_v24 = vadd.f32 %v2402_v25, %v5101_v19  ;;  %v5555_v13 = vld [vmem:[#allocation13_spill] sm:$0xff] }
 0x1f6   : > { %v3827_v32 = vpop.f32.mrf.mxu0  ;;  %v4005_v55 = vpop.f32.mrf.mxu1 }
 0x1f7   : > { %v2513_v18 = vadd.f32 %v2512_v34, %v5320_v17  ;;  %3458 = vst [vmem:[%s4253_s10 + $0x20] sm:$0xff] %v3396_v49   ;;  %v2405_v12 = vadd.f32 %v4005_v55, %v3805_v40  ;;  %v5355_v15 = vadd.f32 %v2394_v51, %v5086_v42  ;;  %v5556_v55 = vld [vmem:[#allocation12_spill] sm:$0xff] }
 0x1f8   : > { %v3828_v30 = vpop.f32.mrf.mxu0  ;;  %v2396_v35 = vpop.f32.mrf.mxu1 }
 0x1f9   : > { %v2514_v44 = vadd.f32 %v2513_v18, %v5329_v28  ;;  %v5359_v27 = vadd.f32 %v2405_v12, %v5107_v46  ;;  %v2397_v1 = vadd.f32 %v3799_v14, %v2396_v35 }
 0x1fa   : > { %v3830_v33 = vpop.f32.mrf.mxu0  ;;  %v4008_v53 = vpop.f32.mrf.mxu1 }
 0x1fb   : > { %v2515_v19 = vadd.f32 %v2514_v44, %v5355_v15  ;;  %v3411_v45 = vpack.c.bf16 %v5359_v27, %v5352_v24  ;;  %v5367_v42 = vadd.f32 %v2397_v1, %v5093_v61  ;;  %v2418_v46 = vadd.f32 %v4008_v53, %v3814_v48 }
 0x1fc   : > { %v3831_v16 = vpop.f32.mrf.mxu0  ;;  %v2409_v6 = vpop.f32.mrf.mxu1  ;;  %v3811_v61 = vadd.f32 %v5247_v60, %v5240_v23  ;;  %v3826_v23 = vadd.f32 %v3825_v37, %v3824_v29  ;;  %v3829_v44 = vadd.f32 %v3828_v30, %v3827_v32 }
 0x1fd   : > { %3461 = vst [vmem:[%s4253_s10 + $0x38] sm:$0xff] %v3411_v45   ;;  %v2516_v54 = vadd.f32 %v2515_v19, %v5367_v42  ;;  %v3406_v22 = vpack.c.bf16 %v5367_v42, %v5355_v15  ;;  %v2410_v9 = vadd.f32 %v3808_v11, %v2409_v6  ;;  %v5382_v39 = vadd.f32 %v2418_v46, %v5131_v62  ;;  %v5558_v46 = vld [vmem:[#allocation14_spill] sm:$0xff] }
 0x1fe   : > { %v3833_v8 = vpop.f32.mrf.mxu0  ;;  %v4009_v57 = vpop.f32.mrf.mxu1  ;;  %v3823_v19 = vadd.f32 %v5322_v0, %v5313_v43 }
 0x1ff   : > { %v2517_v38 = vadd.f32 %v2516_v54, %v5352_v24  ;;  %3460 = vst [vmem:[%s4253_s10 + $0x30] sm:$0xff] %v3406_v22   ;;  %v2421_v7 = vadd.f32 %v4009_v57, %v3817_v4  ;;  %v5385_v26 = vadd.f32 %v2410_v9, %v5115_v47  ;;  %v3820_v47 = vadd.f32 %v5305_v10, %v5295_v56  ;;  %v5557_v10 = vld [vmem:[#allocation16_spill] sm:$0xff]  ;;  %v5559_v54 = vld [vmem:[#allocation17_spill] sm:$0xff] }
 0x200   : > { %v3834_v3 = vpop.f32.mrf.mxu0  ;;  %v2412_v5 = vpop.f32.mrf.mxu1 }
 0x201   : > { %v2518_v25 = vadd.f32 %v2517_v38, %v5359_v27  ;;  %v5389_v40 = vadd.f32 %v2421_v7, %v5555_v13  ;;  %v2413_v34 = vadd.f32 %v3811_v61, %v2412_v5  ;;  %v5560_v7 = vld [vmem:[#allocation15_spill] sm:$0xff] }
 0x202   : > { %v3836_v60 = vpop.f32.mrf.mxu0  ;;  %v4012_v49 = vpop.f32.mrf.mxu1 }
 0x203   : > { %v2519_v51 = vadd.f32 %v2518_v25, %v5385_v26  ;;  %v3421_v62 = vpack.c.bf16 %v5389_v40, %v5382_v39  ;;  %v5395_v14 = vadd.f32 %v2413_v34, %v5556_v55  ;;  %v2434_v18 = vadd.f32 %v4012_v49, %v3826_v23 }
 0x204   : > { %v3837_v12 = vpop.f32.mrf.mxu0  ;;  %v2425_v35 = vpop.f32.mrf.mxu1  ;;  %v3832_v25 = vadd.f32 %v3831_v16, %v3830_v33 }
 0x205   : > { %3463 = vst [vmem:[%s4253_s10 + $0x48] sm:$0xff] %v3421_v62   ;;  %v2520_v29 = vadd.f32 %v2519_v51, %v5395_v14  ;;  %v3416_v37 = vpack.c.bf16 %v5395_v14, %v5385_v26  ;;  %v2426_v1 = vadd.f32 %v3820_v47, %v2425_v35  ;;  %v5408_v11 = vadd.f32 %v2434_v18, %v5557_v10 }
 0x206   : > { %v3839_v48 = vpop.f32.mrf.mxu0  ;;  %v4013_v53 = vpop.f32.mrf.mxu1  ;;  %v3838_v43 = vadd.f32 %v3837_v12, %v3836_v60  ;;  %v3835_v18 = vadd.f32 %v3834_v3, %v3833_v8 }
 0x207   : > { %v2521_v45 = vadd.f32 %v2520_v29, %v5382_v39  ;;  %3462 = vst [vmem:[%s4253_s10 + $0x40] sm:$0xff] %v3416_v37   ;;  %v2437_v56 = vadd.f32 %v4013_v53, %v3829_v44  ;;  %v5411_v6 = vadd.f32 %v2426_v1, %v5558_v46  ;;  %v5561_v44 = vld [vmem:[#allocation20_spill] sm:$0xff]  ;;  %v5562_v37 = vld [vmem:[#allocation18_spill] sm:$0xff]  ;;  %v5563_v53 = vld [vmem:[#allocation21_spill] sm:$0xff] }
 0x208   : > { %v3840_v32 = vpop.f32.mrf.mxu0  ;;  %v2428_v30 = vpop.f32.mrf.mxu1 }
 0x209   : > { %v2522_v4 = vadd.f32 %v2521_v45, %v5389_v40  ;;  %v5415_v22 = vadd.f32 %v2437_v56, %v5559_v54  ;;  %v2429_v9 = vadd.f32 %v3823_v19, %v2428_v30  ;;  %v3841_v49 = vadd.f32 %v3840_v32, %v3839_v48  ;;  %v5564_v30 = vld [vmem:[#allocation19_spill] sm:$0xff] }
 0x20a   : > { %v3842_v0 = vpop.f32.mrf.mxu0  ;;  %v4016_v57 = vpop.f32.mrf.mxu1 }
 0x20b   : > { %v2523_v61 = vadd.f32 %v2522_v4, %v5411_v6  ;;  %v3431_v38 = vpack.c.bf16 %v5415_v22, %v5408_v11  ;;  %v5421_v5 = vadd.f32 %v2429_v9, %v5560_v7  ;;  %v2450_v13 = vadd.f32 %v4016_v57, %v3838_v43 }
 0x20c   : > { %v3843_v34 = vpop.f32.mrf.mxu0  ;;  %v2441_v23 = vpop.f32.mrf.mxu1 }
 0x20d   : > { %3465 = vst [vmem:[%s4253_s10 + $0x58] sm:$0xff] %v3431_v38   ;;  %v2524_v51 = vadd.f32 %v2523_v61, %v5421_v5  ;;  %v3426_v60 = vpack.c.bf16 %v5421_v5, %v5411_v6  ;;  %v2442_v62 = vadd.f32 %v3832_v25, %v2441_v23  ;;  %v5430_v33 = vadd.f32 %v2450_v13, %v5561_v44  ;;  %v5568_v44 = vld [vmem:[#allocation11_spill] sm:$0xff] }
 0x20e   : > { %v3845_v55 = vpop.f32.mrf.mxu0  ;;  %v4017_v47 = vpop.f32.mrf.mxu1  ;;  %v3844_v56 = vadd.f32 %v3843_v34, %v3842_v0 }
 0x20f   : > { %v2525_v12 = vadd.f32 %v2524_v51, %v5408_v11  ;;  %3464 = vst [vmem:[%s4253_s10 + $0x50] sm:$0xff] %v3426_v60   ;;  %v2453_v35 = vadd.f32 %v4017_v47, %v3841_v49  ;;  %v5433_v1 = vadd.f32 %v2442_v62, %v5562_v37  ;;  %v5565_v49 = vld [vmem:[#allocation22_spill] sm:$0xff]  ;;  %v5569_v37 = vld [vmem:[#allocation23_spill] sm:$0xff] }
 0x210   : > { %v3846_v16 = vpop.f32.mrf.mxu0  ;;  %v2444_v29 = vpop.f32.mrf.mxu1 }
 0x211   : > { %v2526_v48 = vadd.f32 %v2525_v12, %v5415_v22  ;;  %v5437_v19 = vadd.f32 %v2453_v35, %v5563_v53  ;;  %v2445_v45 = vadd.f32 %v3835_v18, %v2444_v29  ;;  %v3847_v25 = vadd.f32 %v3846_v16, %v3845_v55  ;;  %v5566_v18 = vld [vmem:[#allocation10_spill] sm:$0xff]  ;;  %v5567_v35 = vld [vmem:[#allocation24_spill] sm:$0xff] }
 0x212   : > { %v3848_v8 = vpop.f32.mrf.mxu0  ;;  %v4020_v3 = vpop.f32.mrf.mxu1  ;;  %v1951_v12 = vadd.f32 %v5566_v18, %v5224_v52  ;;  %v1954_v55 = vadd.f32 %v5568_v44, %v5567_v35 }
 0x213   : > { %v2527_v10 = vadd.f32 %v2526_v48, %v5433_v1  ;;  %v3441_v32 = vpack.c.bf16 %v5437_v19, %v5430_v33  ;;  %v2497_v46 = vadd.f32 %v2445_v45, %v5564_v30 }
 0x214   : > { %v3849_v4 = vpop.f32.mrf.mxu0  ;;  %v2457_v54 = vpop.f32.mrf.mxu1 }
 0x215   : > { %3467 = vst [vmem:[%s4253_s10 + $0x68] sm:$0xff] %v3441_v32   ;;  %v2528_v9 = vadd.f32 %v2527_v10, %v2497_v46  ;;  %v3436_v43 = vpack.c.bf16 %v2497_v46, %v5433_v1  ;;  %v3850_v57 = vadd.f32 %v3849_v4, %v3848_v8  ;;  %v2458_v61 = vadd.f32 %v3844_v56, %v2457_v54 }
 0x216   : > { %v3851_v38 = vpop.f32.mrf.mxu0  ;;  %v4021_v7 = vpop.f32.mrf.mxu1 }
 0x217   : > { %v2529_v0 = vadd.f32 %v2528_v9, %v5430_v33  ;;  %3466 = vst [vmem:[%s4253_s10 + $0x60] sm:$0xff] %v3436_v43   ;;  %v2466_v13 = vadd.f32 %v4020_v3, %v3850_v57  ;;  %v2500_v51 = vadd.f32 %v2458_v61, %v5565_v49 }
 0x218   : > { %v3852_v34 = vpop.f32.mrf.mxu0  ;;  %v2460_v23 = vpop.f32.mrf.mxu1 }
 0x219   : > { %v2530_v60 = vadd.f32 %v2529_v0, %v5437_v19  ;;  %v3853_v62 = vadd.f32 %v3852_v34, %v3851_v38  ;;  %v2461_v47 = vadd.f32 %v3847_v25, %v2460_v23  ;;  %v2502_v53 = vadd.f32 %v2466_v13, %v1951_v12 }
 0x21b   : > { %v2531_v16 = vadd.f32 %v2530_v60, %v2500_v51  ;;  %v2469_v29 = vadd.f32 %v4021_v7, %v3853_v62  ;;  %v2501_v48 = vadd.f32 %v2461_v47, %v5569_v37 }
 0x21d   : > { %v2503_v45 = vadd.f32 %v2469_v29, %v1954_v55  ;;  %v2532_v8 = vadd.f32 %v2531_v16, %v2501_v48  ;;  %v3446_v3 = vpack.c.bf16 %v2501_v48, %v2500_v51 }
 0x21f   : > { %v3451_v56 = vpack.c.bf16 %v2503_v45, %v2502_v53  ;;  %v2533_v10 = vadd.f32 %v2532_v8, %v2502_v53  ;;  %3468 = vst [vmem:[%s4253_s10 + $0x70] sm:$0xff] %v3446_v3  }
 0x221   : > { %3469 = vst [vmem:[%s4253_s10 + $0x78] sm:$0xff] %v3451_v56   ;;  %v2534_v32 = vadd.f32 %v2533_v10, %v2503_v45 }
 0x223   : > { %v2535_v30 = vrot.slane %v2534_v32, 4 }
 0x225   : > { %v2536_v4 = vadd.f32 %v2535_v30, %v2534_v32 }
 0x227   : > { %v2537_v52 = vrot.slane %v2536_v4, 2 }
 0x229   : > { %v2538_v54 = vadd.f32 %v2537_v52, %v2536_v4 }
 0x22b   : > { %v2539_v9 = vrot.slane %v2538_v54, 1 }
 0x22d   : > { %v2540_v43 = vadd.f32 %v2539_v9, %v2538_v54 }
 0x22f   : > { %v2541_v57 = vmul.f32 0.00390625, %v2540_v43  ;;  %2643 = vst [vmem:[%s269_s29] sm:$0x1] %v2540_v43 }
 0x231   : > { %v2550_v61 = vsub.f32 %v5325_v58, %v2541_v57  ;;  %v2551_v38 = vsub.f32 %v5337_v63, %v2541_v57  ;;  %v2552_v7 = vsub.f32 %v5320_v17, %v2541_v57  ;;  %v2553_v25 = vsub.f32 %v5329_v28, %v2541_v57 }
 0x232   : > { %v2554_v0 = vsub.f32 %v5355_v15, %v2541_v57  ;;  %v2555_v13 = vsub.f32 %v5367_v42, %v2541_v57  ;;  %v2556_v34 = vsub.f32 %v5352_v24, %v2541_v57  ;;  %v2557_v23 = vsub.f32 %v5359_v27, %v2541_v57 }
 0x233   : > { %v2558_v49 = vsub.f32 %v5385_v26, %v2541_v57  ;;  %v2559_v60 = vsub.f32 %v5395_v14, %v2541_v57  ;;  %v2560_v58 = vsub.f32 %v5382_v39, %v2541_v57  ;;  %v2561_v63 = vsub.f32 %v5389_v40, %v2541_v57 }
 0x234   : > { %v2562_v17 = vsub.f32 %v5411_v6, %v2541_v57  ;;  %v2563_v28 = vsub.f32 %v5421_v5, %v2541_v57  ;;  %v2564_v15 = vsub.f32 %v5408_v11, %v2541_v57  ;;  %v2565_v42 = vsub.f32 %v5415_v22, %v2541_v57 }
 0x235   : > { %v2566_v24 = vsub.f32 %v5433_v1, %v2541_v57  ;;  %v5478_v62 = vsub.f32 %v2497_v46, %v2541_v57  ;;  %v5481_v27 = vsub.f32 %v5430_v33, %v2541_v57  ;;  %v5484_v26 = vsub.f32 %v5437_v19, %v2541_v57 }
 0x236   : > { %v5486_v39 = vsub.f32 %v2500_v51, %v2541_v57  ;;  %v5488_v40 = vsub.f32 %v2501_v48, %v2541_v57  ;;  %v5490_v14 = vsub.f32 %v2502_v53, %v2541_v57  ;;  %v5492_v6 = vsub.f32 %v2503_v45, %v2541_v57 }
 0x237   : > { %v2542_v11 = vsub.f32 %v5245_v20, %v2541_v57  ;;  %v2543_v22 = vsub.f32 %v5262_v50, %v2541_v57  ;;  %v2544_v5 = vsub.f32 %v5250_v36, %v2541_v57  ;;  %v2545_v46 = vsub.f32 %v5253_v2, %v2541_v57 }
 0x238   : > { %v2546_v19 = vsub.f32 %v5287_v31, %v2541_v57  ;;  %v2547_v18 = vsub.f32 %v5301_v21, %v2541_v57  ;;  %v2548_v44 = vsub.f32 %v5282_v41, %v2541_v57  ;;  %v2549_v50 = vsub.f32 %v5291_v59, %v2541_v57 }
 0x239   : > { %v2574_v1 = vmul.f32 %v2542_v11, %v2542_v11  ;;  %v2575_v33 = vmul.f32 %v2543_v22, %v2543_v22  ;;  %v2576_v51 = vmul.f32 %v2544_v5, %v2544_v5  ;;  %v2577_v12 = vmul.f32 %v2545_v46, %v2545_v46 }
 0x23a   : > { %v2578_v55 = vmul.f32 %v2546_v19, %v2546_v19  ;;  %v2579_v16 = vmul.f32 %v2547_v18, %v2547_v18  ;;  %v2580_v29 = vmul.f32 %v2548_v44, %v2548_v44  ;;  %v2581_v48 = vmul.f32 %v2549_v50, %v2549_v50 }
 0x23b   : > { %v2606_v47 = vadd.f32 %v2575_v33, %v2574_v1  ;;  %v2582_v53 = vmul.f32 %v2550_v61, %v2550_v61  ;;  %v2583_v45 = vmul.f32 %v2551_v38, %v2551_v38  ;;  %v2584_v3 = vmul.f32 %v2552_v7, %v2552_v7 }
 0x23c   : > { %v2585_v56 = vmul.f32 %v2553_v25, %v2553_v25  ;;  %v2586_v32 = vmul.f32 %v2554_v0, %v2554_v0  ;;  %v2587_v30 = vmul.f32 %v2555_v13, %v2555_v13  ;;  %v2588_v52 = vmul.f32 %v2556_v34, %v2556_v34 }
 0x23d   : > { %v2607_v35 = vadd.f32 %v2606_v47, %v2576_v51  ;;  %v2589_v54 = vmul.f32 %v2557_v23, %v2557_v23  ;;  %v2590_v43 = vmul.f32 %v2558_v49, %v2558_v49  ;;  %v2591_v11 = vmul.f32 %v2559_v60, %v2559_v60 }
 0x23e   : > { %v2592_v61 = vmul.f32 %v2560_v58, %v2560_v58  ;;  %v2593_v38 = vmul.f32 %v2561_v63, %v2561_v63  ;;  %v2594_v7 = vmul.f32 %v2562_v17, %v2562_v17  ;;  %v2595_v25 = vmul.f32 %v2563_v28, %v2563_v28 }
 0x23f   : > { %v2608_v20 = vadd.f32 %v2607_v35, %v2577_v12  ;;  %v2596_v0 = vmul.f32 %v2564_v15, %v2564_v15  ;;  %v2597_v13 = vmul.f32 %v2565_v42, %v2565_v42  ;;  %v2598_v34 = vmul.f32 %v2566_v24, %v2566_v24 }
 0x240   : > { %v2599_v23 = vmul.f32 %v5478_v62, %v5478_v62  ;;  %v2600_v60 = vmul.f32 %v5481_v27, %v5481_v27  ;;  %v2601_v63 = vmul.f32 %v5484_v26, %v5484_v26  ;;  %v2602_v28 = vmul.f32 %v5486_v39, %v5486_v39 }
 0x241   : > { %v2609_v36 = vadd.f32 %v2608_v20, %v2578_v55  ;;  %v2603_v42 = vmul.f32 %v5488_v40, %v5488_v40  ;;  %v2604_v62 = vmul.f32 %v5490_v14, %v5490_v14  ;;  %v2605_v27 = vmul.f32 %v5492_v6, %v5492_v6 }
 0x243   : > { %v2610_v37 = vadd.f32 %v2609_v36, %v2579_v16 }
 0x245   : > { %v2611_v2 = vadd.f32 %v2610_v37, %v2580_v29 }
 0x247   : > { %v2612_v31 = vadd.f32 %v2611_v2, %v2581_v48 }
 0x249   : > { %v2613_v8 = vadd.f32 %v2612_v31, %v2582_v53 }
 0x24b   : > { %v2614_v21 = vadd.f32 %v2613_v8, %v2583_v45 }
 0x24d   : > { %v2615_v10 = vadd.f32 %v2614_v21, %v2584_v3 }
 0x24f   : > { %v2616_v41 = vadd.f32 %v2615_v10, %v2585_v56 }
 0x251   : > { %v2617_v4 = vadd.f32 %v2616_v41, %v2586_v32 }
 0x253   : > { %v2618_v59 = vadd.f32 %v2617_v4, %v2587_v30 }
 0x255   : > { %v2619_v9 = vadd.f32 %v2618_v59, %v2588_v52 }
 0x257   : > { %v2620_v57 = vadd.f32 %v2619_v9, %v2589_v54 }
 0x259   : > { %v2621_v22 = vadd.f32 %v2620_v57, %v2590_v43 }
 0x25b   : > { %v2622_v5 = vadd.f32 %v2621_v22, %v2591_v11 }
 0x25d   : > { %v2623_v1 = vadd.f32 %v2622_v5, %v2592_v61 }
 0x25f   : > { %v2624_v33 = vadd.f32 %v2623_v1, %v2593_v38 }
 0x261   : > { %v2625_v46 = vadd.f32 %v2624_v33, %v2594_v7 }
 0x263   : > { %v2626_v19 = vadd.f32 %v2625_v46, %v2595_v25 }
 0x265   : > { %v2627_v51 = vadd.f32 %v2626_v19, %v2596_v0 }
 0x267   : > { %v2628_v47 = vadd.f32 %v2627_v51, %v2597_v13 }
 0x269   : > { %v2629_v49 = vadd.f32 %v2628_v47, %v2598_v34 }
 0x26b   : > { %v2630_v58 = vadd.f32 %v2629_v49, %v2599_v23 }
 0x26d   : > { %v2631_v17 = vadd.f32 %v2630_v58, %v2600_v60 }
 0x26f   : > { %v2632_v15 = vadd.f32 %v2631_v17, %v2601_v63 }
 0x271   : > { %v2633_v24 = vadd.f32 %v2632_v15, %v2602_v28 }
 0x273   : > { %v2634_v18 = vadd.f32 %v2633_v24, %v2603_v42 }
 0x275   : > { %v2635_v12 = vadd.f32 %v2634_v18, %v2604_v62 }
 0x277   : > { %v2636_v35 = vadd.f32 %v2635_v12, %v2605_v27 }
 0x279   : > { %v2637_v26 = vrot.slane %v2636_v35, 4 }
 0x27b   : > { %v2638_v44 = vadd.f32 %v2637_v26, %v2636_v35 }
 0x27d   : > { %v2639_v55 = vrot.slane %v2638_v44, 2 }
 0x27f   : > { %v2640_v20 = vadd.f32 %v2639_v55, %v2638_v44 }
 0x281   : > { %v2641_v50 = vrot.slane %v2640_v20, 1 }
 0x283   : > { %v2642_v39 = vadd.f32 %v2641_v50, %v2640_v20 }
 0x285   : > { %2644 = vst [vmem:[%s275_s13] sm:$0x1] %v2642_v39 }
 0x286 PF: > { %s16_s20 = sadd.s32 1, %s4182_s20   ;;  %s5570_s18 = smov %s4178_s19 }
 0x287   : > { %p13_p5 = scmp.ge.s32.totalorder %s16_s20, 4   ;;  %s5571_s19 = smov %s5573_s21 }
 0x289   :  { %15 = sbr.rel (!%p13_p5) target bundleno = 2 (0x2), region = 278 }
 0x28e   :  { %2873 = vsyncmov [#allocation3] }
 0x291   :  { %s2874_s11 = vpop.sfrf %2873 }
 0x292   :  { %p3320_p6 = scmp.ne.s32.totalorder %s2874_s11, 0 }
 0x294   :  { %2878 = shalt.err (%p3320_p6)  }
 0x295   :  { %2880 = vsyncmov [#allocation3 + $0x1] }
 0x298   :  { %s2881_s12 = vpop.sfrf %2880 }
 0x299   :  { %p3321_p7 = scmp.ne.s32.totalorder %s2881_s12, 0 }
 0x29b   :  { %2885 = shalt.err (%p3321_p7)  }
 0x29c   :  { %2887 = vsyncmov [#allocation3 + $0x2] }
 0x29f   :  { %s2888_s13 = vpop.sfrf %2887 }
 0x2a0   :  { %p3322_p8 = scmp.ne.s32.totalorder %s2888_s13, 0 }
 0x2a2   :  { %2892 = shalt.err (%p3322_p8)  }
 0x2a3   :  { %2894 = vsyncmov [#allocation3 + $0x3] }
 0x2a6   :  { %s2895_s14 = vpop.sfrf %2894 }
 0x2a7   :  { %p3323_p9 = scmp.ne.s32.totalorder %s2895_s14, 0 }
 0x2a9   :  { %2899 = shalt.err (%p3323_p9)  }

</bundles_post_ra>
